<compile_context>
chip_gen: v5e
topology: v5e:2x2
jax: 0.10.0
libtpu: 0.0.40
codegen_flags: <defaults>
</compile_context>

<pallas_src>
import numpy as np
import jax
import jax.numpy as jnp
from jax import lax
from jax.experimental import pallas as pl
from jax.experimental.pallas import tpu as pltpu

EPS = 1e-5
LANE = 128                     # lane-padded logits width (10 -> 128)


# ------------------------------ small helpers --------------------------------

def _ceil8(n):
    return (n + 7) // 8 * 8


def _conv_out(n):              # Conv2d(k=3, stride=2, pad=1) output size
    return (n + 2 - 3) // 2 + 1


def _valid_taps(h, w):
    """3x3 taps that touch at least one valid input pixel (drop all-zero taps)."""
    ho, wo = _conv_out(h), _conv_out(w)
    taps = []
    for ki in range(3):
        for kj in range(3):
            ok_h = any(0 <= 2 * oh + ki - 1 < h for oh in range(ho))
            ok_w = any(0 <= 2 * ow + kj - 1 < w for ow in range(wo))
            if ok_h and ok_w:
                taps.append((ki, kj))
    return taps


def _gather_matrix(h, w, taps, nc, rows_in, rows_out):
    """0/1 row-gather matrix G (T*rows_out, rows_in).

    G @ act extracts, for each valid tap t, the input pixel feeding every
    (image, output-position) row.  Batch is folded into the rows
    (block-diagonal over images); all-zero rows implement both the conv's
    zero padding and the ceil8 row padding."""
    ho, wo = _conv_out(h), _conv_out(w)
    g = np.zeros((len(taps) * rows_out, rows_in), np.float32)
    for ti, (ki, kj) in enumerate(taps):
        for n in range(nc):
            for oh in range(ho):
                ih = 2 * oh + ki - 1
                if not 0 <= ih < h:
                    continue
                for ow in range(wo):
                    iw = 2 * ow + kj - 1
                    if not 0 <= iw < w:
                        continue
                    g[ti * rows_out + n * ho * wo + oh * wo + ow,
                      n * h * w + ih * w + iw] = 1.0
    return g


def _const_spec(a):
    # Full-array block with constant index map -> stays VMEM-resident.
    zeros = (0,) * a.ndim
    return pl.BlockSpec(a.shape, lambda i, _z=zeros: _z)


# ------------------------------ Pallas kernel ---------------------------------

def _make_kernel(layer_meta):
    """layer_meta: per conv layer dict(n_taps, rows_out) of static ints.

    Ref order: x_patches, [W1, s1, b1], [G, W, s, b] x3, P_pool, lin_w, lin_b, out
      x_patches : (rows1, 27)        bf16  layer-1 im2col slab (wrapper-built)
      G         : (T*rows_out, rows_in) bf16  0/1 gather matrix (layers 2-4)
      W         : (T*Cin, Cout)      bf16  tap-folded conv weights
      s, b      : (1, Cout)          f32   folded BN scale / bias
      P_pool    : (head_rows, rows4) f32   avg-pool + batch-row-pad matrix
      lin_w     : (512, 128)         f32   linear weight, zero-padded lanes
      lin_b     : (1, 128)           f32
      out       : (1, head_rows, 128) f32  lane-dense padded logits
    """
    def kernel(*refs):
        it = iter(refs)
        x_ref = next(it)
        act = None
        for li, lm in enumerate(layer_meta):
            if li == 0:
                w_ref, s_ref, b_ref = next(it), next(it), next(it)
                slab = x_ref[...]                              # (rows1, 27) bf16
            else:
                g_ref, w_ref, s_ref, b_ref = next(it), next(it), next(it), next(it)
                ab = act.astype(jnp.bfloat16)
                # one gather matmul per layer: exact 0/1 row selection (f32 exact)
                gathered = jnp.dot(g_ref[...], ab,
                                   preferred_element_type=jnp.float32)
                m = lm["rows_out"]
                slab = jnp.concatenate(
                    [gathered[t * m:(t + 1) * m, :] for t in range(lm["n_taps"])],
                    axis=1).astype(jnp.bfloat16)               # (rows_out, T*Cin)
            # ONE conv matmul per layer: taps folded into K, f32 accumulation
            y = jnp.dot(slab, w_ref[...], preferred_element_type=jnp.float32)
            # fused BatchNorm(inference) + ReLU epilogue, f32
            act = jnp.maximum(y * s_ref[...] + b_ref[...], 0.0)

        p_ref, lw_ref, lb_ref = next(it), next(it), next(it)
        o_ref = next(it)
        # AdaptiveAvgPool2d((1,1)) as a constant averaging matmul (also drops the
        # ceil8 padding rows and pads batch rows to 8), then the Linear head (f32).
        pooled = jnp.dot(p_ref[...], act, preferred_element_type=jnp.float32)
        logits = jnp.dot(pooled, lw_ref[...],
                         preferred_element_type=jnp.float32) + lb_ref[...]
        o_ref[0] = logits                                       # (head_rows, 128)
    return kernel


def fused_cnn_forward(x_patches, layers, head, meta):
    """x_patches: (n_chunks*rows1, 27) bf16 -> (n_chunks, head_rows, 128) f32."""
    n_chunks = meta["n_chunks"]
    rows1, k1 = layers[0]["rows_out"], int(layers[0]["W"].shape[0])
    head_rows = head["head_rows"]

    args = [x_patches]
    in_specs = [pl.BlockSpec((rows1, k1), lambda i: (i, 0))]
    for li, lay in enumerate(layers):
        if li > 0:
            args.append(lay["G"])
            in_specs.append(_const_spec(lay["G"]))
        for name in ("W", "scale", "bias"):
            args.append(lay[name])
            in_specs.append(_const_spec(lay[name]))
    for name in ("P", "lw", "lb"):
        args.append(head[name])
        in_specs.append(_const_spec(head[name]))

    layer_meta = [dict(n_taps=len(l["taps"]), rows_out=l["rows_out"]) for l in layers]
    kernel = _make_kernel(layer_meta)

    # advisory cost estimate
    flops = 0
    for li, lay in enumerate(layers):
        kk, cc = int(lay["W"].shape[0]), int(lay["W"].shape[1])
        if li > 0:
            gr, gc = int(lay["G"].shape[0]), int(lay["G"].shape[1])
            flops += 2 * gr * gc * int(lay["cin"])
        flops += 2 * lay["rows_out"] * kk * cc + 3 * lay["rows_out"] * cc
    flops += 2 * head_rows * int(head["P"].shape[1]) * int(head["lw"].shape[0])
    flops += 2 * head_rows * int(head["lw"].shape[0]) * LANE
    flops *= n_chunks
    bytes_accessed = int(sum(int(np.prod(a.shape)) * a.dtype.itemsize for a in args)
                         + n_chunks * head_rows * LANE * 4)

    return pl.pallas_call(
        kernel,
        out_shape=jax.ShapeDtypeStruct((n_chunks, head_rows, LANE), jnp.float32),
        grid=(n_chunks,),
        in_specs=in_specs,
        out_specs=pl.BlockSpec((1, head_rows, LANE), lambda i: (i, 0, 0)),
        compiler_params=pltpu.CompilerParams(
            dimension_semantics=("parallel",),
            vmem_limit_bytes=32 * 1024 * 1024),
        cost_estimate=pl.CostEstimate(flops=int(flops), transcendentals=0,
                                      bytes_accessed=bytes_accessed),
    )(*args)


# --------------------------- one-time parameter prep --------------------------

def prepare_params(conv_params, linear_params, h, w, batch, n_chunks=1):
    """BN folding, tap-folded bf16 weights, gather matrices, pool matrix,
    lane-padded Linear weights.  Hoisted out of the per-step forward."""
    assert batch % n_chunks == 0
    nc = batch // n_chunks

    layers = []
    cur_h, cur_w = h, w
    rows_in = None
    for li, p in enumerate(conv_params):
        cout, cin = int(p["w"].shape[0]), int(p["w"].shape[1])
        taps = _valid_taps(cur_h, cur_w)
        ho, wo = _conv_out(cur_h), _conv_out(cur_w)
        rows_out = _ceil8(nc * ho * wo)
        # tap-folded weight: (T*Cin, Cout), rows ordered (tap, cin)
        wsel = jnp.stack([p["w"][:, :, ki, kj] for (ki, kj) in taps], axis=0)
        wf = jnp.transpose(wsel, (0, 2, 1)).reshape(len(taps) * cin, cout)
        scale = p["gamma"] / jnp.sqrt(p["var"] + EPS)
        bias = p["beta"] + scale * (p["b"] - p["mean"])          # fold conv bias + BN
        layer = dict(
            taps=taps, cin=cin, cout=cout, rows_out=rows_out,
            W=wf.astype(jnp.bfloat16),
            scale=scale.reshape(1, cout).astype(jnp.float32),
            bias=bias.reshape(1, cout).astype(jnp.float32),
        )
        if li > 0:   # layer-1 im2col happens in the wrapper
            layer["G"] = jnp.asarray(
                _gather_matrix(cur_h, cur_w, taps, nc, rows_in, rows_out),
                jnp.bfloat16)
        layers.append(layer)
        rows_in = rows_out
        cur_h, cur_w = ho, wo

    # pooling matrix: (head_rows, rows_last); mean over spatial, zero for pad rows
    howo_last = cur_h * cur_w
    head_rows = _ceil8(nc)
    pp = np.zeros((head_rows, rows_in), np.float32)
    for n in range(nc):
        for s in range(howo_last):
            pp[n, n * howo_last + s] = 1.0 / howo_last

    lw, lb = linear_params                                       # (10, 512), (10,)
    ncls, feat = int(lw.shape[0]), int(lw.shape[1])
    lw_pad = jnp.zeros((feat, LANE), jnp.float32).at[:, :ncls].set(jnp.asarray(lw).T)
    lb_pad = jnp.zeros((1, LANE), jnp.float32).at[0, :ncls].set(jnp.asarray(lb))

    head = dict(P=jnp.asarray(pp), lw=lw_pad, lb=lb_pad,
                head_rows=head_rows, num_classes=ncls)
    meta = dict(nc=nc, n_chunks=n_chunks, h=h, w=w)
    return layers, head, meta


# ------------------------------- forward pass ---------------------------------

def _im2col_layer1(x_nchw, taps, nc, n_chunks, rows_out):
    """Plain-XLA im2col for layer 1: (N,3,H,W) -> (n_chunks*rows1, T*3) bf16,
    rows ordered (chunk, image, oh, ow), columns ordered (tap, cin)."""
    n, c, h, w = x_nchw.shape
    ho, wo = _conv_out(h), _conv_out(w)
    xp = jnp.pad(x_nchw.astype(jnp.float32), ((0, 0), (0, 0), (1, 1), (1, 1)))
    cols = []
    for (ki, kj) in taps:
        cols.append(lax.slice(
            xp, (0, 0, ki, kj),
            (n, c, ki + 2 * (ho - 1) + 1, kj + 2 * (wo - 1) + 1),
            (1, 1, 2, 2)))                                       # (N, C, Ho, Wo)
    p = jnp.stack(cols, axis=1)                                  # (N, T, C, Ho, Wo)
    p = jnp.transpose(p, (0, 3, 4, 1, 2))                        # (N, Ho, Wo, T, C)
    p = p.reshape(n_chunks, nc * ho * wo, len(taps) * c)
    pad_rows = rows_out - nc * ho * wo
    if pad_rows:
        p = jnp.pad(p, ((0, 0), (0, pad_rows), (0, 0)))
    return p.reshape(n_chunks * rows_out, len(taps) * c).astype(jnp.bfloat16)


def model_forward(x_nchw, layers, head, meta):
    n = int(x_nchw.shape[0])
    patches = _im2col_layer1(x_nchw, layers[0]["taps"], meta["nc"],
                             meta["n_chunks"], layers[0]["rows_out"])
    out = fused_cnn_forward(patches, layers, head, meta)   # (chunks, head_rows, 128)
    out = out[:, :meta["nc"], :head["num_classes"]]
    return out.reshape(n, head["num_classes"])


# -------------------------- params & reference model --------------------------

def init_params(key):
    chans = [(3, 64), (64, 128), (128, 256), (256, 512)]
    conv_params = []
    for cin, cout in chans:
        key, k1, k2, k3, k4, k5, k6 = jax.random.split(key, 7)
        conv_params.append(dict(
            w=jax.random.normal(k1, (cout, cin, 3, 3), jnp.float32)
              * (1.0 / np.sqrt(9 * cin)),
            b=0.1 * jax.random.normal(k2, (cout,), jnp.float32),
            gamma=1.0 + 0.1 * jax.random.normal(k3, (cout,), jnp.float32),
            beta=0.1 * jax.random.normal(k4, (cout,), jnp.float32),
            mean=0.1 * jax.random.normal(k5, (cout,), jnp.float32),
            var=jnp.abs(jax.random.normal(k6, (cout,), jnp.float32)) + 0.5,
        ))
    key, k1, k2 = jax.random.split(key, 3)
    lw = jax.random.normal(k1, (10, 512), jnp.float32) * (1.0 / np.sqrt(512.0))
    lb = 0.1 * jax.random.normal(k2, (10,), jnp.float32)
    return conv_params, (lw, lb)


def reference_forward(x_nchw, conv_params, linear_params):
    # Pure-JAX reference (XLA conv) matching the kernel's numerics: bf16 conv
    # operands, f32 accumulation, BN/ReLU/pool/Linear in f32.
    x = x_nchw.astype(jnp.float32)
    for p in conv_params:
        y = lax.conv_general_dilated(
            x.astype(jnp.bfloat16), p["w"].astype(jnp.bfloat16),
            window_strides=(2, 2), padding=((1, 1), (1, 1)),
            dimension_numbers=("NCHW", "OIHW", "NCHW"),
            preferred_element_type=jnp.float32)
        y = y + p["b"][None, :, None, None]
        y = (y - p["mean"][None, :, None, None]) / jnp.sqrt(
            p["var"][None, :, None, None] + EPS)
        y = y * p["gamma"][None, :, None, None] + p["beta"][None, :, None, None]
        x = jnp.maximum(y, 0.0)
    pooled = jnp.mean(x, axis=(2, 3))
    lw, lb = linear_params
    return pooled @ lw.T + lb


# ----------------------------------- main --------------------------------------

if __name__ == "__main__":
    key = jax.random.PRNGKey(0)
    key, kx, kp = jax.random.split(key, 3)

    x = jax.random.normal(kx, (2, 3, 16, 16), jnp.float32)       # NCHW, like PyTorch
    conv_params, linear_params = init_params(kp)

    # one-time parameter prep; n_chunks=1 -> single fat grid step (v5e/v6e have
    # one TensorCore); set n_chunks=2 on v7x to shard the batch across both TCs.
    layers, head, meta = prepare_params(conv_params, linear_params, 16, 16,
                                        batch=2, n_chunks=1)

    fwd = jax.jit(lambda xx: model_forward(xx, layers, head, meta))
    out = jax.block_until_ready(fwd(x))
    assert out.shape == (2, 10) and out.dtype == jnp.float32

    ref = jax.block_until_ready(reference_forward(x, conv_params, linear_params))
    np.testing.assert_allclose(np.asarray(out), np.asarray(ref),
                               rtol=2e-3, atol=2e-3)

    print("KERNEL_OK")
</pallas_src>

<mosaic_0001>
module attributes {stable_mosaic.version = 11 : i64} {
  func.func @kernel(%arg0: i32, %arg1: memref<128x27xbf16, #tpu.memory_space<vmem>>, %arg2: memref<27x64xbf16, #tpu.memory_space<vmem>>, %arg3: memref<1x64xf32, #tpu.memory_space<vmem>>, %arg4: memref<1x64xf32, #tpu.memory_space<vmem>>, %arg5: memref<288x128xbf16, #tpu.memory_space<vmem>>, %arg6: memref<576x128xbf16, #tpu.memory_space<vmem>>, %arg7: memref<1x128xf32, #tpu.memory_space<vmem>>, %arg8: memref<1x128xf32, #tpu.memory_space<vmem>>, %arg9: memref<72x32xbf16, #tpu.memory_space<vmem>>, %arg10: memref<1152x256xbf16, #tpu.memory_space<vmem>>, %arg11: memref<1x256xf32, #tpu.memory_space<vmem>>, %arg12: memref<1x256xf32, #tpu.memory_space<vmem>>, %arg13: memref<32x8xbf16, #tpu.memory_space<vmem>>, %arg14: memref<1024x512xbf16, #tpu.memory_space<vmem>>, %arg15: memref<1x512xf32, #tpu.memory_space<vmem>>, %arg16: memref<1x512xf32, #tpu.memory_space<vmem>>, %arg17: memref<8x8xf32, #tpu.memory_space<vmem>>, %arg18: memref<512x128xf32, #tpu.memory_space<vmem>>, %arg19: memref<1x128xf32, #tpu.memory_space<vmem>>, %arg20: memref<1x8x128xf32, #tpu.memory_space<vmem>>) attributes {dimension_semantics = [#tpu.dimension_semantics<parallel>], iteration_bounds = array<i64: 1>, scalar_prefetch = 0 : i64, scratch_operands = 0 : i64, tpu.core_type = #tpu.core_type<tc>, window_params = [{transform_indices = @transform_0, window_bounds = array<i64: 128, 27>}, {pipeline_mode = #tpu.pipeline_mode<synchronous>, transform_indices = @transform_1, window_bounds = array<i64: 27, 64>}, {pipeline_mode = #tpu.pipeline_mode<synchronous>, transform_indices = @transform_2, window_bounds = array<i64: 1, 64>}, {pipeline_mode = #tpu.pipeline_mode<synchronous>, transform_indices = @transform_3, window_bounds = array<i64: 1, 64>}, {pipeline_mode = #tpu.pipeline_mode<synchronous>, transform_indices = @transform_4, window_bounds = array<i64: 288, 128>}, {pipeline_mode = #tpu.pipeline_mode<synchronous>, transform_indices = @transform_5, window_bounds = array<i64: 576, 128>}, {pipeline_mode = #tpu.pipeline_mode<synchronous>, transform_indices = @transform_6, window_bounds = array<i64: 1, 128>}, {pipeline_mode = #tpu.pipeline_mode<synchronous>, transform_indices = @transform_7, window_bounds = array<i64: 1, 128>}, {pipeline_mode = #tpu.pipeline_mode<synchronous>, transform_indices = @transform_8, window_bounds = array<i64: 72, 32>}, {pipeline_mode = #tpu.pipeline_mode<synchronous>, transform_indices = @transform_9, window_bounds = array<i64: 1152, 256>}, {pipeline_mode = #tpu.pipeline_mode<synchronous>, transform_indices = @transform_10, window_bounds = array<i64: 1, 256>}, {pipeline_mode = #tpu.pipeline_mode<synchronous>, transform_indices = @transform_11, window_bounds = array<i64: 1, 256>}, {pipeline_mode = #tpu.pipeline_mode<synchronous>, transform_indices = @transform_12, window_bounds = array<i64: 32, 8>}, {pipeline_mode = #tpu.pipeline_mode<synchronous>, transform_indices = @transform_13, window_bounds = array<i64: 1024, 512>}, {pipeline_mode = #tpu.pipeline_mode<synchronous>, transform_indices = @transform_14, window_bounds = array<i64: 1, 512>}, {pipeline_mode = #tpu.pipeline_mode<synchronous>, transform_indices = @transform_15, window_bounds = array<i64: 1, 512>}, {pipeline_mode = #tpu.pipeline_mode<synchronous>, transform_indices = @transform_16, window_bounds = array<i64: 8, 8>}, {pipeline_mode = #tpu.pipeline_mode<synchronous>, transform_indices = @transform_17, window_bounds = array<i64: 512, 128>}, {pipeline_mode = #tpu.pipeline_mode<synchronous>, transform_indices = @transform_18, window_bounds = array<i64: 1, 128>}, {transform_indices = @transform_19, window_bounds = array<i64: 1, 8, 128>}]} {
    %c0 = arith.constant 0 : index
    %c0_0 = arith.constant 0 : index
    %0 = vector.load %arg1[%c0, %c0_0] : memref<128x27xbf16, #tpu.memory_space<vmem>>, vector<128x27xbf16>
    %c0_1 = arith.constant 0 : index
    %c0_2 = arith.constant 0 : index
    %1 = vector.load %arg2[%c0_1, %c0_2] : memref<27x64xbf16, #tpu.memory_space<vmem>>, vector<27x64xbf16>
    %cst = arith.constant dense<0.000000e+00> : vector<128x64xf32>
    %2 = tpu.matmul %0, %1, %cst {dimension_numbers = #tpu.dot_dimension_numbers<[1], [0], [0], [1], [0, 0, 1, 1], [], []>} : vector<128x27xbf16>, vector<27x64xbf16>, vector<128x64xf32> -> vector<128x64xf32>
    %c0_3 = arith.constant 0 : index
    %c0_4 = arith.constant 0 : index
    %3 = vector.load %arg3[%c0_3, %c0_4] : memref<1x64xf32, #tpu.memory_space<vmem>>, vector<1x64xf32>
    %4 = vector.broadcast %3 : vector<1x64xf32> to vector<128x64xf32>
    %5 = arith.mulf %2, %4 : vector<128x64xf32>
    %c0_5 = arith.constant 0 : index
    %c0_6 = arith.constant 0 : index
    %6 = vector.load %arg4[%c0_5, %c0_6] : memref<1x64xf32, #tpu.memory_space<vmem>>, vector<1x64xf32>
    %7 = vector.broadcast %6 : vector<1x64xf32> to vector<128x64xf32>
    %8 = arith.addf %5, %7 : vector<128x64xf32>
    %cst_7 = arith.constant 0.000000e+00 : f32
    %9 = vector.broadcast %cst_7 : f32 to vector<128x64xf32>
    %10 = arith.maximumf %8, %9 : vector<128x64xf32>
    %11 = arith.truncf %10 : vector<128x64xf32> to vector<128x64xbf16>
    %c0_8 = arith.constant 0 : index
    %c0_9 = arith.constant 0 : index
    %12 = vector.load %arg5[%c0_8, %c0_9] : memref<288x128xbf16, #tpu.memory_space<vmem>>, vector<288x128xbf16>
    %cst_10 = arith.constant dense<0.000000e+00> : vector<288x64xf32>
    %13 = tpu.matmul %12, %11, %cst_10 {dimension_numbers = #tpu.dot_dimension_numbers<[1], [0], [0], [1], [0, 0, 1, 1], [], []>} : vector<288x128xbf16>, vector<128x64xbf16>, vector<288x64xf32> -> vector<288x64xf32>
    %14 = vector.extract_strided_slice %13 {offsets = [0, 0], sizes = [32, 64], strides = [1, 1]} : vector<288x64xf32> to vector<32x64xf32>
    %15 = vector.extract_strided_slice %13 {offsets = [32, 0], sizes = [32, 64], strides = [1, 1]} : vector<288x64xf32> to vector<32x64xf32>
    %16 = vector.extract_strided_slice %13 {offsets = [64, 0], sizes = [32, 64], strides = [1, 1]} : vector<288x64xf32> to vector<32x64xf32>
    %17 = vector.extract_strided_slice %13 {offsets = [96, 0], sizes = [32, 64], strides = [1, 1]} : vector<288x64xf32> to vector<32x64xf32>
    %18 = vector.extract_strided_slice %13 {offsets = [128, 0], sizes = [32, 64], strides = [1, 1]} : vector<288x64xf32> to vector<32x64xf32>
    %19 = vector.extract_strided_slice %13 {offsets = [160, 0], sizes = [32, 64], strides = [1, 1]} : vector<288x64xf32> to vector<32x64xf32>
    %20 = vector.extract_strided_slice %13 {offsets = [192, 0], sizes = [32, 64], strides = [1, 1]} : vector<288x64xf32> to vector<32x64xf32>
    %21 = vector.extract_strided_slice %13 {offsets = [224, 0], sizes = [32, 64], strides = [1, 1]} : vector<288x64xf32> to vector<32x64xf32>
    %22 = vector.extract_strided_slice %13 {offsets = [256, 0], sizes = [32, 64], strides = [1, 1]} : vector<288x64xf32> to vector<32x64xf32>
    %23 = tpu.concatenate %14, %15, %16, %17, %18, %19, %20, %21, %22 in 1 : vector<32x64xf32>, vector<32x64xf32>, vector<32x64xf32>, vector<32x64xf32>, vector<32x64xf32>, vector<32x64xf32>, vector<32x64xf32>, vector<32x64xf32>, vector<32x64xf32> -> vector<32x576xf32>
    %24 = arith.truncf %23 : vector<32x576xf32> to vector<32x576xbf16>
    %c0_11 = arith.constant 0 : index
    %c0_12 = arith.constant 0 : index
    %25 = vector.load %arg6[%c0_11, %c0_12] : memref<576x128xbf16, #tpu.memory_space<vmem>>, vector<576x128xbf16>
    %cst_13 = arith.constant dense<0.000000e+00> : vector<32x128xf32>
    %26 = tpu.matmul %24, %25, %cst_13 {dimension_numbers = #tpu.dot_dimension_numbers<[1], [0], [0], [1], [0, 0, 1, 1], [], []>} : vector<32x576xbf16>, vector<576x128xbf16>, vector<32x128xf32> -> vector<32x128xf32>
    %c0_14 = arith.constant 0 : index
    %c0_15 = arith.constant 0 : index
    %27 = vector.load %arg7[%c0_14, %c0_15] : memref<1x128xf32, #tpu.memory_space<vmem>>, vector<1x128xf32>
    %28 = vector.broadcast %27 : vector<1x128xf32> to vector<32x128xf32>
    %29 = arith.mulf %26, %28 : vector<32x128xf32>
    %c0_16 = arith.constant 0 : index
    %c0_17 = arith.constant 0 : index
    %30 = vector.load %arg8[%c0_16, %c0_17] : memref<1x128xf32, #tpu.memory_space<vmem>>, vector<1x128xf32>
    %31 = vector.broadcast %30 : vector<1x128xf32> to vector<32x128xf32>
    %32 = arith.addf %29, %31 : vector<32x128xf32>
    %cst_18 = arith.constant 0.000000e+00 : f32
    %33 = vector.broadcast %cst_18 : f32 to vector<32x128xf32>
    %34 = arith.maximumf %32, %33 : vector<32x128xf32>
    %35 = arith.truncf %34 : vector<32x128xf32> to vector<32x128xbf16>
    %c0_19 = arith.constant 0 : index
    %c0_20 = arith.constant 0 : index
    %36 = vector.load %arg9[%c0_19, %c0_20] : memref<72x32xbf16, #tpu.memory_space<vmem>>, vector<72x32xbf16>
    %cst_21 = arith.constant dense<0.000000e+00> : vector<72x128xf32>
    %37 = tpu.matmul %36, %35, %cst_21 {dimension_numbers = #tpu.dot_dimension_numbers<[1], [0], [0], [1], [0, 0, 1, 1], [], []>} : vector<72x32xbf16>, vector<32x128xbf16>, vector<72x128xf32> -> vector<72x128xf32>
    %38 = vector.extract_strided_slice %37 {offsets = [0, 0], sizes = [8, 128], strides = [1, 1]} : vector<72x128xf32> to vector<8x128xf32>
    %39 = vector.extract_strided_slice %37 {offsets = [8, 0], sizes = [8, 128], strides = [1, 1]} : vector<72x128xf32> to vector<8x128xf32>
    %40 = vector.extract_strided_slice %37 {offsets = [16, 0], sizes = [8, 128], strides = [1, 1]} : vector<72x128xf32> to vector<8x128xf32>
    %41 = vector.extract_strided_slice %37 {offsets = [24, 0], sizes = [8, 128], strides = [1, 1]} : vector<72x128xf32> to vector<8x128xf32>
    %42 = vector.extract_strided_slice %37 {offsets = [32, 0], sizes = [8, 128], strides = [1, 1]} : vector<72x128xf32> to vector<8x128xf32>
    %43 = vector.extract_strided_slice %37 {offsets = [40, 0], sizes = [8, 128], strides = [1, 1]} : vector<72x128xf32> to vector<8x128xf32>
    %44 = vector.extract_strided_slice %37 {offsets = [48, 0], sizes = [8, 128], strides = [1, 1]} : vector<72x128xf32> to vector<8x128xf32>
    %45 = vector.extract_strided_slice %37 {offsets = [56, 0], sizes = [8, 128], strides = [1, 1]} : vector<72x128xf32> to vector<8x128xf32>
    %46 = vector.extract_strided_slice %37 {offsets = [64, 0], sizes = [8, 128], strides = [1, 1]} : vector<72x128xf32> to vector<8x128xf32>
    %47 = tpu.concatenate %38, %39, %40, %41, %42, %43, %44, %45, %46 in 1 : vector<8x128xf32>, vector<8x128xf32>, vector<8x128xf32>, vector<8x128xf32>, vector<8x128xf32>, vector<8x128xf32>, vector<8x128xf32>, vector<8x128xf32>, vector<8x128xf32> -> vector<8x1152xf32>
    %48 = arith.truncf %47 : vector<8x1152xf32> to vector<8x1152xbf16>
    %c0_22 = arith.constant 0 : index
    %c0_23 = arith.constant 0 : index
    %49 = vector.load %arg10[%c0_22, %c0_23] : memref<1152x256xbf16, #tpu.memory_space<vmem>>, vector<1152x256xbf16>
    %cst_24 = arith.constant dense<0.000000e+00> : vector<8x256xf32>
    %50 = tpu.matmul %48, %49, %cst_24 {dimension_numbers = #tpu.dot_dimension_numbers<[1], [0], [0], [1], [0, 0, 1, 1], [], []>} : vector<8x1152xbf16>, vector<1152x256xbf16>, vector<8x256xf32> -> vector<8x256xf32>
    %c0_25 = arith.constant 0 : index
    %c0_26 = arith.constant 0 : index
    %51 = vector.load %arg11[%c0_25, %c0_26] : memref<1x256xf32, #tpu.memory_space<vmem>>, vector<1x256xf32>
    %52 = vector.broadcast %51 : vector<1x256xf32> to vector<8x256xf32>
    %53 = arith.mulf %50, %52 : vector<8x256xf32>
    %c0_27 = arith.constant 0 : index
    %c0_28 = arith.constant 0 : index
    %54 = vector.load %arg12[%c0_27, %c0_28] : memref<1x256xf32, #tpu.memory_space<vmem>>, vector<1x256xf32>
    %55 = vector.broadcast %54 : vector<1x256xf32> to vector<8x256xf32>
    %56 = arith.addf %53, %55 : vector<8x256xf32>
    %cst_29 = arith.constant 0.000000e+00 : f32
    %57 = vector.broadcast %cst_29 : f32 to vector<8x256xf32>
    %58 = arith.maximumf %56, %57 : vector<8x256xf32>
    %59 = arith.truncf %58 : vector<8x256xf32> to vector<8x256xbf16>
    %c0_30 = arith.constant 0 : index
    %c0_31 = arith.constant 0 : index
    %60 = vector.load %arg13[%c0_30, %c0_31] : memref<32x8xbf16, #tpu.memory_space<vmem>>, vector<32x8xbf16>
    %cst_32 = arith.constant dense<0.000000e+00> : vector<32x256xf32>
    %61 = tpu.matmul %60, %59, %cst_32 {dimension_numbers = #tpu.dot_dimension_numbers<[1], [0], [0], [1], [0, 0, 1, 1], [], []>} : vector<32x8xbf16>, vector<8x256xbf16>, vector<32x256xf32> -> vector<32x256xf32>
    %62 = vector.extract_strided_slice %61 {offsets = [0, 0], sizes = [8, 256], strides = [1, 1]} : vector<32x256xf32> to vector<8x256xf32>
    %63 = vector.extract_strided_slice %61 {offsets = [8, 0], sizes = [8, 256], strides = [1, 1]} : vector<32x256xf32> to vector<8x256xf32>
    %64 = vector.extract_strided_slice %61 {offsets = [16, 0], sizes = [8, 256], strides = [1, 1]} : vector<32x256xf32> to vector<8x256xf32>
    %65 = vector.extract_strided_slice %61 {offsets = [24, 0], sizes = [8, 256], strides = [1, 1]} : vector<32x256xf32> to vector<8x256xf32>
    %66 = tpu.concatenate %62, %63, %64, %65 in 1 : vector<8x256xf32>, vector<8x256xf32>, vector<8x256xf32>, vector<8x256xf32> -> vector<8x1024xf32>
    %67 = arith.truncf %66 : vector<8x1024xf32> to vector<8x1024xbf16>
    %c0_33 = arith.constant 0 : index
    %c0_34 = arith.constant 0 : index
    %68 = vector.load %arg14[%c0_33, %c0_34] : memref<1024x512xbf16, #tpu.memory_space<vmem>>, vector<1024x512xbf16>
    %cst_35 = arith.constant dense<0.000000e+00> : vector<8x512xf32>
    %69 = tpu.matmul %67, %68, %cst_35 {dimension_numbers = #tpu.dot_dimension_numbers<[1], [0], [0], [1], [0, 0, 1, 1], [], []>} : vector<8x1024xbf16>, vector<1024x512xbf16>, vector<8x512xf32> -> vector<8x512xf32>
    %c0_36 = arith.constant 0 : index
    %c0_37 = arith.constant 0 : index
    %70 = vector.load %arg15[%c0_36, %c0_37] : memref<1x512xf32, #tpu.memory_space<vmem>>, vector<1x512xf32>
    %71 = vector.broadcast %70 : vector<1x512xf32> to vector<8x512xf32>
    %72 = arith.mulf %69, %71 : vector<8x512xf32>
    %c0_38 = arith.constant 0 : index
    %c0_39 = arith.constant 0 : index
    %73 = vector.load %arg16[%c0_38, %c0_39] : memref<1x512xf32, #tpu.memory_space<vmem>>, vector<1x512xf32>
    %74 = vector.broadcast %73 : vector<1x512xf32> to vector<8x512xf32>
    %75 = arith.addf %72, %74 : vector<8x512xf32>
    %cst_40 = arith.constant 0.000000e+00 : f32
    %76 = vector.broadcast %cst_40 : f32 to vector<8x512xf32>
    %77 = arith.maximumf %75, %76 : vector<8x512xf32>
    %c0_41 = arith.constant 0 : index
    %c0_42 = arith.constant 0 : index
    %78 = vector.load %arg17[%c0_41, %c0_42] : memref<8x8xf32, #tpu.memory_space<vmem>>, vector<8x8xf32>
    %cst_43 = arith.constant dense<0.000000e+00> : vector<8x512xf32>
    %79 = tpu.matmul %78, %77, %cst_43 {dimension_numbers = #tpu.dot_dimension_numbers<[1], [0], [0], [1], [0, 0, 1, 1], [], []>} : vector<8x8xf32>, vector<8x512xf32>, vector<8x512xf32> -> vector<8x512xf32>
    %c0_44 = arith.constant 0 : index
    %c0_45 = arith.constant 0 : index
    %80 = vector.load %arg18[%c0_44, %c0_45] : memref<512x128xf32, #tpu.memory_space<vmem>>, vector<512x128xf32>
    %cst_46 = arith.constant dense<0.000000e+00> : vector<8x128xf32>
    %81 = tpu.matmul %79, %80, %cst_46 {dimension_numbers = #tpu.dot_dimension_numbers<[1], [0], [0], [1], [0, 0, 1, 1], [], []>} : vector<8x512xf32>, vector<512x128xf32>, vector<8x128xf32> -> vector<8x128xf32>
    %c0_47 = arith.constant 0 : index
    %c0_48 = arith.constant 0 : index
    %82 = vector.load %arg19[%c0_47, %c0_48] : memref<1x128xf32, #tpu.memory_space<vmem>>, vector<1x128xf32>
    %83 = vector.broadcast %82 : vector<1x128xf32> to vector<8x128xf32>
    %84 = arith.addf %81, %83 : vector<8x128xf32>
    %c0_49 = arith.constant 0 : index
    %c0_50 = arith.constant 0 : index
    %c0_51 = arith.constant 0 : index
    %85 = vector.load %arg20[%c0_49, %c0_50, %c0_51] : memref<1x8x128xf32, #tpu.memory_space<vmem>>, vector<1x8x128xf32>
    %86 = vector.shape_cast %85 : vector<1x8x128xf32> to vector<8x128xf32>
    %87 = vector.shape_cast %84 : vector<8x128xf32> to vector<1x8x128xf32>
    tpu.vector_store %arg20[%c0_49, %c0_50, %c0_51], %87 {strides = array<i32>} : memref<1x8x128xf32, #tpu.memory_space<vmem>>, vector<1x8x128xf32>,
    return
  }
  func.func @transform_0(%arg0: i32) -> (i32, i32) {
    %c0_i32 = arith.constant 0 : i32
    %c0_i32_0 = arith.constant 0 : i32
    return %arg0, %c0_i32 : i32, i32
  }
  func.func @transform_1(%arg0: i32) -> (i32, i32) {
    %c0_i32 = arith.constant 0 : i32
    %c0_i32_0 = arith.constant 0 : i32
    %c0_i32_1 = arith.constant 0 : i32
    return %c0_i32, %c0_i32_0 : i32, i32
  }
  func.func @transform_2(%arg0: i32) -> (i32, i32) {
    %c0_i32 = arith.constant 0 : i32
    %c0_i32_0 = arith.constant 0 : i32
    %c0_i32_1 = arith.constant 0 : i32
    return %c0_i32, %c0_i32_0 : i32, i32
  }
  func.func @transform_3(%arg0: i32) -> (i32, i32) {
    %c0_i32 = arith.constant 0 : i32
    %c0_i32_0 = arith.constant 0 : i32
    %c0_i32_1 = arith.constant 0 : i32
    return %c0_i32, %c0_i32_0 : i32, i32
  }
  func.func @transform_4(%arg0: i32) -> (i32, i32) {
    %c0_i32 = arith.constant 0 : i32
    %c0_i32_0 = arith.constant 0 : i32
    %c0_i32_1 = arith.constant 0 : i32
    return %c0_i32, %c0_i32_0 : i32, i32
  }
  func.func @transform_5(%arg0: i32) -> (i32, i32) {
    %c0_i32 = arith.constant 0 : i32
    %c0_i32_0 = arith.constant 0 : i32
    %c0_i32_1 = arith.constant 0 : i32
    return %c0_i32, %c0_i32_0 : i32, i32
  }
  func.func @transform_6(%arg0: i32) -> (i32, i32) {
    %c0_i32 = arith.constant 0 : i32
    %c0_i32_0 = arith.constant 0 : i32
    %c0_i32_1 = arith.constant 0 : i32
    return %c0_i32, %c0_i32_0 : i32, i32
  }
  func.func @transform_7(%arg0: i32) -> (i32, i32) {
    %c0_i32 = arith.constant 0 : i32
    %c0_i32_0 = arith.constant 0 : i32
    %c0_i32_1 = arith.constant 0 : i32
    return %c0_i32, %c0_i32_0 : i32, i32
  }
  func.func @transform_8(%arg0: i32) -> (i32, i32) {
    %c0_i32 = arith.constant 0 : i32
    %c0_i32_0 = arith.constant 0 : i32
    %c0_i32_1 = arith.constant 0 : i32
    return %c0_i32, %c0_i32_0 : i32, i32
  }
  func.func @transform_9(%arg0: i32) -> (i32, i32) {
    %c0_i32 = arith.constant 0 : i32
    %c0_i32_0 = arith.constant 0 : i32
    %c0_i32_1 = arith.constant 0 : i32
    return %c0_i32, %c0_i32_0 : i32, i32
  }
  func.func @transform_10(%arg0: i32) -> (i32, i32) {
    %c0_i32 = arith.constant 0 : i32
    %c0_i32_0 = arith.constant 0 : i32
    %c0_i32_1 = arith.constant 0 : i32
    return %c0_i32, %c0_i32_0 : i32, i32
  }
  func.func @transform_11(%arg0: i32) -> (i32, i32) {
    %c0_i32 = arith.constant 0 : i32
    %c0_i32_0 = arith.constant 0 : i32
    %c0_i32_1 = arith.constant 0 : i32
    return %c0_i32, %c0_i32_0 : i32, i32
  }
  func.func @transform_12(%arg0: i32) -> (i32, i32) {
    %c0_i32 = arith.constant 0 : i32
    %c0_i32_0 = arith.constant 0 : i32
    %c0_i32_1 = arith.constant 0 : i32
    return %c0_i32, %c0_i32_0 : i32, i32
  }
  func.func @transform_13(%arg0: i32) -> (i32, i32) {
    %c0_i32 = arith.constant 0 : i32
    %c0_i32_0 = arith.constant 0 : i32
    %c0_i32_1 = arith.constant 0 : i32
    return %c0_i32, %c0_i32_0 : i32, i32
  }
  func.func @transform_14(%arg0: i32) -> (i32, i32) {
    %c0_i32 = arith.constant 0 : i32
    %c0_i32_0 = arith.constant 0 : i32
    %c0_i32_1 = arith.constant 0 : i32
    return %c0_i32, %c0_i32_0 : i32, i32
  }
  func.func @transform_15(%arg0: i32) -> (i32, i32) {
    %c0_i32 = arith.constant 0 : i32
    %c0_i32_0 = arith.constant 0 : i32
    %c0_i32_1 = arith.constant 0 : i32
    return %c0_i32, %c0_i32_0 : i32, i32
  }
  func.func @transform_16(%arg0: i32) -> (i32, i32) {
    %c0_i32 = arith.constant 0 : i32
    %c0_i32_0 = arith.constant 0 : i32
    %c0_i32_1 = arith.constant 0 : i32
    return %c0_i32, %c0_i32_0 : i32, i32
  }
  func.func @transform_17(%arg0: i32) -> (i32, i32) {
    %c0_i32 = arith.constant 0 : i32
    %c0_i32_0 = arith.constant 0 : i32
    %c0_i32_1 = arith.constant 0 : i32
    return %c0_i32, %c0_i32_0 : i32, i32
  }
  func.func @transform_18(%arg0: i32) -> (i32, i32) {
    %c0_i32 = arith.constant 0 : i32
    %c0_i32_0 = arith.constant 0 : i32
    %c0_i32_1 = arith.constant 0 : i32
    return %c0_i32, %c0_i32_0 : i32, i32
  }
  func.func @transform_19(%arg0: i32) -> (i32, i32, i32) {
    %c0_i32 = arith.constant 0 : i32
    %c0_i32_0 = arith.constant 0 : i32
    %c0_i32_1 = arith.constant 0 : i32
    return %arg0, %c0_i32, %c0_i32_0 : i32, i32, i32
  }
}

</mosaic_0001>

<bundles_post_ra>
// kernel: _lambda_.1
= control target key start
LH: loop header
LB: loop body
LE: loop exit
PB: predicated region body
PF: predicated region fallthrough
CT: control target
= control target key end

     0   :  { %s8570_s0 = inlined_call_operand.vmem [shape: bf16[128,27], index: 0, kind: input, shape index: {}]   ;;  %s8571_s1 = inlined_call_operand.vmem [shape: bf16[27,64], index: 1, kind: input, shape index: {}]   ;;  %s8572_s2 = inlined_call_operand.vmem [shape: f32[1,64], index: 2, kind: input, shape index: {}]   ;;  %s8573_s3 = inlined_call_operand.vmem [shape: f32[1,64], index: 3, kind: input, shape index: {}]   ;;  %s8574_s4 = inlined_call_operand.hbm [shape: bf16[288,128], index: 4, kind: input, shape index: {}]   ;;  %s8575_s5 = inlined_call_operand.hbm [shape: bf16[576,128], index: 5, kind: input, shape index: {}]   ;;  %s8576_s6 = inlined_call_operand.vmem [shape: f32[1,128], index: 6, kind: input, shape index: {}]   ;;  %s8577_s7 = inlined_call_operand.vmem [shape: f32[1,128], index: 7, kind: input, shape index: {}]   ;;  %s8578_s8 = inlined_call_operand.vmem [shape: bf16[72,32], index: 8, kind: input, shape index: {}]   ;;  %s8579_s9 = inlined_call_operand.vmem [shape: bf16[1152,256], index: 9, kind: input, shape index: {}]   ;;  %s8580_s10 = inlined_call_operand.vmem [shape: f32[1,256], index: 10, kind: input, shape index: {}]   ;;  %s8581_s11 = inlined_call_operand.vmem [shape: f32[1,256], index: 11, kind: input, shape index: {}]   ;;  %s8582_s12 = inlined_call_operand.vmem [shape: bf16[32,8], index: 12, kind: input, shape index: {}]   ;;  %s8583_s13 = inlined_call_operand.hbm [shape: bf16[1024,512], index: 13, kind: input, shape index: {}]   ;;  %s8584_s14 = inlined_call_operand.vmem [shape: f32[1,512], index: 14, kind: input, shape index: {}]   ;;  %s8585_s15 = inlined_call_operand.vmem [shape: f32[1,512], index: 15, kind: input, shape index: {}]   ;;  %s8586_s16 = inlined_call_operand.vmem [shape: f32[8,8], index: 16, kind: input, shape index: {}]   ;;  %s8587_s17 = inlined_call_operand.vmem [shape: f32[512,128], index: 17, kind: input, shape index: {}]   ;;  %s8588_s18 = inlined_call_operand.vmem [shape: f32[1,128], index: 18, kind: input, shape index: {}]   ;;  %s8589_s19 = inlined_call_operand.vmem [shape: f32[1,8,128], index: 19, kind: output, shape index: {}]  }
   0x1   :  { %8592 = sst [smem:[#allocation9_spill]] %s8570_s0 }
   0x2   :  { %8593 = sst [smem:[#allocation10_spill]] %s8571_s1 }
   0x3   :  { %8594 = sst [smem:[#allocation11_spill]] %s8572_s2 }
   0x4   :  { %8595 = sst [smem:[#allocation12_spill]] %s8573_s3 }
   0x5   :  { %24 = vsyncpa [#allocation3], 0 }
   0x6   :  { %25 = vsyncpa [#allocation5], 0  ;;  %s51_s20 = sshll.u32 %s8575_s5, 4  ;;  %s7078_s21 = smov [#allocation4]   ;;  %s52_s20 = int_to_ptr.hbm [resolvable:$true] %s51_s20 }
   0x7   :  { %s53_s1 = sshll.u32 %s7078_s21, 4  ;;  %s38_s23 = sshll.u32 %s8574_s4, 4  ;;  %s54_s1 = int_to_ptr.vmem [resolvable:$true] %s53_s1  ;;  %s39_s23 = int_to_ptr.hbm [resolvable:$true] %s38_s23 }
   0x8   :  { %s7079_s24 = smov 64   ;;  %s7080_s25 = smov 4  }
   0x9   :  { %59 = dma.hbm_to_vmem [thread:$0]  %s52_s20, 4608, %s54_s1, [#allocation5], %s7079_s24, %s7079_s24, %s7080_s25  }
   0xa   :  { %s7081_s3 = smov [#allocation2]   ;;  %s78_s5 = sshll.u32 %s8583_s13, 4  ;;  %s79_s5 = int_to_ptr.hbm [resolvable:$true] %s78_s5 }
   0xb   :  { %s40_s26 = sshll.u32 %s7081_s3, 4  ;;  %s7082_s29 = smov [#allocation6]   ;;  %s41_s26 = int_to_ptr.vmem [resolvable:$true] %s40_s26 }
   0xc   :  { %46 = dma.hbm_to_vmem [thread:$0]  %s39_s23, 2304, %s41_s26, [#allocation3], %s7079_s24, %s7079_s24, %s7080_s25  }
   0xd   :  { %s80_s0 = sshll.u32 %s7082_s29, 4  ;;  %s7083_s4 = smov 256   ;;  %s81_s0 = int_to_ptr.vmem [resolvable:$true] %s80_s0 }
   0xe   :  { %s7084_s30 = smov 16  }
   0xf   :  { %86 = dma.hbm_to_vmem [thread:$0]  %s79_s5, 32768, %s81_s0, [#allocation5], %s7083_s4, %s7083_s4, %s7084_s30  }
  0x10   :  { %7074 = dma.done.wait [#allocation3], 2304  }
  0x11   :  { %7075 = vsyncadd [#allocation3], 4294964992 }
  0x12   :  { %7076 = dma.done.wait [#allocation5], 37376  }
  0x13   :  { %7077 = vsyncadd [#allocation5], 4294929920  ;;  %vm206_vm0 = vcmask 1044480   ;;  %vm207_vm1 = vcmask 1045504   ;;  %v7085_v0 = vmov 65535   ;;  %s8596_s21 = sld [smem:[#allocation10_spill]] }
  0x14   :  { %v208_v1 = vsel %vm206_vm0, 4294967295, %v7085_v0  ;;  %s8597_s26 = sld [smem:[#allocation9_spill]]  ;;  %vm181_vm2 = vcmask 220160   ;;  %vm633_vm3 = vcmask 523264   ;;  %vm1103_vm4 = vcmask 261120  }
  0x15   :  { %v209_v4 = vsel %vm207_vm1, %v208_v1, 0  ;;  %s8599_s5 = sld [smem:[#allocation12_spill]]  ;;  %vm2300_vm5 = vcmask 1043456   ;;  %vm2293_vm6 = vcmask 64512  }
  0x19   :  { %v4614_v2 = vld [vmem:[%s8596_s21 + $0x8] sm:$0xf]  ;;  %v6488_v3 = vld [vmem:[%s8596_s21 + $0x8] sm:$0x30]  ;;  %v6487_v7 = vld [vmem:[%s8596_s21] sm:$0xff] }
  0x1a   :  { %v4615_v5 = vor.u32 %v6488_v3, %v4614_v2  ;;  %v6479_v8 = vld [vmem:[%s8597_s26] sm:$0xff]  ;;  %v6480_v9 = vld [vmem:[%s8597_s26 + $0x8] sm:$0xff]  ;;  %v6481_v10 = vld [vmem:[%s8597_s26 + $0x10] sm:$0xff] }
  0x1b   :  { %v6482_v11 = vld [vmem:[%s8597_s26 + $0x18] sm:$0xff]  ;;  %v6483_v12 = vld [vmem:[%s8597_s26 + $0x20] sm:$0xff]  ;;  %v6484_v13 = vld [vmem:[%s8597_s26 + $0x28] sm:$0xff] }
  0x1c   :  { %v211_v6 = vand.u32 %v4615_v5, %v209_v4  ;;  %v6485_v14 = vld [vmem:[%s8597_s26 + $0x30] sm:$0xff]  ;;  %v6486_v15 = vld [vmem:[%s8597_s26 + $0x38] sm:$0xff]  ;;  %s8598_s26 = sld [smem:[#allocation11_spill]]  ;;  %v6998_v33 = vld [vmem:[%s8599_s5] ss:$0 sm:$0xff] }
  0x1e   :  { %219 = vmatpush.bf16.msra.mxu0 %v211_v6 }
  0x22   :  { %220 = vmatpush.bf16.msra.mxu0 %v6487_v7  ;;  %v6997_v31 = vld [vmem:[%s8598_s26] ss:$0 sm:$0xff] }
  0x25   :  { %4616 = vmatmul.msk.bf16.vlgmr.msra.gmra.mxu0 %vm181_vm2, %v6479_v8 }
  0x35   :  { %4617 = vmatmul.msk.bf16.gmra.mxu0 %vm181_vm2, %v6480_v9 }
  0x45   :  { %4618 = vmatmul.msk.bf16.gmra.mxu0 %vm181_vm2, %v6481_v10 }
  0x55   :  { %4619 = vmatmul.msk.bf16.gmra.mxu0 %vm181_vm2, %v6482_v11 }
  0x65   :  { %4620 = vmatmul.msk.bf16.gmra.mxu0 %vm181_vm2, %v6483_v12 }
  0x75   :  { %4621 = vmatmul.msk.bf16.gmra.mxu0 %vm181_vm2, %v6484_v13 }
  0x85   :  { %4622 = vmatmul.msk.bf16.gmra.mxu0 %vm181_vm2, %v6485_v14 }
  0x95   :  { %4623 = vmatmul.msk.bf16.gmra.mxu0 %vm181_vm2, %v6486_v15 }
  0xa2   :  { %v7232_v16 = vpop.f32.mrf.mxu0 }
  0xa3   :  { %v266_v14 = vmul.f32 %v6997_v31, %v7232_v16  ;;  %v6491_v16 = vld [vmem:[#allocation2 + $0x10] sm:$0xff] }
  0xaa   :  { %v224_v17 = vpop.f32.mrf.mxu0 }
  0xab   :  { %v267_v10 = vmul.f32 %v6997_v31, %v224_v17  ;;  %v6489_v17 = vld [vmem:[#allocation2] sm:$0xff] }
  0xb2   :  { %v227_v18 = vpop.f32.mrf.mxu0 }
  0xb3   :  { %v268_v7 = vmul.f32 %v6997_v31, %v227_v18 }
  0xb5   :  { %v288_v15 = vadd.f32 %v6998_v33, %v268_v7 }
  0xba   :  { %v229_v19 = vpop.f32.mrf.mxu0 }
  0xbb   :  { %v269_v3 = vmul.f32 %v6997_v31, %v229_v19  ;;  %v286_v19 = vadd.f32 %v6998_v33, %v266_v14 }
  0xbd   :  { %v289_v11 = vadd.f32 %v6998_v33, %v269_v3  ;;  %v6508_v3 = vld [vmem:[#allocation4 + $0x8] sm:$0xff] }
  0xc2   :  { %v232_v20 = vpop.f32.mrf.mxu0 }
  0xc3   :  { %v270_v0 = vmul.f32 %v6997_v31, %v232_v20  ;;  %v287_v20 = vadd.f32 %v6998_v33, %v267_v10 }
  0xc5   :  { %v290_v8 = vadd.f32 %v6998_v33, %v270_v0  ;;  %v303_v18 = vmax.f32 %v287_v20, 0.0  ;;  %v6510_v0 = vld [vmem:[#allocation4 + $0x18] sm:$0xff] }
  0xca   :  { %v234_v21 = vpop.f32.mrf.mxu0 }
  0xcb   :  { %v271_v60 = vmul.f32 %v6997_v31, %v234_v21  ;;  %v306_v21 = vmax.f32 %v290_v8, 0.0 }
  0xcd   :  { %v291_v4 = vadd.f32 %v6998_v33, %v271_v60 }
  0xcf   :  { %v307_v13 = vmax.f32 %v291_v4, 0.0 }
  0xd2   :  { %v237_v22 = vpop.f32.mrf.mxu0 }
  0xd3   :  { %v272_v57 = vmul.f32 %v6997_v31, %v237_v22  ;;  %v320_v22 = vpack.c.bf16 %v307_v13, %v306_v21  ;;  %v6522_v21 = vld [vmem:[#allocation4 + $0x78] sm:$0xff] }
  0xd4   :  { %973 = vmatpush.bf16.msra.mxu3 %v6522_v21  ;;  %v6541_v21 = vld [vmem:[#allocation4 + $0x110] sm:$0xff] }
  0xd5   :  { %v292_v1 = vadd.f32 %v6998_v33, %v272_v57  ;;  %v6513_v57 = vld [vmem:[#allocation4 + $0x30] sm:$0xff] }
  0xd7   :  { %v308_v9 = vmax.f32 %v292_v1, 0.0  ;;  %v6509_v1 = vld [vmem:[#allocation4 + $0x10] sm:$0xff] }
  0xda   :  { %v239_v23 = vpop.f32.mrf.mxu0 }
  0xdb   :  { %v273_v53 = vmul.f32 %v6997_v31, %v239_v23  ;;  %v305_v23 = vmax.f32 %v289_v11, 0.0 }
  0xdd   :  { %v293_v61 = vadd.f32 %v6998_v33, %v273_v53 }
  0xdf   :  { %v309_v6 = vmax.f32 %v293_v61, 0.0  ;;  %v6511_v61 = vld [vmem:[#allocation4 + $0x20] sm:$0xff] }
  0xe1   :  { %v321_v12 = vpack.c.bf16 %v309_v6, %v308_v9 }
  0xe2   :  { %v242_v24 = vpop.f32.mrf.mxu0 }
  0xe3   :  { %v274_v50 = vmul.f32 %v6997_v31, %v242_v24  ;;  %v304_v24 = vmax.f32 %v288_v15, 0.0 }
  0xe5   :  { %v294_v58 = vadd.f32 %v6998_v33, %v274_v50 }
  0xe7   :  { %v310_v2 = vmax.f32 %v294_v58, 0.0 }
  0xea   :  { %v244_v25 = vpop.f32.mrf.mxu0 }
  0xeb   :  { %v275_v46 = vmul.f32 %v6997_v31, %v244_v25  ;;  %v319_v25 = vpack.c.bf16 %v305_v23, %v304_v24  ;;  %v6505_v24 = vld [vmem:[#allocation2 + $0x80] sm:$0xff] }
  0xed   :  { %v295_v54 = vadd.f32 %v6998_v33, %v275_v46 }
  0xef   :  { %v311_v63 = vmax.f32 %v295_v54, 0.0  ;;  %v6503_v54 = vld [vmem:[#allocation2 + $0x70] sm:$0xff] }
  0xf1   :  { %v322_v5 = vpack.c.bf16 %v311_v63, %v310_v2 }
  0xf2   :  { %v247_v26 = vpop.f32.mrf.mxu0 }
  0xf3   :  { %v276_v42 = vmul.f32 %v6997_v31, %v247_v26  ;;  %v302_v26 = vmax.f32 %v286_v19, 0.0  ;;  %v6520_v19 = vld [vmem:[#allocation4 + $0x68] sm:$0xff] }
  0xf5   :  { %v296_v51 = vadd.f32 %v6998_v33, %v276_v42 }
  0xf7   :  { %v312_v59 = vmax.f32 %v296_v51, 0.0  ;;  %v6502_v51 = vld [vmem:[#allocation2 + $0x68] sm:$0xff] }
  0xfa   :  { %v249_v27 = vpop.f32.mrf.mxu0 }
  0xfb   :  { %v277_v39 = vmul.f32 %v6997_v31, %v249_v27  ;;  %v318_v27 = vpack.c.bf16 %v303_v18, %v302_v26 }
  0xfd   :  { %v297_v47 = vadd.f32 %v6998_v33, %v277_v39 }
  0xff   :  { %v313_v56 = vmax.f32 %v297_v47, 0.0 }
 0x101   :  { %v323_v62 = vpack.c.bf16 %v313_v56, %v312_v59  ;;  %v6514_v56 = vld [vmem:[#allocation4 + $0x38] sm:$0xff]  ;;  %v6512_v59 = vld [vmem:[#allocation4 + $0x28] sm:$0xff] }
 0x102   :  { %v252_v28 = vpop.f32.mrf.mxu0  ;;  %954 = vmatpush.bf16.msra.mxu2 %v6514_v56  ;;  %v6527_v56 = vld [vmem:[#allocation4 + $0xa0] sm:$0xff] }
 0x103   :  { %v278_v36 = vmul.f32 %v6997_v31, %v252_v28  ;;  %v6490_v28 = vld [vmem:[#allocation2 + $0x8] sm:$0xff] }
 0x105   :  { %v298_v43 = vadd.f32 %v6998_v33, %v278_v36 }
 0x106   :  { %955 = vmatpush.bf16.msra.mxu2 %v6513_v57 }
 0x107   :  { %v314_v52 = vmax.f32 %v298_v43, 0.0 }
 0x10a   :  { %v254_v29 = vpop.f32.mrf.mxu0  ;;  %956 = vmatpush.bf16.msra.mxu2 %v6512_v59 }
 0x10b   :  { %v279_v34 = vmul.f32 %v6997_v31, %v254_v29  ;;  %v6492_v29 = vld [vmem:[#allocation2 + $0x18] sm:$0xff] }
 0x10d   :  { %v299_v40 = vadd.f32 %v6998_v33, %v279_v34  ;;  %v6497_v34 = vld [vmem:[#allocation2 + $0x40] sm:$0xff] }
 0x10e   :  { %957 = vmatpush.bf16.msra.mxu2 %v6511_v61 }
 0x10f   :  { %v315_v49 = vmax.f32 %v299_v40, 0.0  ;;  %v6499_v40 = vld [vmem:[#allocation2 + $0x50] sm:$0xff] }
 0x111   :  { %v324_v55 = vpack.c.bf16 %v315_v49, %v314_v52 }
 0x112   :  { %v257_v30 = vpop.f32.mrf.mxu0  ;;  %958 = vmatpush.bf16.msra.mxu2 %v6510_v0 }
 0x113   :  { %v280_v32 = vmul.f32 %v6997_v31, %v257_v30  ;;  %v6493_v30 = vld [vmem:[#allocation2 + $0x20] sm:$0xff] }
 0x115   :  { %v300_v38 = vadd.f32 %v6998_v33, %v280_v32  ;;  %v6495_v32 = vld [vmem:[#allocation2 + $0x30] sm:$0xff] }
 0x116   :  { %959 = vmatpush.bf16.msra.mxu2 %v6509_v1  ;;  %v6525_v1 = vld [vmem:[#allocation4 + $0x90] sm:$0xff] }
 0x117   :  { %v316_v44 = vmax.f32 %v300_v38, 0.0 }
 0x11a   :  { %v259_v35 = vpop.f32.mrf.mxu0  ;;  %960 = vmatpush.bf16.msra.mxu2 %v6508_v3  ;;  %v6524_v3 = vld [vmem:[#allocation4 + $0x88] sm:$0xff] }
 0x11b   :  { %v281_v37 = vmul.f32 %v6997_v31, %v259_v35  ;;  %v6494_v31 = vld [vmem:[#allocation2 + $0x28] sm:$0xff] }
 0x11d   :  { %v301_v41 = vadd.f32 %v6998_v33, %v281_v37  ;;  %v6496_v33 = vld [vmem:[#allocation2 + $0x38] sm:$0xff]  ;;  %v6498_v37 = vld [vmem:[#allocation2 + $0x48] sm:$0xff] }
 0x11f   :  { %v317_v45 = vmax.f32 %v301_v41, 0.0 }
 0x121   :  { %v325_v48 = vpack.c.bf16 %v317_v45, %v316_v44  ;;  %v6500_v44 = vld [vmem:[#allocation2 + $0x58] sm:$0xff] }
 0x123   :  { %470 = vmatpush.bf16.msra.mxu1 %v325_v48  ;;  %v6501_v48 = vld [vmem:[#allocation2 + $0x60] sm:$0xff] }
 0x127   :  { %471 = vmatpush.bf16.msra.mxu1 %v324_v55 }
 0x12b   :  { %472 = vmatpush.bf16.msra.mxu1 %v323_v62  ;;  %v6504_v62 = vld [vmem:[#allocation2 + $0x78] sm:$0xff] }
 0x12f   :  { %473 = vmatpush.bf16.msra.mxu1 %v322_v5  ;;  %v6507_v5 = vld [vmem:[#allocation4] sm:$0xff] }
 0x130   :  { %961 = vmatpush.bf16.msra.mxu2 %v6507_v5  ;;  %v6523_v5 = vld [vmem:[#allocation4 + $0x80] sm:$0xff] }
 0x133   :  { %474 = vmatpush.bf16.msra.mxu1 %v321_v12 }
 0x137   :  { %475 = vmatpush.bf16.msra.mxu1 %v320_v22  ;;  %v6521_v22 = vld [vmem:[#allocation4 + $0x70] sm:$0xff] }
 0x138   :  { %974 = vmatpush.bf16.msra.mxu3 %v6521_v22  ;;  %v6536_v22 = vld [vmem:[#allocation4 + $0xe8] sm:$0xff] }
 0x13b   :  { %476 = vmatpush.bf16.msra.mxu1 %v319_v25 }
 0x13c   :  { %975 = vmatpush.bf16.msra.mxu3 %v6520_v19 }
 0x13f   :  { %477 = vmatpush.bf16.msra.mxu1 %v318_v27 }
 0x142   :  { %478 = vmatmul.bf16.vlgmr.msra.gmra.mxu1 %v6489_v17  ;;  %v6519_v17 = vld [vmem:[#allocation4 + $0x60] sm:$0xff] }
 0x143   :  { %976 = vmatpush.bf16.msra.mxu3 %v6519_v17 }
 0x152   :  { %483 = vmatmul.bf16.gmra.mxu1 %v6490_v28 }
 0x162   :  { %488 = vmatmul.bf16.gmra.mxu1 %v6491_v16 }
 0x172   :  { %493 = vmatmul.bf16.gmra.mxu1 %v6492_v29 }
 0x182   :  { %498 = vmatmul.bf16.gmra.mxu1 %v6493_v30  ;;  %v6518_v30 = vld [vmem:[#allocation4 + $0x58] sm:$0xff] }
 0x183   :  { %977 = vmatpush.bf16.msra.mxu3 %v6518_v30 }
 0x192   :  { %503 = vmatmul.bf16.gmra.mxu1 %v6494_v31 }
 0x1a2   :  { %508 = vmatmul.bf16.gmra.mxu1 %v6495_v32  ;;  %v6517_v32 = vld [vmem:[#allocation4 + $0x50] sm:$0xff] }
 0x1a3   :  { %978 = vmatpush.bf16.msra.mxu3 %v6517_v32 }
 0x1b2   :  { %513 = vmatmul.bf16.gmra.mxu1 %v6496_v33 }
 0x1bf   :  { %v7241_v35 = vpop.f32.mrf.mxu1 }
 0x1c2   :  { %518 = vmatmul.bf16.gmra.mxu1 %v6497_v34  ;;  %v6516_v34 = vld [vmem:[#allocation4 + $0x48] sm:$0xff] }
 0x1c3   :  { %979 = vmatpush.bf16.msra.mxu3 %v6516_v34 }
 0x1c7   :  { %v7243_v36 = vpop.f32.mrf.mxu1 }
 0x1cf   :  { %v7245_v38 = vpop.f32.mrf.mxu1 }
 0x1d2   :  { %523 = vmatmul.bf16.gmra.mxu1 %v6498_v37  ;;  %v6515_v37 = vld [vmem:[#allocation4 + $0x40] sm:$0xff] }
 0x1d3   :  { %980 = vmatpush.bf16.msra.mxu3 %v6515_v37 }
 0x1d7   :  { %v7247_v39 = vpop.f32.mrf.mxu1 }
 0x1df   :  { %v489_v41 = vpop.f32.mrf.mxu1 }
 0x1e2   :  { %528 = vmatmul.bf16.gmra.mxu1 %v6499_v40 }
 0x1e7   :  { %v491_v42 = vpop.f32.mrf.mxu1 }
 0x1e8   :  { %v6957_v43 = vpack.i.bf16 %v491_v42, %v489_v41  ;;  %v6530_v42 = vld [vmem:[#allocation4 + $0xb8] sm:$0xff] }
 0x1e9   :  { %992 = vmatpush.bf16.msrb.mxu2 %v6530_v42 }
 0x1ea   :  { %6958 = vrot.lane.b32.xlu0 %v6957_v43, %s7079_s24 }
 0x1ef   :  { %v494_v45 = vpop.f32.mrf.mxu1 }
 0x1f2   :  { %533 = vmatmul.bf16.gmra.mxu1 %v6500_v44  ;;  %v6529_v44 = vld [vmem:[#allocation4 + $0xb0] sm:$0xff] }
 0x1f3   :  { %993 = vmatpush.bf16.msrb.mxu2 %v6529_v44 }
 0x1f7   :  { %v496_v46 = vpop.f32.mrf.mxu1 }
 0x1f8   :  { %v6962_v47 = vpack.i.bf16 %v496_v46, %v494_v45 }
 0x1fa   :  { %6963 = vrot.lane.b32.xlu0 %v6962_v47, %s7079_s24 }
 0x1ff   :  { %v7251_v49 = vpop.f32.mrf.mxu1 }
 0x202   :  { %538 = vmatmul.bf16.gmra.mxu1 %v6501_v48 }
 0x207   :  { %v7253_v50 = vpop.f32.mrf.mxu1 }
 0x20f   :  { %v7255_v52 = vpop.f32.mrf.mxu1 }
 0x212   :  { %543 = vmatmul.bf16.gmra.mxu1 %v6502_v51 }
 0x217   :  { %v7257_v53 = vpop.f32.mrf.mxu1 }
 0x21f   :  { %v509_v55 = vpop.f32.mrf.mxu1 }
 0x222   :  { %548 = vmatmul.bf16.gmra.mxu1 %v6503_v54 }
 0x227   :  { %v511_v58 = vpop.f32.mrf.mxu1 }
 0x228   :  { %v6967_v60 = vpack.i.bf16 %v511_v58, %v509_v55  ;;  %v6528_v55 = vld [vmem:[#allocation4 + $0xa8] sm:$0xff] }
 0x229   :  { %994 = vmatpush.bf16.msrb.mxu2 %v6528_v55 }
 0x22a   :  { %6968 = vrot.lane.b32.xlu1 %v6967_v60, %s7079_s24  ;;  %v6526_v60 = vld [vmem:[#allocation4 + $0x98] sm:$0xff] }
 0x22d   :  { %995 = vmatpush.bf16.msrb.mxu2 %v6527_v56 }
 0x22f   :  { %v514_v63 = vpop.f32.mrf.mxu1 }
 0x231   :  { %996 = vmatpush.bf16.msrb.mxu2 %v6526_v60 }
 0x232   :  { %553 = vmatmul.bf16.gmra.mxu1 %v6504_v62 }
 0x235   :  { %997 = vmatpush.bf16.msrb.mxu2 %v6525_v1 }
 0x237   :  { %v516_v2 = vpop.f32.mrf.mxu1 }
 0x238   :  { %v6977_v4 = vpack.i.bf16 %v516_v2, %v514_v63 }
 0x239   :  { %998 = vmatpush.bf16.msrb.mxu2 %v6524_v3 }
 0x23a   :  { %6978 = vrot.lane.b32.xlu2 %v6977_v4, %s7079_s24 }
 0x23d   :  { %999 = vmatpush.bf16.msrb.mxu2 %v6523_v5 }
 0x23f   :  { %v7261_v6 = vpop.f32.mrf.mxu1 }
 0x242   :  { %558 = vmatmul.bf16.gmra.mxu1 %v6505_v24  ;;  %v6535_v24 = vld [vmem:[#allocation4 + $0xe0] sm:$0xff] }
 0x247   :  { %v7263_v7 = vpop.f32.mrf.mxu1 }
 0x24f   :  { %v7265_v8 = vpop.f32.mrf.mxu1 }
 0x257   :  { %v7267_v9 = vpop.f32.mrf.mxu1 }
 0x25c   :  { %v6959_v10 = vpop.permute.xlu0 %6958 }
 0x25d   :  { %v6961_v11 = vunpack.i.h.bf16 %v6959_v10  ;;  %v6960_v12 = vunpack.i.l.bf16 %v6959_v10 }
 0x25f   :  { %v529_v13 = vpop.f32.mrf.mxu1  ;;  %v634_v14 = vsel %vm633_vm3, %v7241_v35, %v6960_v12  ;;  %v635_v15 = vsel %vm633_vm3, %v7243_v36, %v6961_v11  ;;  %v6506_v35 = vld [vmem:[#allocation2 + $0x88] sm:$0xff] }
 0x260   :  { %v650_v20 = vpack.c.bf16 %v635_v15, %v634_v14  ;;  %563 = vmatmul.bf16.gmra.mxu1 %v6506_v35  ;;  %v6537_v15 = vld [vmem:[#allocation4 + $0xf0] sm:$0xff] }
 0x262   :  { %962 = vmatmul.bf16.vlgmr.msra.gmra.mxu2 %v650_v20 }
 0x267   :  { %v531_v23 = vpop.f32.mrf.mxu1 }
 0x268   :  { %v6972_v25 = vpack.i.bf16 %v531_v23, %v529_v13  ;;  %v6542_v13 = vld [vmem:[#allocation4 + $0x118] sm:$0xff]  ;;  %v6540_v23 = vld [vmem:[#allocation4 + $0x108] sm:$0xff] }
 0x269   :  { %1034 = vmatpush.bf16.msra.mxu2 %v6542_v13 }
 0x26a   :  { %6973 = vrot.lane.b32.xlu1 %v6972_v25, %s7079_s24  ;;  %v6539_v25 = vld [vmem:[#allocation4 + $0x100] sm:$0xff] }
 0x26c   :  { %v6964_v18 = vpop.permute.xlu0 %6963 }
 0x26d   :  { %v6966_v26 = vunpack.i.h.bf16 %v6964_v18  ;;  %v6965_v27 = vunpack.i.l.bf16 %v6964_v18  ;;  %1035 = vmatpush.bf16.msra.mxu2 %v6541_v21  ;;  %v6999_v21 = vld [vmem:[%s8576_s6] ss:$0 sm:$0xff] }
 0x26f   :  { %v534_v28 = vpop.f32.mrf.mxu1  ;;  %v636_v16 = vsel %vm633_vm3, %v7245_v38, %v6965_v27  ;;  %v637_v29 = vsel %vm633_vm3, %v7247_v39, %v6966_v26 }
 0x270   :  { %v655_v31 = vpack.c.bf16 %v637_v29, %v636_v16  ;;  %v6532_v29 = vld [vmem:[#allocation4 + $0xc8] sm:$0xff] }
 0x271   :  { %1036 = vmatpush.bf16.msra.mxu2 %v6540_v23 }
 0x272   :  { %967 = vmatmul.bf16.gmra.mxu2 %v655_v31  ;;  %v6531_v31 = vld [vmem:[#allocation4 + $0xc0] sm:$0xff] }
 0x275   :  { %1037 = vmatpush.bf16.msra.mxu2 %v6539_v25 }
 0x277   :  { %v536_v33 = vpop.f32.mrf.mxu1 }
 0x278   :  { %v6982_v36 = vpack.i.bf16 %v536_v33, %v534_v28  ;;  %v6533_v28 = vld [vmem:[#allocation4 + $0xd0] sm:$0xff] }
 0x27a   :  { %6983 = vrot.lane.b32.xlu2 %v6982_v36, %s7079_s24 }
 0x27f   :  { %v7279_v38 = vpop.f32.mrf.mxu1 }
 0x287   :  { %v7281_v39 = vpop.f32.mrf.mxu1 }
 0x28f   :  { %v7283_v40 = vpop.f32.mrf.mxu1 }
 0x294   :  { %v6979_v57 = vpop.permute.xlu2 %6978 }
 0x295   :  { %v6981_v61 = vunpack.i.h.bf16 %v6979_v57  ;;  %v6980_v62 = vunpack.i.l.bf16 %v6979_v57 }
 0x297   :  { %v7285_v41 = vpop.f32.mrf.mxu1 }
 0x29c   :  { %v6969_v43 = vpop.permute.xlu1 %6968 }
 0x29d   :  { %v6971_v45 = vunpack.i.h.bf16 %v6969_v43  ;;  %v6970_v46 = vunpack.i.l.bf16 %v6969_v43 }
 0x29f   :  { %v549_v47 = vpop.f32.mrf.mxu1  ;;  %v638_v48 = vsel %vm633_vm3, %v7251_v49, %v6970_v46  ;;  %v639_v51 = vsel %vm633_vm3, %v7253_v50, %v6971_v45  ;;  %v640_v49 = vsel %vm633_vm3, %v7255_v52, %v6980_v62  ;;  %v641_v50 = vsel %vm633_vm3, %v7257_v53, %v6981_v61  ;;  %v6538_v52 = vld [vmem:[#allocation4 + $0xf8] sm:$0xff] }
 0x2a0   :  { %v651_v54 = vpack.c.bf16 %v639_v51, %v638_v48  ;;  %v656_v0 = vpack.c.bf16 %v641_v50, %v640_v49  ;;  %1011 = vmatpush.bf16.msrb.mxu3 %v6538_v52 }
 0x2a2   :  { %981 = vmatmul.bf16.vlgmr.msra.gmra.mxu3 %v651_v54 }
 0x2a4   :  { %1012 = vmatpush.bf16.msrb.mxu3 %v6537_v15 }
 0x2a7   :  { %v551_v58 = vpop.f32.mrf.mxu1 }
 0x2a8   :  { %v6987_v59 = vpack.i.bf16 %v551_v58, %v549_v47  ;;  %1013 = vmatpush.bf16.msrb.mxu3 %v6536_v22 }
 0x2aa   :  { %6988 = vrot.lane.b32.xlu0 %v6987_v59, %s7079_s24 }
 0x2ac   :  { %1014 = vmatpush.bf16.msrb.mxu3 %v6535_v24 }
 0x2af   :  { %v554_v63 = vpop.f32.mrf.mxu1 }
 0x2b2   :  { %986 = vmatmul.bf16.gmra.mxu3 %v656_v0 }
 0x2b7   :  { %v556_v2 = vpop.f32.mrf.mxu1 }
 0x2b8   :  { %v6992_v4 = vpack.i.bf16 %v556_v2, %v554_v63 }
 0x2ba   :  { %6993 = vrot.lane.b32.xlu1 %v6992_v4, %s7079_s24 }
 0x2bf   :  { %v559_v17 = vpop.f32.mrf.mxu1 }
 0x2c7   :  { %v561_v30 = vpop.f32.mrf.mxu1 }
 0x2c8   :  { %v654_v32 = vpack.c.bf16 %v561_v30, %v559_v17 }
 0x2d4   :  { %v6984_v19 = vpop.permute.xlu2 %6983 }
 0x2d5   :  { %v6986_v18 = vunpack.i.h.bf16 %v6984_v19 }
 0x2d7   :  { %v645_v27 = vsel %vm633_vm3, %v7267_v9, %v6986_v18 }
 0x2dc   :  { %v6974_v10 = vpop.permute.xlu1 %6973 }
 0x2dd   :  { %v6976_v11 = vunpack.i.h.bf16 %v6974_v10  ;;  %v6975_v12 = vunpack.i.l.bf16 %v6974_v10  ;;  %v564_v33 = vpop.f32.mrf.mxu1 }
 0x2df   :  { %v642_v53 = vsel %vm633_vm3, %v7261_v6, %v6975_v12  ;;  %v643_v14 = vsel %vm633_vm3, %v7263_v7, %v6976_v11  ;;  %v6985_v6 = vunpack.i.l.bf16 %v6984_v19  ;;  %v6534_v7 = vld [vmem:[#allocation4 + $0xd8] sm:$0xff] }
 0x2e0   :  { %v652_v20 = vpack.c.bf16 %v643_v14, %v642_v53  ;;  %1015 = vmatpush.bf16.msrb.mxu3 %v6534_v7 }
 0x2e1   :  { %v644_v26 = vsel %vm633_vm3, %v7265_v8, %v6985_v6  ;;  %v7000_v6 = vld [vmem:[%s8577_s7] ss:$0 sm:$0xff] }
 0x2e2   :  { %1000 = vmatmul.bf16.vlgmr.msrb.gmra.mxu2 %v652_v20  ;;  %v657_v16 = vpack.c.bf16 %v645_v27, %v644_v26 }
 0x2e4   :  { %1016 = vmatpush.bf16.msrb.mxu3 %v6533_v28 }
 0x2e5   :  { %v566_v34 = vpop.f32.mrf.mxu1  ;;  %v963_v54 = vpop.f32.mrf.mxu2 }
 0x2e6   :  { %v659_v8 = vpack.c.bf16 %v566_v34, %v564_v33 }
 0x2e8   :  { %1017 = vmatpush.bf16.msrb.mxu3 %v6532_v29 }
 0x2ec   :  { %1018 = vmatpush.bf16.msrb.mxu3 %v6531_v31 }
 0x2ed   :  { %v965_v55 = vpop.f32.mrf.mxu2 }
 0x2f2   :  { %1005 = vmatmul.bf16.gmra.mxu2 %v657_v16 }
 0x2f5   :  { %v968_v56 = vpop.f32.mrf.mxu2 }
 0x302   :  { %4840 = vmatmul.msk.bf16.vlgmr.msra.gmra.mxu2 %vm633_vm3, %v654_v32 }
 0x312   :  { %4841 = vmatmul.msk.bf16.gmra.mxu2 %vm633_vm3, %v659_v8 }
 0x31c   :  { %v6989_v9 = vpop.permute.xlu0 %6988 }
 0x31d   :  { %v6991_v35 = vunpack.i.h.bf16 %v6989_v9  ;;  %v6990_v36 = vunpack.i.l.bf16 %v6989_v9  ;;  %v6543_v9 = vld [vmem:[%s8578_s8] sm:$0xff] }
 0x31f   :  { %v646_v37 = vsel %vm633_vm3, %v7279_v38, %v6990_v36  ;;  %v647_v42 = vsel %vm633_vm3, %v7281_v39, %v6991_v35  ;;  %v970_v38 = vpop.f32.mrf.mxu2  ;;  %v6689_v35 = vld [vmem:[%s8579_s9 + $0x474] sm:$0xf]  ;;  %v5435_v36 = vld [vmem:[%s8579_s9 + $0x478] sm:$0xf0] }
 0x320   :  { %v653_v43 = vpack.c.bf16 %v647_v42, %v646_v37  ;;  %v5438_v37 = vor.u32 %v6689_v35, %v5435_v36  ;;  %v6544_v42 = vld [vmem:[%s8578_s8 + $0x8] sm:$0xff]  ;;  %v6566_v36 = vld [vmem:[%s8579_s9 + $0x94] sm:$0xf0] }
 0x322   :  { %1019 = vmatmul.bf16.vlgmr.msrb.gmra.mxu3 %v653_v43  ;;  %2246 = vmatpush.bf16.msrb.mxu1 %v5438_v37  ;;  %v6545_v43 = vld [vmem:[%s8578_s8 + $0x10] sm:$0xff] }
 0x323   :  { %v5145_v37 = vld [vmem:[%s8579_s9 + $0x230] sm:$0xf] }
 0x325   :  { %v982_v58 = vpop.f32.mrf.mxu3 }
 0x326   :  { %v983_v5 = vadd.f32 %v982_v58, %v963_v54  ;;  %v5427_v54 = vld [vmem:[%s8579_s9 + $0x468] sm:$0xf0]  ;;  %v6578_v58 = vld [vmem:[%s8579_s9 + $0xf4] sm:$0xf0] }
 0x32c   :  { %v6994_v44 = vpop.permute.xlu1 %6993 }
 0x32d   :  { %v6996_v45 = vunpack.i.h.bf16 %v6994_v44  ;;  %v6995_v46 = vunpack.i.l.bf16 %v6994_v44  ;;  %v984_v59 = vpop.f32.mrf.mxu3  ;;  %v4921_v44 = vld [vmem:[%s8579_s9 + $0x70] sm:$0xf] }
 0x32f   :  { %v648_v47 = vsel %vm633_vm3, %v7283_v40, %v6995_v46  ;;  %v649_v48 = vsel %vm633_vm3, %v7285_v41, %v6996_v45  ;;  %v985_v41 = vadd.f32 %v984_v59, %v965_v55  ;;  %v6562_v45 = vld [vmem:[%s8579_s9 + $0x74] sm:$0xf0]  ;;  %v4913_v46 = vld [vmem:[%s8579_s9 + $0x60] sm:$0xf] }
 0x330   :  { %v658_v51 = vpack.c.bf16 %v649_v48, %v648_v47  ;;  %v4922_v47 = vor.u32 %v6562_v45, %v4921_v44  ;;  %v6560_v48 = vld [vmem:[%s8579_s9 + $0x64] sm:$0xf0]  ;;  %v4865_v44 = vld [vmem:[%s8579_s9] sm:$0xf] }
 0x331   :  { %v6548_v45 = vld [vmem:[%s8579_s9 + $0x4] sm:$0xf0] }
 0x332   :  { %1024 = vmatmul.bf16.gmra.mxu3 %v658_v51  ;;  %v6687_v51 = vld [vmem:[%s8579_s9 + $0x464] sm:$0xf]  ;;  %2025 = vmatpush.bf16.msrb.mxu2 %v4922_v47  ;;  %v6594_v47 = vld [vmem:[%s8579_s9 + $0x174] sm:$0xf0] }
 0x333   :  { %v5430_v55 = vor.u32 %v6687_v51, %v5427_v54  ;;  %v4929_v51 = vld [vmem:[%s8579_s9 + $0x80] sm:$0xf] }
 0x335   :  { %v987_v61 = vpop.f32.mrf.mxu3  ;;  %2247 = vmatpush.bf16.msrb.mxu1 %v5430_v55  ;;  %v4866_v55 = vor.u32 %v6548_v45, %v4865_v44  ;;  %v6674_v44 = vld [vmem:[%s8579_s9 + $0x3f4] sm:$0xf0] }
 0x336   :  { %v988_v1 = vadd.f32 %v987_v61, %v968_v56  ;;  %v4985_v56 = vld [vmem:[%s8579_s9 + $0xf0] sm:$0xf]  ;;  %v6576_v61 = vld [vmem:[%s8579_s9 + $0xe4] sm:$0xf0] }
 0x337   :  { %v4986_v59 = vor.u32 %v6578_v58, %v4985_v56  ;;  %v6564_v56 = vld [vmem:[%s8579_s9 + $0x84] sm:$0xf0] }
 0x339   :  { %2038 = vmatpush.bf16.msrb.mxu0 %v4986_v59  ;;  %v5113_v59 = vld [vmem:[%s8579_s9 + $0x1f0] sm:$0xf] }
 0x33d   :  { %v989_v49 = vpop.f32.mrf.mxu3 }
 0x33e   :  { %v990_v13 = vadd.f32 %v989_v49, %v970_v38  ;;  %v4914_v38 = vor.u32 %v6560_v48, %v4913_v46  ;;  %v5049_v46 = vld [vmem:[%s8579_s9 + $0x170] sm:$0xf] }
 0x340   :  { %2026 = vmatpush.bf16.msrb.mxu2 %v4914_v38  ;;  %v5137_v38 = vld [vmem:[%s8579_s9 + $0x220] sm:$0xf] }
 0x365   :  { %v1001_v57 = vpop.f32.mrf.mxu2 }
 0x366   :  { %v1002_v12 = vadd.f32 %v1001_v57, %v983_v5  ;;  %v4905_v57 = vld [vmem:[%s8579_s9 + $0x50] sm:$0xf]  ;;  %v6626_v5 = vld [vmem:[%s8579_s9 + $0x274] sm:$0xf0] }
 0x36d   :  { %v1003_v39 = vpop.f32.mrf.mxu2 }
 0x36e   :  { %v1004_v10 = vadd.f32 %v1003_v39, %v985_v41  ;;  %v6558_v39 = vld [vmem:[%s8579_s9 + $0x54] sm:$0xf0]  ;;  %v4961_v41 = vld [vmem:[%s8579_s9 + $0xc0] sm:$0xf] }
 0x36f   :  { %v4906_v49 = vor.u32 %v6558_v39, %v4905_v57  ;;  %v6616_v57 = vld [vmem:[%s8579_s9 + $0x224] sm:$0xf0]  ;;  %v5050_v39 = vor.u32 %v6594_v47, %v5049_v46  ;;  %v5057_v46 = vld [vmem:[%s8579_s9 + $0x180] sm:$0xf] }
 0x370   :  { %v6596_v47 = vld [vmem:[%s8579_s9 + $0x184] sm:$0xf0] }
 0x371   :  { %2027 = vmatpush.bf16.msrb.mxu2 %v4906_v49  ;;  %v4930_v49 = vor.u32 %v6564_v56, %v4929_v51  ;;  %v5058_v51 = vor.u32 %v6596_v47, %v5057_v46  ;;  %v5353_v56 = vld [vmem:[%s8579_s9 + $0x3d0] sm:$0xf]  ;;  %v6630_v46 = vld [vmem:[%s8579_s9 + $0x294] sm:$0xf0] }
 0x372   :  { %v5273_v47 = vld [vmem:[%s8579_s9 + $0x330] sm:$0xf] }
 0x375   :  { %v1006_v60 = vpop.f32.mrf.mxu2 }
 0x376   :  { %v1007_v2 = vadd.f32 %v1006_v60, %v988_v1  ;;  %v4977_v60 = vld [vmem:[%s8579_s9 + $0xe0] sm:$0xf] }
 0x37d   :  { %v1008_v62 = vpop.f32.mrf.mxu2 }
 0x37e   :  { %v1009_v15 = vadd.f32 %v1008_v62, %v990_v13  ;;  %v4978_v62 = vor.u32 %v6576_v61, %v4977_v60  ;;  %v5169_v13 = vld [vmem:[%s8579_s9 + $0x260] sm:$0xf]  ;;  %v6610_v60 = vld [vmem:[%s8579_s9 + $0x1f4] sm:$0xf0] }
 0x37f   :  { %v5041_v61 = vld [vmem:[%s8579_s9 + $0x160] sm:$0xf] }
 0x380   :  { %2039 = vmatpush.bf16.msrb.mxu0 %v4978_v62  ;;  %v6592_v62 = vld [vmem:[%s8579_s9 + $0x164] sm:$0xf0] }
 0x385   :  { %v1039_v50 = vpop.f32.mrf.mxu2 }
 0x38d   :  { %v1041_v40 = vpop.f32.mrf.mxu2 }
 0x395   :  { %v1044_v3 = vpop.f32.mrf.mxu2 }
 0x39d   :  { %v1046_v25 = vpop.f32.mrf.mxu2 }
 0x3a5   :  { %v1020_v63 = vpop.f32.mrf.mxu3 }
 0x3a6   :  { %v1021_v53 = vadd.f32 %v1020_v63, %v1002_v12  ;;  %v6574_v63 = vld [vmem:[%s8579_s9 + $0xd4] sm:$0xf0] }
 0x3a7   :  { %v6554_v12 = vld [vmem:[%s8579_s9 + $0x34] sm:$0xf0] }
 0x3a8   :  { %v1040_v23 = vadd.f32 %v1039_v50, %v1021_v53  ;;  %v4969_v50 = vld [vmem:[%s8579_s9 + $0xd0] sm:$0xf]  ;;  %v6624_v53 = vld [vmem:[%s8579_s9 + $0x264] sm:$0xf0] }
 0x3a9   :  { %v4970_v1 = vor.u32 %v6574_v63, %v4969_v50  ;;  %v5138_v50 = vor.u32 %v6616_v57, %v5137_v38  ;;  %v5114_v63 = vor.u32 %v6610_v60, %v5113_v59  ;;  %v6670_v38 = vld [vmem:[%s8579_s9 + $0x3d4] sm:$0xf0]  ;;  %v5337_v60 = vld [vmem:[%s8579_s9 + $0x3b0] sm:$0xf] }
 0x3aa   :  { %v1053_v26 = vmul.f32 %v6999_v21, %v1040_v23  ;;  %v5161_v23 = vld [vmem:[%s8579_s9 + $0x250] sm:$0xf]  ;;  %v5354_v57 = vor.u32 %v6670_v38, %v5353_v56  ;;  %v5185_v56 = vld [vmem:[%s8579_s9 + $0x280] sm:$0xf] }
 0x3ab   :  { %2040 = vmatpush.bf16.msrb.mxu0 %v4970_v1  ;;  %v6608_v1 = vld [vmem:[%s8579_s9 + $0x1e4] sm:$0xf0] }
 0x3ac   :  { %v1061_v31 = vadd.f32 %v7000_v6, %v1053_v26  ;;  %v4945_v26 = vld [vmem:[%s8579_s9 + $0xa0] sm:$0xf] }
 0x3ad   :  { %v1022_v0 = vpop.f32.mrf.mxu3 }
 0x3ae   :  { %v1023_v52 = vadd.f32 %v1022_v0, %v1004_v10  ;;  %v1065_v34 = vmax.f32 %v1061_v31, 0.0  ;;  %v6556_v0 = vld [vmem:[%s8579_s9 + $0x44] sm:$0xf0]  ;;  %v6546_v10 = vld [vmem:[%s8578_s8 + $0x18] sm:$0xff]  ;;  %v4873_v31 = vld [vmem:[%s8579_s9 + $0x10] sm:$0xf] }
 0x3b0   :  { %v1042_v20 = vadd.f32 %v1041_v40, %v1023_v52  ;;  %v4897_v40 = vld [vmem:[%s8579_s9 + $0x40] sm:$0xf] }
 0x3b2   :  { %v1054_v18 = vmul.f32 %v6999_v21, %v1042_v20 }
 0x3b4   :  { %v1062_v16 = vadd.f32 %v7000_v6, %v1054_v18  ;;  %v6685_v18 = vld [vmem:[%s8579_s9 + $0x454] sm:$0xf] }
 0x3b5   :  { %v1025_v4 = vpop.f32.mrf.mxu3 }
 0x3b6   :  { %v1026_v11 = vadd.f32 %v1025_v4, %v1007_v2  ;;  %v1066_v33 = vmax.f32 %v1062_v16, 0.0  ;;  %v4898_v2 = vor.u32 %v6556_v0, %v4897_v40  ;;  %v5177_v4 = vld [vmem:[%s8579_s9 + $0x270] sm:$0xf]  ;;  %v6568_v16 = vld [vmem:[%s8579_s9 + $0xa4] sm:$0xf0]  ;;  %v5042_v40 = vor.u32 %v6592_v62, %v5041_v61 }
 0x3b7   :  { %v5178_v52 = vor.u32 %v6626_v5, %v5177_v4  ;;  %v5105_v0 = vld [vmem:[%s8579_s9 + $0x1e0] sm:$0xf]  ;;  %v5097_v5 = vld [vmem:[%s8579_s9 + $0x1d0] sm:$0xf]  ;;  %v6666_v61 = vld [vmem:[%s8579_s9 + $0x3b4] sm:$0xf0] }
 0x3b8   :  { %v1045_v14 = vadd.f32 %v1044_v3, %v1026_v11  ;;  %v1069_v8 = vpack.c.bf16 %v1066_v33, %v1065_v34  ;;  %v6572_v3 = vld [vmem:[%s8579_s9 + $0xc4] sm:$0xf0]  ;;  %v4889_v11 = vld [vmem:[%s8579_s9 + $0x30] sm:$0xf]  ;;  %2028 = vmatpush.bf16.msrb.mxu2 %v4898_v2  ;;  %v1079_v33 = vld [vmem:[%s8578_s8 + $0x20] sm:$0xf]  ;;  %v4946_v34 = vor.u32 %v6568_v16, %v4945_v26  ;;  %v5338_v62 = vor.u32 %v6666_v61, %v5337_v60 }
 0x3b9   :  { %v4890_v20 = vor.u32 %v6554_v12, %v4889_v11  ;;  %v6590_v2 = vld [vmem:[%s8579_s9 + $0x154] sm:$0xf0]  ;;  %v5025_v11 = vld [vmem:[%s8579_s9 + $0x140] sm:$0xf]  ;;  %v6588_v12 = vld [vmem:[%s8579_s9 + $0x144] sm:$0xf0] }
 0x3ba   :  { %v1055_v19 = vmul.f32 %v6999_v21, %v1045_v14  ;;  %v4962_v14 = vor.u32 %v6572_v3, %v4961_v41  ;;  %v5033_v41 = vld [vmem:[%s8579_s9 + $0x150] sm:$0xf]  ;;  %v5106_v3 = vor.u32 %v6608_v1, %v5105_v0  ;;  %v6582_v26 = vld [vmem:[%s8579_s9 + $0x114] sm:$0xf0] }
 0x3bb   :  { %v5034_v4 = vor.u32 %v6590_v2, %v5033_v41  ;;  %v5321_v41 = vld [vmem:[%s8579_s9 + $0x390] sm:$0xf]  ;;  %v6662_v2 = vld [vmem:[%s8579_s9 + $0x394] sm:$0xf0] }
 0x3bc   :  { %v1063_v27 = vadd.f32 %v7000_v6, %v1055_v19  ;;  %v6622_v19 = vld [vmem:[%s8579_s9 + $0x254] sm:$0xf0]  ;;  %2041 = vmatpush.bf16.msrb.mxu0 %v4962_v14  ;;  %2029 = vmatpush.bf16.msrb.mxu2 %v4890_v20  ;;  %v6604_v14 = vld [vmem:[%s8579_s9 + $0x1c4] sm:$0xf0] }
 0x3bd   :  { %v1027_v22 = vpop.f32.mrf.mxu3  ;;  %v6690_v60 = vld [vmem:[%s8579_s9 + $0x474] sm:$0xf0] }
 0x3be   :  { %v1028_v24 = vadd.f32 %v1027_v22, %v1009_v15  ;;  %v1067_v29 = vmax.f32 %v1063_v27, 0.0  ;;  %v4953_v15 = vld [vmem:[%s8579_s9 + $0xb0] sm:$0xf]  ;;  %v6570_v22 = vld [vmem:[%s8579_s9 + $0xb4] sm:$0xf0]  ;;  %v5162_v27 = vor.u32 %v6622_v19, %v5161_v23 }
 0x3bf   :  { %v5081_v23 = vld [vmem:[%s8579_s9 + $0x1b0] sm:$0xf]  ;;  %v6602_v19 = vld [vmem:[%s8579_s9 + $0x1b4] sm:$0xf0] }
 0x3c0   :  { %v1047_v7 = vadd.f32 %v1046_v25, %v1028_v24  ;;  %v4881_v24 = vld [vmem:[%s8579_s9 + $0x20] sm:$0xf]  ;;  %v6552_v25 = vld [vmem:[%s8579_s9 + $0x24] sm:$0xf0] }
 0x3c2   :  { %v1056_v17 = vmul.f32 %v6999_v21, %v1047_v7  ;;  %v5170_v21 = vor.u32 %v6624_v53, %v5169_v13  ;;  %v4954_v7 = vor.u32 %v6570_v22, %v4953_v15  ;;  %v5026_v13 = vor.u32 %v6588_v12, %v5025_v11  ;;  %v5089_v53 = vld [vmem:[%s8579_s9 + $0x1c0] sm:$0xf]  ;;  %v5017_v15 = vld [vmem:[%s8579_s9 + $0x130] sm:$0xf] }
 0x3c3   :  { %v5090_v20 = vor.u32 %v6604_v14, %v5089_v53  ;;  %v5313_v12 = vld [vmem:[%s8579_s9 + $0x380] sm:$0xf]  ;;  %v6640_v14 = vld [vmem:[%s8579_s9 + $0x2e4] sm:$0xf0] }
 0x3c4   :  { %v1064_v28 = vadd.f32 %v7000_v6, %v1056_v17  ;;  %v5419_v6 = vld [vmem:[%s8579_s9 + $0x458] sm:$0xf0]  ;;  %2042 = vmatpush.bf16.msrb.mxu0 %v4954_v7  ;;  %v5001_v7 = vld [vmem:[%s8579_s9 + $0x110] sm:$0xf]  ;;  %v5233_v53 = vld [vmem:[%s8579_s9 + $0x2e0] sm:$0xf] }
 0x3c5   :  { %v5422_v17 = vor.u32 %v6685_v18, %v5419_v6  ;;  %v5082_v18 = vor.u32 %v6602_v19, %v5081_v23  ;;  %v5305_v23 = vld [vmem:[%s8579_s9 + $0x370] sm:$0xf]  ;;  %v6658_v19 = vld [vmem:[%s8579_s9 + $0x374] sm:$0xf0] }
 0x3c6   :  { %v1068_v30 = vmax.f32 %v1064_v28, 0.0  ;;  %v4882_v28 = vor.u32 %v6552_v25, %v4881_v24  ;;  %v5009_v24 = vld [vmem:[%s8579_s9 + $0x120] sm:$0xf]  ;;  %v6584_v25 = vld [vmem:[%s8579_s9 + $0x124] sm:$0xf0] }
 0x3c7   :  { %2248 = vmatpush.bf16.msrb.mxu1 %v5422_v17  ;;  %v5010_v6 = vor.u32 %v6584_v25, %v5009_v24  ;;  %v5129_v17 = vld [vmem:[%s8579_s9 + $0x210] sm:$0xf] }
 0x3c8   :  { %v1070_v32 = vpack.c.bf16 %v1068_v30, %v1067_v29  ;;  %v5153_v29 = vld [vmem:[%s8579_s9 + $0x240] sm:$0xf]  ;;  %v6620_v30 = vld [vmem:[%s8579_s9 + $0x244] sm:$0xf0]  ;;  %2030 = vmatpush.bf16.msrb.mxu2 %v4882_v28  ;;  %2043 = vmatpush.bf16.msrb.mxu0 %v4946_v34  ;;  %v6614_v28 = vld [vmem:[%s8579_s9 + $0x214] sm:$0xf0] }
 0x3c9   :  { %v5130_v16 = vor.u32 %v6614_v28, %v5129_v17  ;;  %v6656_v17 = vld [vmem:[%s8579_s9 + $0x364] sm:$0xf0] }
 0x3ca   :  { %1125 = vmatpush.bf16.msra.mxu3 %v1070_v32  ;;  %v6550_v32 = vld [vmem:[%s8579_s9 + $0x14] sm:$0xf0] }
 0x3cb   :  { %v4874_v35 = vor.u32 %v6550_v32, %v4873_v31  ;;  %v5073_v31 = vld [vmem:[%s8579_s9 + $0x1a0] sm:$0xf] }
 0x3cd   :  { %2031 = vmatpush.bf16.msrb.mxu2 %v4874_v35 }
 0x3ce   :  { %1126 = vmatpush.bf16.msra.mxu3 %v1069_v8  ;;  %v4937_v8 = vld [vmem:[%s8579_s9 + $0x90] sm:$0xf] }
 0x3cf   :  { %v4938_v48 = vor.u32 %v6566_v36, %v4937_v8  ;;  %v5121_v8 = vld [vmem:[%s8579_s9 + $0x200] sm:$0xf]  ;;  %v5065_v36 = vld [vmem:[%s8579_s9 + $0x190] sm:$0xf] }
 0x3d1   :  { %4858 = vmatmul.msk.bf16.vlgmr.msra.gmra.mxu3 %vm1103_vm4, %v6543_v9  ;;  %v5154_v9 = vor.u32 %v6620_v30, %v5153_v29  ;;  %2044 = vmatpush.bf16.msrb.mxu0 %v4938_v48  ;;  %v4993_v29 = vld [vmem:[%s8579_s9 + $0x100] sm:$0xf]  ;;  %v6580_v30 = vld [vmem:[%s8579_s9 + $0x104] sm:$0xf0] }
 0x3d2   :  { %2077 = vmatpush.bf16.msrb.mxu3 %v5178_v52  ;;  %2032 = vmatpush.bf16.msrb.mxu2 %v4866_v55  ;;  %v4994_v32 = vor.u32 %v6580_v30, %v4993_v29  ;;  %v5361_v48 = vld [vmem:[%s8579_s9 + $0x3e0] sm:$0xf]  ;;  %v5209_v29 = vld [vmem:[%s8579_s9 + $0x2b0] sm:$0xf]  ;;  %v6634_v30 = vld [vmem:[%s8579_s9 + $0x2b4] sm:$0xf0] }
 0x3d5   :  { %2045 = vmatpush.bf16.msrb.mxu0 %v4930_v49  ;;  %v5329_v49 = vld [vmem:[%s8579_s9 + $0x3a0] sm:$0xf] }
 0x3d6   :  { %2078 = vmatpush.bf16.msrb.mxu3 %v5170_v21  ;;  %2051 = vmatpush.bf16.msra.mxu2 %v5050_v39  ;;  %v6586_v21 = vld [vmem:[%s8579_s9 + $0x134] sm:$0xf0]  ;;  %v6668_v39 = vld [vmem:[%s8579_s9 + $0x3c4] sm:$0xf0] }
 0x3d7   :  { %v5018_v22 = vor.u32 %v6586_v21, %v5017_v15  ;;  %v5234_v21 = vor.u32 %v6640_v14, %v5233_v53 }
 0x3d9   :  { %2064 = vmatpush.bf16.msra.mxu0 %v5114_v63  ;;  %v6683_v63 = vld [vmem:[%s8579_s9 + $0x444] sm:$0xf] }
 0x3da   :  { %2079 = vmatpush.bf16.msrb.mxu3 %v5162_v27  ;;  %2052 = vmatpush.bf16.msra.mxu2 %v5042_v40  ;;  %v5002_v27 = vor.u32 %v6582_v26, %v5001_v7  ;;  %v5411_v40 = vld [vmem:[%s8579_s9 + $0x448] sm:$0xf0]  ;;  %v6636_v26 = vld [vmem:[%s8579_s9 + $0x2c4] sm:$0xf0] }
 0x3db   :  { %v5414_v1 = vor.u32 %v6683_v63, %v5411_v40  ;;  %v6577_v63 = vld [vmem:[%s8579_s9 + $0xf4] sm:$0xf] }
 0x3dd   :  { %2065 = vmatpush.bf16.msra.mxu0 %v5106_v3  ;;  %2249 = vmatpush.bf16.msrb.mxu1 %v5414_v1  ;;  %v5241_v3 = vld [vmem:[%s8579_s9 + $0x2f0] sm:$0xf]  ;;  %v6681_v1 = vld [vmem:[%s8579_s9 + $0x434] sm:$0xf] }
 0x3de   :  { %2080 = vmatpush.bf16.msrb.mxu3 %v5154_v9  ;;  %2053 = vmatpush.bf16.msra.mxu2 %v5034_v4  ;;  %v6612_v9 = vld [vmem:[%s8579_s9 + $0x204] sm:$0xf0]  ;;  %v6642_v4 = vld [vmem:[%s8579_s9 + $0x2f4] sm:$0xf0] }
 0x3df   :  { %v5122_v35 = vor.u32 %v6612_v9, %v5121_v8  ;;  %v5242_v11 = vor.u32 %v6642_v4, %v5241_v3  ;;  %v5201_v9 = vld [vmem:[%s8579_s9 + $0x2a0] sm:$0xf]  ;;  %v6688_v3 = vld [vmem:[%s8579_s9 + $0x464] sm:$0xf0] }
 0x3e1   :  { %4859 = vmatmul.msk.bf16.gmra.mxu3 %vm1103_vm4, %v6544_v42  ;;  %v6618_v42 = vld [vmem:[%s8579_s9 + $0x234] sm:$0xf0] }
 0x3e2   :  { %v5146_v54 = vor.u32 %v6618_v42, %v5145_v37  ;;  %2054 = vmatpush.bf16.msra.mxu2 %v5026_v13  ;;  %v6598_v37 = vld [vmem:[%s8579_s9 + $0x194] sm:$0xf0]  ;;  %v5369_v42 = vld [vmem:[%s8579_s9 + $0x3f0] sm:$0xf] }
 0x3e3   :  { %v5370_v45 = vor.u32 %v6674_v44, %v5369_v42  ;;  %v6652_v42 = vld [vmem:[%s8579_s9 + $0x344] sm:$0xf0] }
 0x3e4   :  { %2081 = vmatpush.bf16.msrb.mxu3 %v5146_v54  ;;  %v6672_v54 = vld [vmem:[%s8579_s9 + $0x3e4] sm:$0xf0] }
 0x3e5   :  { %v5362_v55 = vor.u32 %v6672_v54, %v5361_v48  ;;  %v6650_v48 = vld [vmem:[%s8579_s9 + $0x334] sm:$0xf0] }
 0x3e6   :  { %2055 = vmatpush.bf16.msra.mxu2 %v5018_v22  ;;  %v6638_v22 = vld [vmem:[%s8579_s9 + $0x2d4] sm:$0xf0] }
 0x3e8   :  { %2082 = vmatpush.bf16.msrb.mxu3 %v5138_v50  ;;  %v6664_v50 = vld [vmem:[%s8579_s9 + $0x3a4] sm:$0xf0] }
 0x3e9   :  { %v5330_v0 = vor.u32 %v6664_v50, %v5329_v49  ;;  %v5257_v49 = vld [vmem:[%s8579_s9 + $0x310] sm:$0xf]  ;;  %v6646_v50 = vld [vmem:[%s8579_s9 + $0x314] sm:$0xf0] }
 0x3ea   :  { %2056 = vmatpush.bf16.msra.mxu2 %v5010_v6  ;;  %v5217_v6 = vld [vmem:[%s8579_s9 + $0x2c0] sm:$0xf] }
 0x3eb   :  { %v5218_v28 = vor.u32 %v6636_v26, %v5217_v6  ;;  %v6679_v6 = vld [vmem:[%s8579_s9 + $0x424] sm:$0xf] }
 0x3ec   :  { %2083 = vmatpush.bf16.msrb.mxu3 %v5130_v16 }
 0x3ee   :  { %2057 = vmatpush.bf16.msra.mxu2 %v5002_v27  ;;  %v5297_v27 = vld [vmem:[%s8579_s9 + $0x360] sm:$0xf] }
 0x3ef   :  { %v5298_v16 = vor.u32 %v6656_v17, %v5297_v27  ;;  %v4971_v17 = vld [vmem:[%s8579_s9 + $0xd8] sm:$0xf0] }
 0x3f0   :  { %2084 = vmatpush.bf16.msrb.mxu3 %v5122_v35 }
 0x3f1   :  { %4860 = vmatmul.msk.bf16.gmra.mxu3 %vm1103_vm4, %v6545_v43  ;;  %v1097_v43 = vunpack.c.l.b16 %v1079_v33  ;;  %v6600_v33 = vld [vmem:[%s8579_s9 + $0x1a4] sm:$0xf0] }
 0x3f2   :  { %v5074_v34 = vor.u32 %v6600_v33, %v5073_v31  ;;  %2058 = vmatpush.bf16.msra.mxu2 %v4994_v32  ;;  %v5289_v31 = vld [vmem:[%s8579_s9 + $0x350] sm:$0xf]  ;;  %v6654_v32 = vld [vmem:[%s8579_s9 + $0x354] sm:$0xf0] }
 0x3f3   :  { %v1102_v58 = vpack.c.b16 %v1097_v43, %v1097_v43  ;;  %v5066_v43 = vor.u32 %v6598_v37, %v5065_v36  ;;  %v5290_v8 = vor.u32 %v6654_v32, %v5289_v31  ;;  %v6632_v36 = vld [vmem:[%s8579_s9 + $0x2a4] sm:$0xf0]  ;;  %v5281_v37 = vld [vmem:[%s8579_s9 + $0x340] sm:$0xf]  ;;  %v4915_v31 = vld [vmem:[%s8579_s9 + $0x68] sm:$0xf0] }
 0x3f4   :  { %2116 = vmatpush.bf16.msra.mxu3 %v5370_v45  ;;  %v5282_v44 = vor.u32 %v6652_v42, %v5281_v37  ;;  %v5193_v45 = vld [vmem:[%s8579_s9 + $0x290] sm:$0xf] }
 0x3f5   :  { %v5194_v54 = vor.u32 %v6630_v46, %v5193_v45  ;;  %v5401_v45 = vld [vmem:[%s8579_s9 + $0x430] sm:$0xf]  ;;  %v6682_v46 = vld [vmem:[%s8579_s9 + $0x434] sm:$0xf0] }
 0x3f8   :  { %2117 = vmatpush.bf16.msra.mxu3 %v5362_v55  ;;  %v5274_v55 = vor.u32 %v6650_v48, %v5273_v47  ;;  %v6557_v47 = vld [vmem:[%s8579_s9 + $0x54] sm:$0xf]  ;;  %v4907_v48 = vld [vmem:[%s8579_s9 + $0x58] sm:$0xf0] }
 0x3fc   :  { %2118 = vmatpush.bf16.msra.mxu3 %v5354_v57  ;;  %v6628_v57 = vld [vmem:[%s8579_s9 + $0x284] sm:$0xf0] }
 0x3fd   :  { %v5186_v61 = vor.u32 %v6628_v57, %v5185_v56  ;;  %v5379_v56 = vld [vmem:[%s8579_s9 + $0x408] sm:$0xf0]  ;;  %v5402_v57 = vor.u32 %v6682_v46, %v5401_v45  ;;  %v6623_v46 = vld [vmem:[%s8579_s9 + $0x264] sm:$0xf] }
 0x401   :  { %4861 = vmatmul.msk.bf16.gmra.mxu3 %vm1103_vm4, %v6546_v10  ;;  %v6606_v10 = vld [vmem:[%s8579_s9 + $0x1d4] sm:$0xf0] }
 0x402   :  { %v5098_v52 = vor.u32 %v6606_v10, %v5097_v5  ;;  %v5322_v5 = vor.u32 %v6662_v2, %v5321_v41  ;;  %v5403_v41 = vld [vmem:[%s8579_s9 + $0x438] sm:$0xf0]  ;;  %v5425_v2 = vld [vmem:[%s8579_s9 + $0x460] sm:$0xf] }
 0x403   :  { %v5406_v4 = vor.u32 %v6681_v1, %v5403_v41  ;;  %v5426_v14 = vor.u32 %v6688_v3, %v5425_v2  ;;  %v6567_v2 = vld [vmem:[%s8579_s9 + $0xa4] sm:$0xf]  ;;  %v4947_v3 = vld [vmem:[%s8579_s9 + $0xa8] sm:$0xf0] }
 0x404   :  { %2066 = vmatpush.bf16.msra.mxu0 %v5098_v52  ;;  %v6660_v52 = vld [vmem:[%s8579_s9 + $0x384] sm:$0xf0] }
 0x405   :  { %v5314_v15 = vor.u32 %v6660_v52, %v5313_v12  ;;  %v5249_v12 = vld [vmem:[%s8579_s9 + $0x300] sm:$0xf]  ;;  %v6644_v52 = vld [vmem:[%s8579_s9 + $0x304] sm:$0xf0]  ;;  %2250 = vmatpush.bf16.msrb.mxu1 %v5406_v4  ;;  %v5385_v4 = vld [vmem:[%s8579_s9 + $0x410] sm:$0xf] }
 0x408   :  { %2067 = vmatpush.bf16.msra.mxu0 %v5090_v20  ;;  %v5225_v20 = vld [vmem:[%s8579_s9 + $0x2d0] sm:$0xf] }
 0x409   :  { %v5226_v25 = vor.u32 %v6638_v22, %v5225_v20  ;;  %v5417_v20 = vld [vmem:[%s8579_s9 + $0x450] sm:$0xf]  ;;  %v6686_v22 = vld [vmem:[%s8579_s9 + $0x454] sm:$0xf0] }
 0x40a   :  { %v5418_v26 = vor.u32 %v6686_v22, %v5417_v20  ;;  %v5377_v20 = vld [vmem:[%s8579_s9 + $0x400] sm:$0xf]  ;;  %v6676_v22 = vld [vmem:[%s8579_s9 + $0x404] sm:$0xf0] }
 0x40c   :  { %2068 = vmatpush.bf16.msra.mxu0 %v5082_v18  ;;  %v5306_v18 = vor.u32 %v6658_v19, %v5305_v23  ;;  %v6561_v23 = vld [vmem:[%s8579_s9 + $0x74] sm:$0xf]  ;;  %v4923_v19 = vld [vmem:[%s8579_s9 + $0x78] sm:$0xf0] }
 0x40d   :  { %v4926_v27 = vor.u32 %v6561_v23, %v4923_v19  ;;  %v6551_v23 = vld [vmem:[%s8579_s9 + $0x24] sm:$0xf]  ;;  %v4883_v19 = vld [vmem:[%s8579_s9 + $0x28] sm:$0xf0] }
 0x410   :  { %2069 = vmatpush.bf16.msra.mxu0 %v5074_v34  ;;  %v5210_v34 = vor.u32 %v6634_v30, %v5209_v29  ;;  %v6684_v29 = vld [vmem:[%s8579_s9 + $0x444] sm:$0xf0]  ;;  %v6559_v30 = vld [vmem:[%s8579_s9 + $0x64] sm:$0xf] }
 0x411   :  { %4862 = vmatmul.msk.bf16.gmra.mxu3 %vm1103_vm4, %v1102_v58  ;;  %v5345_v58 = vld [vmem:[%s8579_s9 + $0x3c0] sm:$0xf]  ;;  %v4918_v42 = vor.u32 %v6559_v30, %v4915_v31  ;;  %v4875_v31 = vld [vmem:[%s8579_s9 + $0x18] sm:$0xf0] }
 0x412   :  { %v5346_v59 = vor.u32 %v6668_v39, %v5345_v58  ;;  %v5265_v58 = vld [vmem:[%s8579_s9 + $0x320] sm:$0xf]  ;;  %v6648_v39 = vld [vmem:[%s8579_s9 + $0x324] sm:$0xf0] }
 0x414   :  { %2070 = vmatpush.bf16.msra.mxu0 %v5066_v43  ;;  %2119 = vmatpush.bf16.msra.mxu3 %v5346_v59  ;;  %v5202_v43 = vor.u32 %v6632_v36, %v5201_v9  ;;  %v5433_v59 = vld [vmem:[%s8579_s9 + $0x470] sm:$0xf]  ;;  %v5387_v9 = vld [vmem:[%s8579_s9 + $0x418] sm:$0xf0] }
 0x415   :  { %v5434_v40 = vor.u32 %v6690_v60, %v5433_v59  ;;  %v4955_v59 = vld [vmem:[%s8579_s9 + $0xb8] sm:$0xf0]  ;;  %v5393_v60 = vld [vmem:[%s8579_s9 + $0x420] sm:$0xf] }
 0x418   :  { %2071 = vmatpush.bf16.msra.mxu0 %v5058_v51  ;;  %2120 = vmatpush.bf16.msra.mxu3 %v5338_v62  ;;  %v5266_v62 = vor.u32 %v6648_v39, %v5265_v58  ;;  %v4910_v58 = vor.u32 %v6557_v47, %v4907_v48  ;;  %v6569_v39 = vld [vmem:[%s8579_s9 + $0xb4] sm:$0xf]  ;;  %v5171_v47 = vld [vmem:[%s8579_s9 + $0x268] sm:$0xf0] }
 0x419   :  { %v6589_v48 = vld [vmem:[%s8579_s9 + $0x154] sm:$0xf] }
 0x41c   :  { %2121 = vmatpush.bf16.msra.mxu3 %v5330_v0  ;;  %v4987_v0 = vld [vmem:[%s8579_s9 + $0xf8] sm:$0xf0] }
 0x420   :  { %2122 = vmatpush.bf16.msra.mxu3 %v5322_v5 }
 0x424   :  { %2123 = vmatpush.bf16.msra.mxu3 %v5314_v15  ;;  %v6575_v15 = vld [vmem:[%s8579_s9 + $0xe4] sm:$0xf] }
 0x454   :  { %v1128_v10 = vpop.f32.mrf.mxu3 }
 0x455   :  { %v7659_v13 = vpack.c.bf16 %v1128_v10, %v1128_v10  ;;  %v5258_v10 = vor.u32 %v6646_v50, %v5257_v49  ;;  %v4899_v49 = vld [vmem:[%s8579_s9 + $0x48] sm:$0xf0] }
 0x457   :  { %2033 = vmatmul.bf16.vlgmr.msrb.gmra.mxu2 %v7659_v13 }
 0x458   :  { %2090 = vmatpush.bf16.msrb.mxu2 %v5242_v11  ;;  %v4990_v11 = vor.u32 %v6577_v63, %v4987_v0 }
 0x45c   :  { %2091 = vmatpush.bf16.msrb.mxu2 %v5234_v21  ;;  %v1130_v24 = vpop.f32.mrf.mxu3  ;;  %v4979_v21 = vld [vmem:[%s8579_s9 + $0xe8] sm:$0xf0] }
 0x45d   :  { %v7683_v7 = vpack.c.bf16 %v1130_v24, %v1130_v24  ;;  %v5250_v24 = vor.u32 %v6644_v52, %v5249_v12  ;;  %v4950_v12 = vor.u32 %v6567_v2, %v4947_v3  ;;  %v6619_v3 = vld [vmem:[%s8579_s9 + $0x244] sm:$0xf] }
 0x45f   :  { %2046 = vmatmul.bf16.vlgmr.msrb.gmra.mxu0 %v7683_v7 }
 0x460   :  { %2092 = vmatpush.bf16.msrb.mxu2 %v5226_v25  ;;  %2103 = vmatpush.bf16.msrb.mxu0 %v5306_v18  ;;  %v4982_v25 = vor.u32 %v6575_v15, %v4979_v21  ;;  %v6573_v18 = vld [vmem:[%s8579_s9 + $0xd4] sm:$0xf]  ;;  %v4939_v21 = vld [vmem:[%s8579_s9 + $0x98] sm:$0xf0] }
 0x461   :  { %v6565_v15 = vld [vmem:[%s8579_s9 + $0x94] sm:$0xf] }
 0x464   :  { %2093 = vmatpush.bf16.msrb.mxu2 %v5218_v28  ;;  %2104 = vmatpush.bf16.msrb.mxu0 %v5298_v16  ;;  %v1133_v33 = vpop.f32.mrf.mxu3  ;;  %v5409_v28 = vld [vmem:[%s8579_s9 + $0x440] sm:$0xf]  ;;  %v5395_v16 = vld [vmem:[%s8579_s9 + $0x428] sm:$0xf0] }
 0x465   :  { %v7710_v35 = vpack.c.bf16 %v1133_v33, %v1133_v33  ;;  %v5398_v32 = vor.u32 %v6679_v6, %v5395_v16  ;;  %v5410_v37 = vor.u32 %v6684_v29, %v5409_v28  ;;  %v4942_v6 = vor.u32 %v6565_v15, %v4939_v21  ;;  %v6563_v28 = vld [vmem:[%s8579_s9 + $0x84] sm:$0xf]  ;;  %v4931_v16 = vld [vmem:[%s8579_s9 + $0x88] sm:$0xf0]  ;;  %v6549_v29 = vld [vmem:[%s8579_s9 + $0x14] sm:$0xf] }
 0x467   :  { %2059 = vmatmul.bf16.vlgmr.msra.gmra.mxu2 %v7710_v35  ;;  %2251 = vmatpush.bf16.msrb.mxu1 %v5398_v32  ;;  %v6625_v32 = vld [vmem:[%s8579_s9 + $0x274] sm:$0xf] }
 0x468   :  { %2094 = vmatpush.bf16.msrb.mxu2 %v5210_v34  ;;  %2105 = vmatpush.bf16.msrb.mxu0 %v5290_v8  ;;  %v4974_v34 = vor.u32 %v6573_v18, %v4971_v17  ;;  %v6677_v8 = vld [vmem:[%s8579_s9 + $0x414] sm:$0xf]  ;;  %v4886_v17 = vor.u32 %v6551_v23, %v4883_v19  ;;  %v6583_v23 = vld [vmem:[%s8579_s9 + $0x124] sm:$0xf] }
 0x469   :  { %v6603_v19 = vld [vmem:[%s8579_s9 + $0x1c4] sm:$0xf] }
 0x46c   :  { %2095 = vmatpush.bf16.msrb.mxu2 %v5202_v43  ;;  %2106 = vmatpush.bf16.msrb.mxu0 %v5282_v44  ;;  %v1135_v51 = vpop.f32.mrf.mxu3  ;;  %v6571_v43 = vld [vmem:[%s8579_s9 + $0xc4] sm:$0xf]  ;;  %v4963_v44 = vld [vmem:[%s8579_s9 + $0xc8] sm:$0xf0] }
 0x46d   :  { %v7737_v38 = vpack.c.bf16 %v1135_v51, %v1135_v51  ;;  %v5390_v51 = vor.u32 %v6677_v8, %v5387_v9  ;;  %v5043_v8 = vld [vmem:[%s8579_s9 + $0x168] sm:$0xf0]  ;;  %v4934_v9 = vor.u32 %v6563_v28, %v4931_v16  ;;  %v5003_v28 = vld [vmem:[%s8579_s9 + $0x118] sm:$0xf0]  ;;  %v6601_v16 = vld [vmem:[%s8579_s9 + $0x1b4] sm:$0xf] }
 0x46f   :  { %2072 = vmatmul.bf16.vlgmr.msra.gmra.mxu0 %v7737_v38  ;;  %2252 = vmatpush.bf16.msrb.mxu1 %v5390_v51  ;;  %v5035_v51 = vld [vmem:[%s8579_s9 + $0x158] sm:$0xf0] }
 0x470   :  { %2096 = vmatpush.bf16.msrb.mxu2 %v5194_v54  ;;  %2107 = vmatpush.bf16.msrb.mxu0 %v5274_v55  ;;  %v4966_v54 = vor.u32 %v6571_v43, %v4963_v44  ;;  %v6675_v55 = vld [vmem:[%s8579_s9 + $0x404] sm:$0xf]  ;;  %v4867_v44 = vld [vmem:[%s8579_s9 + $0x8] sm:$0xf0] }
 0x471   :  { %v5382_v50 = vor.u32 %v6675_v55, %v5379_v56  ;;  %v6547_v43 = vld [vmem:[%s8579_s9 + $0x4] sm:$0xf]  ;;  %v5115_v55 = vld [vmem:[%s8579_s9 + $0x1f8] sm:$0xf0] }
 0x473   :  { %2253 = vmatpush.bf16.msrb.mxu1 %v5382_v50  ;;  %v5027_v50 = vld [vmem:[%s8579_s9 + $0x148] sm:$0xf0] }
 0x474   :  { %2097 = vmatpush.bf16.msrb.mxu2 %v5186_v61  ;;  %2108 = vmatpush.bf16.msrb.mxu0 %v5266_v62  ;;  %v1138_v5 = vpop.f32.mrf.mxu3  ;;  %v6680_v61 = vld [vmem:[%s8579_s9 + $0x424] sm:$0xf0]  ;;  %v6555_v62 = vld [vmem:[%s8579_s9 + $0x44] sm:$0xf] }
 0x475   :  { %v7785_v53 = vpack.c.bf16 %v1138_v5, %v1138_v5  ;;  %v5394_v1 = vor.u32 %v6680_v61, %v5393_v60  ;;  %v4902_v41 = vor.u32 %v6555_v62, %v4899_v49  ;;  %v6678_v5 = vld [vmem:[%s8579_s9 + $0x414] sm:$0xf0]  ;;  %v6621_v61 = vld [vmem:[%s8579_s9 + $0x254] sm:$0xf]  ;;  %v5163_v62 = vld [vmem:[%s8579_s9 + $0x258] sm:$0xf0] }
 0x476   :  { %v5386_v52 = vor.u32 %v6678_v5, %v5385_v4  ;;  %v6587_v49 = vld [vmem:[%s8579_s9 + $0x144] sm:$0xf]  ;;  %v5155_v4 = vld [vmem:[%s8579_s9 + $0x248] sm:$0xf0]  ;;  %v6585_v5 = vld [vmem:[%s8579_s9 + $0x134] sm:$0xf] }
 0x477   :  { %2085 = vmatmul.bf16.vlgmr.msrb.gmra.mxu3 %v7785_v53 }
 0x478   :  { %2129 = vmatpush.bf16.msra.mxu2 %v5434_v40  ;;  %2109 = vmatpush.bf16.msrb.mxu0 %v5258_v10  ;;  %v4958_v40 = vor.u32 %v6569_v39, %v4955_v59  ;;  %v6553_v10 = vld [vmem:[%s8579_s9 + $0x34] sm:$0xf]  ;;  %v5174_v39 = vor.u32 %v6623_v46, %v5171_v47  ;;  %v5038_v59 = vor.u32 %v6589_v48, %v5035_v51  ;;  %v6611_v48 = vld [vmem:[%s8579_s9 + $0x204] sm:$0xf]  ;;  %v5123_v51 = vld [vmem:[%s8579_s9 + $0x208] sm:$0xf0] }
 0x479   :  { %2155 = vmatpush.bf16.msrb.mxu3 %v4990_v11  ;;  %v4891_v11 = vld [vmem:[%s8579_s9 + $0x38] sm:$0xf0] }
 0x47c   :  { %2130 = vmatpush.bf16.msra.mxu2 %v5426_v14  ;;  %2110 = vmatpush.bf16.msrb.mxu0 %v5250_v24  ;;  %v1140_v33 = vpop.f32.mrf.mxu3  ;;  %v4894_v14 = vor.u32 %v6553_v10, %v4891_v11  ;;  %v6593_v24 = vld [vmem:[%s8579_s9 + $0x174] sm:$0xf]  ;;  %v5019_v10 = vld [vmem:[%s8579_s9 + $0x138] sm:$0xf0] }
 0x47d   :  { %2156 = vmatpush.bf16.msrb.mxu3 %v4982_v25  ;;  %v7836_v36 = vpack.c.bf16 %v1140_v33, %v1140_v33  ;;  %v5051_v25 = vld [vmem:[%s8579_s9 + $0x178] sm:$0xf0]  ;;  %v6605_v11 = vld [vmem:[%s8579_s9 + $0x1d4] sm:$0xf]  ;;  %v5022_v15 = vor.u32 %v6585_v5, %v5019_v10 }
 0x47e   :  { %v5054_v30 = vor.u32 %v6593_v24, %v5051_v25  ;;  %v5179_v33 = vld [vmem:[%s8579_s9 + $0x278] sm:$0xf0]  ;;  %v5091_v24 = vld [vmem:[%s8579_s9 + $0x1c8] sm:$0xf0] }
 0x47f   :  { %2098 = vmatmul.bf16.vlgmr.msrb.gmra.mxu2 %v7836_v36 }
 0x480   :  { %2131 = vmatpush.bf16.msra.mxu2 %v5418_v26  ;;  %2142 = vmatpush.bf16.msra.mxu0 %v4926_v27  ;;  %v5378_v27 = vor.u32 %v6676_v22, %v5377_v20  ;;  %v6617_v20 = vld [vmem:[%s8579_s9 + $0x234] sm:$0xf]  ;;  %v5147_v22 = vld [vmem:[%s8579_s9 + $0x238] sm:$0xf0] }
 0x481   :  { %2157 = vmatpush.bf16.msrb.mxu3 %v4974_v34  ;;  %v6591_v34 = vld [vmem:[%s8579_s9 + $0x164] sm:$0xf]  ;;  %v5150_v25 = vor.u32 %v6617_v20, %v5147_v22  ;;  %v5299_v20 = vld [vmem:[%s8579_s9 + $0x368] sm:$0xf0] }
 0x482   :  { %v5046_v45 = vor.u32 %v6591_v34, %v5043_v8  ;;  %v5131_v34 = vld [vmem:[%s8579_s9 + $0x218] sm:$0xf0]  ;;  %v6579_v8 = vld [vmem:[%s8579_s9 + $0x104] sm:$0xf] }
 0x484   :  { %2132 = vmatpush.bf16.msra.mxu2 %v5410_v37  ;;  %2143 = vmatpush.bf16.msra.mxu0 %v4918_v42  ;;  %v1143_v63 = vpop.f32.mrf.mxu3  ;;  %v4878_v37 = vor.u32 %v6549_v29, %v4875_v31  ;;  %v5182_v42 = vor.u32 %v6625_v32, %v5179_v33  ;;  %v5083_v29 = vld [vmem:[%s8579_s9 + $0x1b8] sm:$0xf0]  ;;  %v6613_v33 = vld [vmem:[%s8579_s9 + $0x214] sm:$0xf] }
 0x485   :  { %2158 = vmatpush.bf16.msrb.mxu3 %v4966_v54  ;;  %v7881_v0 = vpack.c.bf16 %v1143_v63, %v1143_v63  ;;  %v6609_v54 = vld [vmem:[%s8579_s9 + $0x1f4] sm:$0xf]  ;;  %v6607_v63 = vld [vmem:[%s8579_s9 + $0x1e4] sm:$0xf]  ;;  %v5086_v32 = vor.u32 %v6601_v16, %v5083_v29  ;;  %v5339_v16 = vld [vmem:[%s8579_s9 + $0x3b8] sm:$0xf0] }
 0x486   :  { %v5118_v60 = vor.u32 %v6609_v54, %v5115_v55  ;;  %v6597_v54 = vld [vmem:[%s8579_s9 + $0x194] sm:$0xf]  ;;  %v6631_v29 = vld [vmem:[%s8579_s9 + $0x2a4] sm:$0xf] }
 0x487   :  { %2111 = vmatmul.bf16.vlgmr.msrb.gmra.mxu0 %v7881_v0 }
 0x488   :  { %2133 = vmatpush.bf16.msra.mxu2 %v5402_v57  ;;  %2144 = vmatpush.bf16.msra.mxu0 %v4910_v58  ;;  %v4870_v58 = vor.u32 %v6547_v43, %v4867_v44  ;;  %v6641_v43 = vld [vmem:[%s8579_s9 + $0x2f4] sm:$0xf]  ;;  %v5243_v44 = vld [vmem:[%s8579_s9 + $0x2f8] sm:$0xf0] }
 0x489   :  { %2159 = vmatpush.bf16.msrb.mxu3 %v4958_v40  ;;  %v5107_v40 = vld [vmem:[%s8579_s9 + $0x1e8] sm:$0xf0]  ;;  %v5246_v55 = vor.u32 %v6641_v43, %v5243_v44  ;;  %v6649_v43 = vld [vmem:[%s8579_s9 + $0x334] sm:$0xf]  ;;  %v5275_v44 = vld [vmem:[%s8579_s9 + $0x338] sm:$0xf0] }
 0x48a   :  { %v5110_v2 = vor.u32 %v6607_v63, %v5107_v40  ;;  %v6671_v40 = vld [vmem:[%s8579_s9 + $0x3e4] sm:$0xf] }
 0x48c   :  { %2134 = vmatpush.bf16.msra.mxu2 %v5394_v1  ;;  %2145 = vmatpush.bf16.msra.mxu0 %v4902_v41  ;;  %v1145_v18 = vpop.f32.mrf.mxu3  ;;  %v5166_v1 = vor.u32 %v6621_v61, %v5163_v62  ;;  %v5030_v41 = vor.u32 %v6587_v49, %v5027_v50  ;;  %v6595_v49 = vld [vmem:[%s8579_s9 + $0x184] sm:$0xf]  ;;  %v5059_v50 = vld [vmem:[%s8579_s9 + $0x188] sm:$0xf0] }
 0x48d   :  { %2160 = vmatpush.bf16.msrb.mxu3 %v4950_v12  ;;  %v7926_v26 = vpack.c.bf16 %v1145_v18, %v1145_v18  ;;  %v5099_v12 = vld [vmem:[%s8579_s9 + $0x1d8] sm:$0xf0]  ;;  %v5062_v5 = vor.u32 %v6595_v49, %v5059_v50 }
 0x48e   :  { %v5102_v21 = vor.u32 %v6605_v11, %v5099_v12  ;;  %v5259_v49 = vld [vmem:[%s8579_s9 + $0x318] sm:$0xf0] }
 0x48f   :  { %2124 = vmatmul.bf16.vlgmr.msra.gmra.mxu3 %v7926_v26 }
 0x490   :  { %2135 = vmatpush.bf16.msra.mxu2 %v5386_v52  ;;  %2146 = vmatpush.bf16.msra.mxu0 %v4894_v14  ;;  %v5158_v14 = vor.u32 %v6619_v3, %v5155_v4  ;;  %v6657_v3 = vld [vmem:[%s8579_s9 + $0x374] sm:$0xf]  ;;  %v5307_v4 = vld [vmem:[%s8579_s9 + $0x378] sm:$0xf0] }
 0x491   :  { %2161 = vmatpush.bf16.msrb.mxu3 %v4942_v6  ;;  %v5094_v6 = vor.u32 %v6603_v19, %v5091_v24  ;;  %v5310_v12 = vor.u32 %v6657_v3, %v5307_v4  ;;  %v5347_v19 = vld [vmem:[%s8579_s9 + $0x3c8] sm:$0xf0]  ;;  %v6633_v24 = vld [vmem:[%s8579_s9 + $0x2b4] sm:$0xf] }
 0x494   :  { %2136 = vmatpush.bf16.msra.mxu2 %v5378_v27  ;;  %2147 = vmatpush.bf16.msra.mxu0 %v4886_v17  ;;  %v1148_v56 = vpop.f32.mrf.mxu3  ;;  %v5139_v27 = vld [vmem:[%s8579_s9 + $0x228] sm:$0xf0]  ;;  %v6581_v17 = vld [vmem:[%s8579_s9 + $0x114] sm:$0xf] }
 0x495   :  { %2162 = vmatpush.bf16.msrb.mxu3 %v4934_v9  ;;  %v1160_v57 = vpack.c.bf16 %v1148_v56, %v1148_v56  ;;  %v5006_v31 = vor.u32 %v6581_v17, %v5003_v28  ;;  %v4995_v9 = vld [vmem:[%s8579_s9 + $0x108] sm:$0xf0]  ;;  %v5067_v56 = vld [vmem:[%s8579_s9 + $0x198] sm:$0xf0]  ;;  %v6665_v28 = vld [vmem:[%s8579_s9 + $0x3b4] sm:$0xf] }
 0x496   :  { %v4998_v46 = vor.u32 %v6579_v8, %v4995_v9  ;;  %v5070_v61 = vor.u32 %v6597_v54, %v5067_v56  ;;  %v6663_v8 = vld [vmem:[%s8579_s9 + $0x3a4] sm:$0xf]  ;;  %v5331_v9 = vld [vmem:[%s8579_s9 + $0x3a8] sm:$0xf0] }
 0x497   :  { %2137 = vmatmul.bf16.vlgmr.msra.gmra.mxu2 %v1160_v57  ;;  %2254 = vmatmul.bf16.vlgmr.msrb.gmra.mxu1 %v1160_v57  ;;  %v6673_v57 = vld [vmem:[%s8579_s9 + $0x3f4] sm:$0xf]  ;;  %v6627_v54 = vld [vmem:[%s8579_s9 + $0x284] sm:$0xf] }
 0x498   :  { %2168 = vmatpush.bf16.msrb.mxu2 %v5054_v30  ;;  %2148 = vmatpush.bf16.msra.mxu0 %v4878_v37  ;;  %v6599_v37 = vld [vmem:[%s8579_s9 + $0x1a4] sm:$0xf] }
 0x499   :  { %2194 = vmatpush.bf16.msra.mxu3 %v5182_v42  ;;  %v5075_v42 = vld [vmem:[%s8579_s9 + $0x1a8] sm:$0xf0]  ;;  %v6647_v56 = vld [vmem:[%s8579_s9 + $0x324] sm:$0xf] }
 0x49a   :  { %v5078_v47 = vor.u32 %v6599_v37, %v5075_v42  ;;  %v6629_v37 = vld [vmem:[%s8579_s9 + $0x294] sm:$0xf]  ;;  %v5195_v42 = vld [vmem:[%s8579_s9 + $0x298] sm:$0xf0] }
 0x49c   :  { %2169 = vmatpush.bf16.msrb.mxu2 %v5046_v45  ;;  %2149 = vmatpush.bf16.msra.mxu0 %v4870_v58  ;;  %v1150_v52 = vpop.f32.mrf.mxu3  ;;  %v5134_v45 = vor.u32 %v6613_v33, %v5131_v34  ;;  %v5371_v58 = vld [vmem:[%s8579_s9 + $0x3f8] sm:$0xf0] }
 0x49d   :  { %2195 = vmatpush.bf16.msra.mxu3 %v5174_v39  ;;  %v6639_v39 = vld [vmem:[%s8579_s9 + $0x2e4] sm:$0xf]  ;;  %v5374_v62 = vor.u32 %v6673_v57, %v5371_v58  ;;  %v6669_v52 = vld [vmem:[%s8579_s9 + $0x3d4] sm:$0xf]  ;;  %v5267_v57 = vld [vmem:[%s8579_s9 + $0x328] sm:$0xf0] }
 0x49f   :  { %2150 = vmatmul.bf16.vlgmr.msra.gmra.mxu0 %v7659_v13  ;;  %2163 = vmatmul.bf16.vlgmr.msrb.gmra.mxu3 %v7683_v7  ;;  %v5011_v13 = vld [vmem:[%s8579_s9 + $0x128] sm:$0xf0]  ;;  %v6615_v7 = vld [vmem:[%s8579_s9 + $0x224] sm:$0xf] }
 0x4a0   :  { %2170 = vmatpush.bf16.msrb.mxu2 %v5038_v59  ;;  %2181 = vmatpush.bf16.msrb.mxu0 %v5118_v60  ;;  %v5014_v18 = vor.u32 %v6583_v23, %v5011_v13  ;;  %v5142_v30 = vor.u32 %v6615_v7, %v5139_v27  ;;  %v5235_v59 = vld [vmem:[%s8579_s9 + $0x2e8] sm:$0xf0]  ;;  %v5126_v60 = vor.u32 %v6611_v48, %v5123_v51  ;;  %v6661_v48 = vld [vmem:[%s8579_s9 + $0x394] sm:$0xf]  ;;  %v5323_v51 = vld [vmem:[%s8579_s9 + $0x398] sm:$0xf0] }
 0x4a1   :  { %2196 = vmatpush.bf16.msra.mxu3 %v5166_v1  ;;  %v5238_v63 = vor.u32 %v6639_v39, %v5235_v59  ;;  %v5363_v1 = vld [vmem:[%s8579_s9 + $0x3e8] sm:$0xf0]  ;;  %v5326_v58 = vor.u32 %v6661_v48, %v5323_v51  ;;  %v5270_v59 = vor.u32 %v6647_v56, %v5267_v57 }
 0x4a2   :  { %v5366_v10 = vor.u32 %v6671_v40, %v5363_v1  ;;  %v6643_v40 = vld [vmem:[%s8579_s9 + $0x304] sm:$0xf]  ;;  %v5251_v1 = vld [vmem:[%s8579_s9 + $0x308] sm:$0xf0] }
 0x4a4   :  { %2171 = vmatpush.bf16.msrb.mxu2 %v5030_v41  ;;  %2182 = vmatpush.bf16.msrb.mxu0 %v5110_v2  ;;  %v6637_v41 = vld [vmem:[%s8579_s9 + $0x2d4] sm:$0xf]  ;;  %v5227_v2 = vld [vmem:[%s8579_s9 + $0x2d8] sm:$0xf0] }
 0x4a5   :  { %2197 = vmatpush.bf16.msra.mxu3 %v5158_v14  ;;  %v5230_v11 = vor.u32 %v6637_v41, %v5227_v2  ;;  %v5355_v14 = vld [vmem:[%s8579_s9 + $0x3d8] sm:$0xf0]  ;;  %v5254_v41 = vor.u32 %v6643_v40, %v5251_v1 }
 0x4a6   :  { %v5358_v22 = vor.u32 %v6669_v52, %v5355_v14 }
 0x4a8   :  { %2172 = vmatpush.bf16.msrb.mxu2 %v5022_v15  ;;  %2183 = vmatpush.bf16.msrb.mxu0 %v5102_v21  ;;  %v5219_v15 = vld [vmem:[%s8579_s9 + $0x2c8] sm:$0xf0]  ;;  %v6655_v21 = vld [vmem:[%s8579_s9 + $0x364] sm:$0xf] }
 0x4a9   :  { %2198 = vmatpush.bf16.msra.mxu3 %v5150_v25  ;;  %v5302_v13 = vor.u32 %v6655_v21, %v5299_v20  ;;  %v5211_v25 = vld [vmem:[%s8579_s9 + $0x2b8] sm:$0xf0] }
 0x4aa   :  { %v5214_v27 = vor.u32 %v6633_v24, %v5211_v25  ;;  %v2259_v24 = vld [vmem:[%s8580_s10] sm:$0x3] }
 0x4ab   :  { %v2262_v1 = vperm.slane %v2259_v24, 1 }
 0x4ac   :  { %2173 = vmatpush.bf16.msrb.mxu2 %v5014_v18  ;;  %2184 = vmatpush.bf16.msrb.mxu0 %v5094_v6  ;;  %v6653_v18 = vld [vmem:[%s8579_s9 + $0x354] sm:$0xf]  ;;  %v5291_v6 = vld [vmem:[%s8579_s9 + $0x358] sm:$0xf0] }
 0x4ad   :  { %2199 = vmatpush.bf16.msra.mxu3 %v5142_v30  ;;  %v5294_v17 = vor.u32 %v6653_v18, %v5291_v6  ;;  %v6651_v30 = vld [vmem:[%s8579_s9 + $0x344] sm:$0xf]  ;;  %v2267_v18 = vld [vmem:[%s8581_s11] sm:$0x3] }
 0x4b0   :  { %2174 = vmatpush.bf16.msrb.mxu2 %v5006_v31  ;;  %2185 = vmatpush.bf16.msrb.mxu0 %v5086_v32  ;;  %v5283_v31 = vld [vmem:[%s8579_s9 + $0x348] sm:$0xf0]  ;;  %v5342_v32 = vor.u32 %v6665_v28, %v5339_v16 }
 0x4b1   :  { %2200 = vmatpush.bf16.msra.mxu3 %v5134_v45  ;;  %v5286_v34 = vor.u32 %v6651_v30, %v5283_v31  ;;  %v5334_v45 = vor.u32 %v6663_v8, %v5331_v9 }
 0x4b4   :  { %2175 = vmatpush.bf16.msrb.mxu2 %v4998_v46  ;;  %2186 = vmatpush.bf16.msrb.mxu0 %v5078_v47  ;;  %v5198_v46 = vor.u32 %v6629_v37, %v5195_v42  ;;  %v5278_v47 = vor.u32 %v6649_v43, %v5275_v44  ;;  %v8247_v42 = vld [vmem:[%s8582_s12] sm:$0xff] }
 0x4b5   :  { %2201 = vmatpush.bf16.msra.mxu3 %v5126_v60  ;;  %v6659_v60 = vld [vmem:[%s8579_s9 + $0x384] sm:$0xf] }
 0x4b7   :  { %2176 = vmatmul.bf16.vlgmr.msrb.gmra.mxu2 %v7710_v35  ;;  %v6635_v35 = vld [vmem:[%s8579_s9 + $0x2c4] sm:$0xf] }
 0x4b8   :  { %2207 = vmatpush.bf16.msra.mxu2 %v5246_v55  ;;  %2187 = vmatpush.bf16.msrb.mxu0 %v5070_v61  ;;  %v5222_v23 = vor.u32 %v6635_v35, %v5219_v15  ;;  %v5187_v55 = vld [vmem:[%s8579_s9 + $0x288] sm:$0xf0] }
 0x4b9   :  { %2233 = vmatpush.bf16.msrb.mxu3 %v5374_v62  ;;  %v5190_v39 = vor.u32 %v6627_v54, %v5187_v55  ;;  %v5315_v61 = vld [vmem:[%s8579_s9 + $0x388] sm:$0xf0]  ;;  %v6645_v62 = vld [vmem:[%s8579_s9 + $0x314] sm:$0xf] }
 0x4ba   :  { %2202 = vmatmul.bf16.vlgmr.msra.gmra.mxu3 %v7785_v53  ;;  %v6667_v53 = vld [vmem:[%s8579_s9 + $0x3c4] sm:$0xf]  ;;  %v5318_v50 = vor.u32 %v6659_v60, %v5315_v61  ;;  %v5565_v61 = vld [vmem:[#allocation6 + $0xe0] sm:$0xf] }
 0x4bb   :  { %v5350_v7 = vor.u32 %v6667_v53, %v5347_v19 }
 0x4bc   :  { %2208 = vmatpush.bf16.msra.mxu2 %v5238_v63  ;;  %2188 = vmatpush.bf16.msrb.mxu0 %v5062_v5  ;;  %v5262_v63 = vor.u32 %v6645_v62, %v5259_v49  ;;  %v6723_v62 = vld [vmem:[#allocation6 + $0xec] sm:$0xf0] }
 0x4bd   :  { %2234 = vmatpush.bf16.msrb.mxu3 %v5366_v10 }
 0x4bf   :  { %2189 = vmatmul.bf16.vlgmr.msrb.gmra.mxu0 %v7737_v38  ;;  %v5203_v38 = vld [vmem:[%s8579_s9 + $0x2a8] sm:$0xf0] }
 0x4c0   :  { %2209 = vmatpush.bf16.msra.mxu2 %v5230_v11  ;;  %2220 = vmatpush.bf16.msra.mxu0 %v5310_v12  ;;  %v5206_v33 = vor.u32 %v6631_v29, %v5203_v38  ;;  %v2269_v29 = vperm.slane %v2267_v18, 0 }
 0x4c1   :  { %2235 = vmatpush.bf16.msrb.mxu3 %v5358_v22 }
 0x4c4   :  { %2210 = vmatpush.bf16.msra.mxu2 %v5222_v23  ;;  %2221 = vmatpush.bf16.msra.mxu0 %v5302_v13 }
 0x4c5   :  { %2236 = vmatpush.bf16.msrb.mxu3 %v5350_v7 }
 0x4c8   :  { %2211 = vmatpush.bf16.msra.mxu2 %v5214_v27  ;;  %2222 = vmatpush.bf16.msra.mxu0 %v5294_v17  ;;  %v2261_v27 = vperm.slane %v2259_v24, 0 }
 0x4c9   :  { %2237 = vmatpush.bf16.msrb.mxu3 %v5342_v32 }
 0x4cc   :  { %2212 = vmatpush.bf16.msra.mxu2 %v5206_v33  ;;  %2223 = vmatpush.bf16.msra.mxu0 %v5286_v34 }
 0x4cd   :  { %2238 = vmatpush.bf16.msrb.mxu3 %v5334_v45  ;;  %v8254_v45 = vld [vmem:[%s8582_s12 + $0x8] sm:$0xff] }
 0x4d0   :  { %2213 = vmatpush.bf16.msra.mxu2 %v5198_v46  ;;  %2224 = vmatpush.bf16.msra.mxu0 %v5278_v47 }
 0x4d1   :  { %2239 = vmatpush.bf16.msrb.mxu3 %v5326_v58 }
 0x4d4   :  { %2214 = vmatpush.bf16.msra.mxu2 %v5190_v39  ;;  %2225 = vmatpush.bf16.msra.mxu0 %v5270_v59 }
 0x4d5   :  { %2240 = vmatpush.bf16.msrb.mxu3 %v5318_v50 }
 0x4d7   :  { %2215 = vmatmul.bf16.vlgmr.msra.gmra.mxu2 %v7836_v36 }
 0x4d8   :  { %2226 = vmatpush.bf16.msra.mxu0 %v5262_v63  ;;  %2241 = vmatmul.bf16.vlgmr.msrb.gmra.mxu3 %v7926_v26  ;;  %v5566_v63 = vor.u32 %v6723_v62, %v5565_v61 }
 0x4da   :  { %v2034_v2 = vpop.f32.mrf.mxu2 }
 0x4dc   :  { %2227 = vmatpush.bf16.msra.mxu0 %v5254_v41  ;;  %v2047_v3 = vpop.f32.mrf.mxu0  ;;  %v5549_v41 = vld [vmem:[#allocation6 + $0xc0] sm:$0xf] }
 0x4dd   :  { %v2048_v21 = vadd.f32 %v2047_v3, %v2034_v2  ;;  %v6719_v2 = vld [vmem:[#allocation6 + $0xcc] sm:$0xf0] }
 0x4de   :  { %v5550_v3 = vor.u32 %v6719_v2, %v5549_v41  ;;  %v6029_v2 = vld [vmem:[#allocation6 + $0x480] sm:$0xf] }
 0x4df   :  { %2228 = vmatmul.bf16.vlgmr.msra.gmra.mxu0 %v7881_v0 }
 0x4e2   :  { %v2036_v4 = vpop.f32.mrf.mxu2 }
 0x4e3   :  { %v5533_v4 = vld [vmem:[#allocation6 + $0xa0] sm:$0xf] }
 0x4e4   :  { %v2049_v5 = vpop.f32.mrf.mxu0 }
 0x4e5   :  { %v6715_v5 = vld [vmem:[#allocation6 + $0xac] sm:$0xf0] }
 0x4ea   :  { %v2060_v10 = vpop.f32.mrf.mxu2 }
 0x4eb   :  { %v2061_v22 = vadd.f32 %v2060_v10, %v2048_v21 }
 0x4ec   :  { %v2073_v11 = vpop.f32.mrf.mxu0 }
 0x4ed   :  { %v2074_v26 = vadd.f32 %v2073_v11, %v2061_v22  ;;  %v2270_v11 = vperm.slane %v2267_v18, 1  ;;  %v5821_v22 = vld [vmem:[#allocation6 + $0x2e0] sm:$0xf]  ;;  %v6783_v18 = vld [vmem:[#allocation6 + $0x2cc] sm:$0xf0] }
 0x4f2   :  { %v2062_v12 = vpop.f32.mrf.mxu2 }
 0x4f4   :  { %v2075_v52 = vpop.f32.mrf.mxu0 }
 0x4fa   :  { %v2086_v14 = vpop.f32.mrf.mxu3 }
 0x4fb   :  { %v2087_v13 = vadd.f32 %v2086_v14, %v2074_v26  ;;  %v5534_v14 = vor.u32 %v6715_v5, %v5533_v4  ;;  %v5709_v4 = vld [vmem:[#allocation6 + $0x200] sm:$0xf]  ;;  %v6759_v5 = vld [vmem:[#allocation6 + $0x20c] sm:$0xf0] }
 0x502   :  { %v2088_v35 = vpop.f32.mrf.mxu3  ;;  %v2099_v15 = vpop.f32.mrf.mxu2 }
 0x503   :  { %v2100_v0 = vadd.f32 %v2099_v15, %v2087_v13  ;;  %v5517_v15 = vld [vmem:[#allocation6 + $0x80] sm:$0xf] }
 0x504   :  { %v2112_v36 = vpop.f32.mrf.mxu0 }
 0x505   :  { %v2113_v25 = vadd.f32 %v2112_v36, %v2100_v0  ;;  %v6711_v36 = vld [vmem:[#allocation6 + $0x8c] sm:$0xf0] }
 0x506   :  { %v5518_v13 = vor.u32 %v6711_v36, %v5517_v15  ;;  %v6707_v0 = vld [vmem:[#allocation6 + $0x6c] sm:$0xf0]  ;;  %v6317_v36 = vld [vmem:[#allocation6 + $0x6c0] sm:$0xf] }
 0x50a   :  { %v2101_v20 = vpop.f32.mrf.mxu2 }
 0x50c   :  { %v2114_v23 = vpop.f32.mrf.mxu0 }
 0x50d   :  { %v6787_v23 = vld [vmem:[#allocation6 + $0x2ec] sm:$0xf0] }
 0x512   :  { %v2125_v53 = vpop.f32.mrf.mxu3 }
 0x513   :  { %v2126_v6 = vadd.f32 %v2125_v53, %v2113_v25  ;;  %v5501_v53 = vld [vmem:[#allocation6 + $0x60] sm:$0xf]  ;;  %v5822_v25 = vor.u32 %v6787_v23, %v5821_v22  ;;  %v6831_v22 = vld [vmem:[#allocation6 + $0x44c] sm:$0xf0] }
 0x514   :  { %v2255_v19 = vpop.f32.mrf.mxu1 }
 0x51a   :  { %v2127_v17 = vpop.f32.mrf.mxu3  ;;  %v2138_v28 = vpop.f32.mrf.mxu2 }
 0x51b   :  { %v2139_v16 = vadd.f32 %v2138_v28, %v2126_v6  ;;  %v6703_v17 = vld [vmem:[#allocation6 + $0x4c] sm:$0xf0] }
 0x51c   :  { %v2151_v7 = vpop.f32.mrf.mxu0  ;;  %v2257_v38 = vpop.f32.mrf.mxu1 }
 0x51d   :  { %v2265_v30 = vmul.f32 %v2261_v27, %v2139_v16  ;;  %v5485_v27 = vld [vmem:[#allocation6 + $0x40] sm:$0xf] }
 0x51e   :  { %v5789_v16 = vld [vmem:[#allocation6 + $0x2a0] sm:$0xf]  ;;  %v5486_v38 = vor.u32 %v6703_v17, %v5485_v27  ;;  %v6899_v17 = vld [vmem:[#allocation6 + $0x66c] sm:$0xf0] }
 0x51f   :  { %v2273_v31 = vadd.f32 %v2269_v29, %v2265_v30  ;;  %v6779_v29 = vld [vmem:[#allocation6 + $0x2ac] sm:$0xf0]  ;;  %v5469_v30 = vld [vmem:[#allocation6 + $0x20] sm:$0xf] }
 0x520   :  { %v6269_v27 = vld [vmem:[#allocation6 + $0x660] sm:$0xf] }
 0x521   :  { %v2275_v32 = vmax.f32 %v2273_v31, 0.0  ;;  %v6699_v31 = vld [vmem:[#allocation6 + $0x2c] sm:$0xf0] }
 0x522   :  { %v2164_v34 = vpop.f32.mrf.mxu3  ;;  %v2140_v8 = vpop.f32.mrf.mxu2 }
 0x523   :  { %v2277_v9 = vpack.c.bf16 %v2275_v32, %v2275_v32  ;;  %v2165_v55 = vadd.f32 %v2164_v34, %v2151_v7  ;;  %v5502_v7 = vor.u32 %v6707_v0, %v5501_v53  ;;  %v5790_v32 = vor.u32 %v6779_v29, %v5789_v16  ;;  %v6775_v34 = vld [vmem:[#allocation6 + $0x28c] sm:$0xf0]  ;;  %v5981_v0 = vld [vmem:[#allocation6 + $0x420] sm:$0xf] }
 0x524   :  { %v2153_v33 = vpop.f32.mrf.mxu0  ;;  %v5470_v8 = vor.u32 %v6699_v31, %v5469_v30  ;;  %v6823_v16 = vld [vmem:[#allocation6 + $0x40c] sm:$0xf0]  ;;  %v6270_v29 = vor.u32 %v6899_v17, %v6269_v27  ;;  %v5677_v30 = vld [vmem:[#allocation6 + $0x1c0] sm:$0xf] }
 0x525   :  { %v2302_v37 = vsel %vm2300_vm5, %v2277_v9, 0  ;;  %v5773_v33 = vld [vmem:[#allocation6 + $0x280] sm:$0xf]  ;;  %v6751_v31 = vld [vmem:[#allocation6 + $0x1cc] sm:$0xf0] }
 0x526   :  { %2314 = vmatpush.bf16.msrb.mxu2 %v2302_v37  ;;  %v5453_v9 = vld [vmem:[#allocation6] sm:$0xf]  ;;  %v6695_v37 = vld [vmem:[#allocation6 + $0xc] sm:$0xf0] }
 0x529   :  { %5447 = vmatmul.msk.bf16.vlgmr.msrb.gmra.mxu2 %vm2293_vm6, %v8247_v42 }
 0x52a   :  { %v2166_v43 = vpop.f32.mrf.mxu3  ;;  %3889 = vmatpush.bf16.msra.mxu2 %v5566_v63  ;;  %v5725_v63 = vld [vmem:[#allocation6 + $0x220] sm:$0xf] }
 0x52b   :  { %v5774_v43 = vor.u32 %v6775_v34, %v5773_v33  ;;  %v6895_v33 = vld [vmem:[#allocation6 + $0x64c] sm:$0xf0]  ;;  %v5678_v34 = vor.u32 %v6751_v31, %v5677_v30  ;;  %v5837_v30 = vld [vmem:[#allocation6 + $0x300] sm:$0xf] }
 0x52c   :  { %v6791_v31 = vld [vmem:[#allocation6 + $0x30c] sm:$0xf0] }
 0x52e   :  { %3890 = vmatpush.bf16.msra.mxu2 %v5550_v3  ;;  %v6839_v3 = vld [vmem:[#allocation6 + $0x48c] sm:$0xf0] }
 0x532   :  { %3891 = vmatpush.bf16.msra.mxu2 %v5534_v14  ;;  %v6013_v14 = vld [vmem:[#allocation6 + $0x460] sm:$0xf] }
 0x536   :  { %3892 = vmatpush.bf16.msra.mxu2 %v5518_v13  ;;  %v6907_v13 = vld [vmem:[#allocation6 + $0x6ac] sm:$0xf0] }
 0x539   :  { %5448 = vmatmul.msk.bf16.gmra.mxu2 %vm2293_vm6, %v8254_v45 }
 0x53a   :  { %v2177_v44 = vpop.f32.mrf.mxu2  ;;  %3893 = vmatpush.bf16.msra.mxu2 %v5502_v7 }
 0x53b   :  { %v2178_v56 = vadd.f32 %v2177_v44, %v2165_v55  ;;  %v6077_v44 = vld [vmem:[#allocation6 + $0x4e0] sm:$0xf] }
 0x53c   :  { %v2190_v46 = vpop.f32.mrf.mxu0  ;;  %v5741_v55 = vld [vmem:[#allocation6 + $0x240] sm:$0xf] }
 0x53d   :  { %v2203_v47 = vpop.f32.mrf.mxu3  ;;  %v2191_v57 = vadd.f32 %v2190_v46, %v2178_v56  ;;  %v6851_v46 = vld [vmem:[#allocation6 + $0x4ec] sm:$0xf0]  ;;  %v6061_v56 = vld [vmem:[#allocation6 + $0x4c0] sm:$0xf] }
 0x53e   :  { %3894 = vmatpush.bf16.msra.mxu2 %v5486_v38 }
 0x53f   :  { %v2204_v58 = vadd.f32 %v2203_v47, %v2191_v57  ;;  %v5757_v47 = vld [vmem:[#allocation6 + $0x260] sm:$0xf]  ;;  %v6847_v57 = vld [vmem:[#allocation6 + $0x4cc] sm:$0xf0] }
 0x540   :  { %v6062_v61 = vor.u32 %v6847_v57, %v6061_v56  ;;  %v5933_v56 = vld [vmem:[#allocation6 + $0x3c0] sm:$0xf] }
 0x541   :  { %v6221_v57 = vld [vmem:[#allocation6 + $0x600] sm:$0xf] }
 0x542   :  { %v2179_v48 = vpop.f32.mrf.mxu2  ;;  %3895 = vmatpush.bf16.msra.mxu2 %v5470_v8  ;;  %v5661_v8 = vld [vmem:[#allocation6 + $0x1a0] sm:$0xf] }
 0x543   :  { %v6771_v48 = vld [vmem:[#allocation6 + $0x26c] sm:$0xf0] }
 0x544   :  { %v2192_v51 = vpop.f32.mrf.mxu0 }
 0x545   :  { %v2205_v54 = vpop.f32.mrf.mxu3  ;;  %v6078_v51 = vor.u32 %v6851_v46, %v6077_v44  ;;  %v6819_v44 = vld [vmem:[#allocation6 + $0x3ec] sm:$0xf0]  ;;  %v6237_v46 = vld [vmem:[#allocation6 + $0x620] sm:$0xf] }
 0x546   :  { %v5758_v54 = vor.u32 %v6771_v48, %v5757_v47  ;;  %v6891_v47 = vld [vmem:[#allocation6 + $0x62c] sm:$0xf0] }
 0x55a   :  { %v2216_v39 = vpop.f32.mrf.mxu2 }
 0x55b   :  { %v2217_v59 = vadd.f32 %v2216_v39, %v2204_v58  ;;  %v2242_v50 = vpop.f32.mrf.mxu3  ;;  %v6767_v58 = vld [vmem:[#allocation6 + $0x24c] sm:$0xf0]  ;;  %v5693_v39 = vld [vmem:[#allocation6 + $0x1e0] sm:$0xf] }
 0x55c   :  { %v2229_v60 = vpop.f32.mrf.mxu0  ;;  %v5742_v62 = vor.u32 %v6767_v58, %v5741_v55  ;;  %v6743_v55 = vld [vmem:[#allocation6 + $0x18c] sm:$0xf0] }
 0x55d   :  { %v2230_v49 = vadd.f32 %v2229_v60, %v2217_v59  ;;  %v6755_v59 = vld [vmem:[#allocation6 + $0x1ec] sm:$0xf0] }
 0x55e   :  { %v5694_v60 = vor.u32 %v6755_v59, %v5693_v39  ;;  %v6887_v58 = vld [vmem:[#allocation6 + $0x60c] sm:$0xf0] }
 0x55f   :  { %v2243_v40 = vadd.f32 %v2242_v50, %v2230_v49  ;;  %v6045_v49 = vld [vmem:[#allocation6 + $0x4a0] sm:$0xf]  ;;  %v6843_v50 = vld [vmem:[#allocation6 + $0x4ac] sm:$0xf0] }
 0x560   :  { %3902 = vmatpush.bf16.msra.mxu3 %v5694_v60  ;;  %v6815_v59 = vld [vmem:[#allocation6 + $0x3cc] sm:$0xf0] }
 0x561   :  { %v2256_v10 = vadd.f32 %v2255_v19, %v2243_v40  ;;  %v5805_v19 = vld [vmem:[#allocation6 + $0x2c0] sm:$0xf]  ;;  %v6763_v40 = vld [vmem:[#allocation6 + $0x22c] sm:$0xf0]  ;;  %v5934_v60 = vor.u32 %v6815_v59, %v5933_v56  ;;  %v6709_v56 = vld [vmem:[#allocation6 + $0x84] sm:$0xf] }
 0x562   :  { %v2218_v12 = vpop.f32.mrf.mxu2  ;;  %v5806_v28 = vor.u32 %v6783_v18, %v5805_v19  ;;  %v5726_v41 = vor.u32 %v6763_v40, %v5725_v63  ;;  %v6285_v19 = vld [vmem:[#allocation6 + $0x680] sm:$0xf]  ;;  %v6903_v18 = vld [vmem:[#allocation6 + $0x68c] sm:$0xf0] }
 0x563   :  { %v2266_v52 = vmul.f32 %v2262_v1, %v2256_v10  ;;  %v2244_v21 = vpop.f32.mrf.mxu3  ;;  %v6046_v1 = vor.u32 %v6843_v50, %v6045_v49  ;;  %v6333_v10 = vld [vmem:[#allocation6 + $0x6e0] sm:$0xf]  ;;  %v6030_v12 = vor.u32 %v6839_v3, %v6029_v2  ;;  %v6286_v7 = vor.u32 %v6903_v18, %v6285_v19  ;;  %v6811_v40 = vld [vmem:[#allocation6 + $0x3ac] sm:$0xf0]  ;;  %v5567_v19 = vld [vmem:[#allocation6 + $0xf0] sm:$0xf0] }
 0x564   :  { %v2231_v35 = vpop.f32.mrf.mxu0  ;;  %v6911_v21 = vld [vmem:[#allocation6 + $0x6cc] sm:$0xf0]  ;;  %3903 = vmatpush.bf16.msra.mxu3 %v5678_v34  ;;  %v5917_v49 = vld [vmem:[#allocation6 + $0x3a0] sm:$0xf]  ;;  %v6222_v50 = vor.u32 %v6887_v58, %v6221_v57 }
 0x565   :  { %v2274_v20 = vadd.f32 %v2270_v11, %v2266_v52  ;;  %v6915_v11 = vld [vmem:[#allocation6 + $0x6ec] sm:$0xf0]  ;;  %v5710_v52 = vor.u32 %v6759_v5, %v5709_v4  ;;  %v6318_v23 = vor.u32 %v6911_v21, %v6317_v36  ;;  %v5901_v3 = vld [vmem:[#allocation6 + $0x380] sm:$0xf] }
 0x566   :  { %v6835_v35 = vld [vmem:[#allocation6 + $0x46c] sm:$0xf0]  ;;  %v6334_v15 = vor.u32 %v6915_v11, %v6333_v10  ;;  %v5597_v11 = vld [vmem:[#allocation6 + $0x120] sm:$0xf] }
 0x567   :  { %v2276_v26 = vmax.f32 %v2274_v20, 0.0  ;;  %v5997_v20 = vld [vmem:[#allocation6 + $0x440] sm:$0xf]  ;;  %v6735_v2 = vld [vmem:[#allocation6 + $0x14c] sm:$0xf0] }
 0x568   :  { %v5998_v53 = vor.u32 %v6831_v22, %v5997_v20  ;;  %v6807_v5 = vld [vmem:[#allocation6 + $0x38c] sm:$0xf0]  ;;  %v5581_v36 = vld [vmem:[#allocation6 + $0x100] sm:$0xf] }
 0x569   :  { %v2278_v24 = vpack.c.bf16 %v2276_v26, %v2276_v26  ;;  %v6301_v26 = vld [vmem:[#allocation6 + $0x6a0] sm:$0xf]  ;;  %v5902_v10 = vor.u32 %v6807_v5, %v5901_v3  ;;  %v6727_v21 = vld [vmem:[#allocation6 + $0x10c] sm:$0xf0] }
 0x56a   :  { %v5582_v20 = vor.u32 %v6727_v21, %v5581_v36  ;;  %v6799_v22 = vld [vmem:[#allocation6 + $0x34c] sm:$0xf0]  ;;  %v6413_v36 = vld [vmem:[#allocation6 + $0x780] sm:$0xf] }
 0x56b   :  { %v2305_v6 = vsel %vm2300_vm5, %v2278_v24, 0  ;;  %v6827_v24 = vld [vmem:[#allocation6 + $0x42c] sm:$0xf0] }
 0x56c   :  { %2333 = vmatpush.bf16.msrb.mxu0 %v2305_v6  ;;  %v5982_v6 = vor.u32 %v6827_v24, %v5981_v0  ;;  %v5853_v0 = vld [vmem:[#allocation6 + $0x320] sm:$0xf]  ;;  %v6795_v24 = vld [vmem:[#allocation6 + $0x32c] sm:$0xf0] }
 0x56d   :  { %v5854_v18 = vor.u32 %v6795_v24, %v5853_v0  ;;  %v6875_v34 = vld [vmem:[#allocation6 + $0x5ac] sm:$0xf0]  ;;  %v6773_v0 = vld [vmem:[#allocation6 + $0x284] sm:$0xf]  ;;  %v5775_v24 = vld [vmem:[#allocation6 + $0x290] sm:$0xf0] }
 0x56e   :  { %v6943_v58 = vld [vmem:[#allocation6 + $0x7cc] sm:$0xf0] }
 0x56f   :  { %5449 = vmatmul.msk.bf16.vlgmr.msrb.gmra.mxu0 %vm2293_vm6, %v8247_v42  ;;  %v5454_v42 = vor.u32 %v6695_v37, %v5453_v9  ;;  %v6747_v37 = vld [vmem:[#allocation6 + $0x1ac] sm:$0xf0] }
 0x570   :  { %3915 = vmatpush.bf16.msra.mxu0 %v5822_v25  ;;  %v6302_v25 = vor.u32 %v6907_v13, %v6301_v26  ;;  %v5662_v48 = vor.u32 %v6747_v37, %v5661_v8  ;;  %v6205_v26 = vld [vmem:[#allocation6 + $0x5e0] sm:$0xf]  ;;  %v6883_v13 = vld [vmem:[#allocation6 + $0x5ec] sm:$0xf0] }
 0x571   :  { %3896 = vmatpush.bf16.msra.mxu2 %v5454_v42  ;;  %v6947_v37 = vld [vmem:[#allocation6 + $0x7ec] sm:$0xf0] }
 0x572   :  { %3904 = vmatpush.bf16.msra.mxu3 %v5662_v48  ;;  %v6785_v48 = vld [vmem:[#allocation6 + $0x2e4] sm:$0xf]  ;;  %v6939_v3 = vld [vmem:[#allocation6 + $0x7ac] sm:$0xf0] }
 0x574   :  { %3916 = vmatpush.bf16.msra.mxu0 %v5806_v28  ;;  %v5965_v28 = vld [vmem:[#allocation6 + $0x400] sm:$0xf] }
 0x575   :  { %3941 = vmatpush.bf16.msrb.mxu2 %v6078_v51  ;;  %v5966_v38 = vor.u32 %v6823_v16, %v5965_v28  ;;  %v6238_v51 = vor.u32 %v6891_v47, %v6237_v46  ;;  %v6717_v16 = vld [vmem:[#allocation6 + $0xc4] sm:$0xf]  ;;  %v5535_v47 = vld [vmem:[#allocation6 + $0xb0] sm:$0xf0] }
 0x578   :  { %3917 = vmatpush.bf16.msra.mxu0 %v5790_v32  ;;  %v6253_v32 = vld [vmem:[#allocation6 + $0x640] sm:$0xf] }
 0x579   :  { %3942 = vmatpush.bf16.msrb.mxu2 %v6062_v61  ;;  %v6254_v9 = vor.u32 %v6895_v33, %v6253_v32  ;;  %v5629_v61 = vld [vmem:[#allocation6 + $0x160] sm:$0xf]  ;;  %v5838_v32 = vor.u32 %v6791_v31, %v5837_v30  ;;  %v5471_v30 = vld [vmem:[#allocation6 + $0x30] sm:$0xf0]  ;;  %v6769_v31 = vld [vmem:[#allocation6 + $0x264] sm:$0xf] }
 0x57a   :  { %v6173_v33 = vld [vmem:[#allocation6 + $0x5a0] sm:$0xf] }
 0x57b   :  { %v6174_v8 = vor.u32 %v6875_v34, %v6173_v33  ;;  %v6093_v33 = vld [vmem:[#allocation6 + $0x500] sm:$0xf]  ;;  %v6855_v34 = vld [vmem:[#allocation6 + $0x50c] sm:$0xf0] }
 0x57c   :  { %3918 = vmatpush.bf16.msra.mxu0 %v5774_v43  ;;  %v5949_v43 = vld [vmem:[#allocation6 + $0x3e0] sm:$0xf] }
 0x57d   :  { %3943 = vmatpush.bf16.msrb.mxu2 %v6046_v1  ;;  %v5950_v42 = vor.u32 %v6819_v44, %v5949_v43  ;;  %v5918_v1 = vor.u32 %v6811_v40, %v5917_v49  ;;  %v6713_v44 = vld [vmem:[#allocation6 + $0xa4] sm:$0xf]  ;;  %v5807_v49 = vld [vmem:[#allocation6 + $0x2d0] sm:$0xf0]  ;;  %v6141_v40 = vld [vmem:[#allocation6 + $0x560] sm:$0xf] }
 0x57e   :  { %v5538_v59 = vor.u32 %v6713_v44, %v5535_v47  ;;  %v6693_v47 = vld [vmem:[#allocation6 + $0x4] sm:$0xf] }
 0x57f   :  { %5450 = vmatmul.msk.bf16.gmra.mxu0 %vm2293_vm6, %v8254_v45  ;;  %v6014_v45 = vor.u32 %v6835_v35, %v6013_v14  ;;  %3928 = vmatpush.bf16.msra.mxu1 %v5950_v42  ;;  %v6803_v35 = vld [vmem:[#allocation6 + $0x36c] sm:$0xf0]  ;;  %v5823_v42 = vld [vmem:[#allocation6 + $0x2f0] sm:$0xf0] }
 0x580   :  { %3919 = vmatpush.bf16.msra.mxu0 %v5758_v54  ;;  %v5645_v54 = vld [vmem:[#allocation6 + $0x180] sm:$0xf] }
 0x581   :  { %3944 = vmatpush.bf16.msrb.mxu2 %v6030_v12  ;;  %v5646_v39 = vor.u32 %v6743_v55, %v5645_v54  ;;  %v6731_v12 = vld [vmem:[#allocation6 + $0x12c] sm:$0xf0]  ;;  %v6445_v55 = vld [vmem:[#allocation6 + $0x7c0] sm:$0xf] }
 0x582   :  { %v5598_v14 = vor.u32 %v6731_v12, %v5597_v11  ;;  %v6871_v54 = vld [vmem:[#allocation6 + $0x58c] sm:$0xf0]  ;;  %v5503_v12 = vld [vmem:[#allocation6 + $0x70] sm:$0xf0] }
 0x583   :  { %3905 = vmatpush.bf16.msra.mxu3 %v5646_v39  ;;  %3929 = vmatpush.bf16.msra.mxu1 %v5934_v60  ;;  %v5826_v60 = vor.u32 %v6785_v48, %v5823_v42 }
 0x584   :  { %3920 = vmatpush.bf16.msra.mxu0 %v5742_v62  ;;  %v6739_v62 = vld [vmem:[#allocation6 + $0x16c] sm:$0xf0] }
 0x585   :  { %3945 = vmatpush.bf16.msrb.mxu2 %v6014_v45  ;;  %v5630_v63 = vor.u32 %v6739_v62, %v5629_v61  ;;  %v5869_v45 = vld [vmem:[#allocation6 + $0x340] sm:$0xf]  ;;  %v5519_v61 = vld [vmem:[#allocation6 + $0x90] sm:$0xf0]  ;;  %v6781_v62 = vld [vmem:[#allocation6 + $0x2c4] sm:$0xf] }
 0x586   :  { %v5810_v11 = vor.u32 %v6781_v62, %v5807_v49  ;;  %v6761_v49 = vld [vmem:[#allocation6 + $0x224] sm:$0xf] }
 0x587   :  { %3906 = vmatpush.bf16.msra.mxu3 %v5630_v63  ;;  %3930 = vmatpush.bf16.msra.mxu1 %v5918_v1  ;;  %v6867_v1 = vld [vmem:[#allocation6 + $0x56c] sm:$0xf0] }
 0x588   :  { %3921 = vmatpush.bf16.msra.mxu0 %v5726_v41  ;;  %v5613_v41 = vld [vmem:[#allocation6 + $0x140] sm:$0xf] }
 0x589   :  { %3946 = vmatpush.bf16.msrb.mxu2 %v5998_v53  ;;  %v5614_v4 = vor.u32 %v6735_v2, %v5613_v41  ;;  %v6206_v53 = vor.u32 %v6883_v13, %v6205_v26  ;;  %v6429_v41 = vld [vmem:[#allocation6 + $0x7a0] sm:$0xf]  ;;  %v6142_v2 = vor.u32 %v6867_v1, %v6141_v40  ;;  %v6845_v40 = vld [vmem:[#allocation6 + $0x4c4] sm:$0xf]  ;;  %v6063_v1 = vld [vmem:[#allocation6 + $0x4d0] sm:$0xf0] }
 0x58a   :  { %v6430_v5 = vor.u32 %v6939_v3, %v6429_v41  ;;  %v6349_v41 = vld [vmem:[#allocation6 + $0x700] sm:$0xf] }
 0x58b   :  { %3907 = vmatpush.bf16.msra.mxu3 %v5614_v4  ;;  %3931 = vmatpush.bf16.msra.mxu1 %v5902_v10  ;;  %v6705_v4 = vld [vmem:[#allocation6 + $0x64] sm:$0xf]  ;;  %v5522_v10 = vor.u32 %v6709_v56, %v5519_v61 }
 0x58c   :  { %3922 = vmatpush.bf16.msra.mxu0 %v5710_v52  ;;  %v5885_v52 = vld [vmem:[#allocation6 + $0x360] sm:$0xf]  ;;  %v6849_v56 = vld [vmem:[#allocation6 + $0x4e4] sm:$0xf] }
 0x58d   :  { %3947 = vmatpush.bf16.msrb.mxu2 %v5982_v6  ;;  %v6189_v6 = vld [vmem:[#allocation6 + $0x5c0] sm:$0xf] }
 0x58f   :  { %3908 = vmatpush.bf16.msra.mxu3 %v5598_v14  ;;  %v5791_v14 = vld [vmem:[#allocation6 + $0x2b0] sm:$0xf0] }
 0x590   :  { %3967 = vmatpush.bf16.msrb.mxu0 %v6334_v15  ;;  %v5886_v15 = vor.u32 %v6803_v35, %v5885_v52  ;;  %v6777_v52 = vld [vmem:[#allocation6 + $0x2a4] sm:$0xf]  ;;  %v6125_v35 = vld [vmem:[#allocation6 + $0x540] sm:$0xf] }
 0x591   :  { %3948 = vmatpush.bf16.msrb.mxu2 %v5966_v38  ;;  %v5551_v38 = vld [vmem:[#allocation6 + $0xd0] sm:$0xf0]  ;;  %v5794_v26 = vor.u32 %v6777_v52, %v5791_v14  ;;  %v6913_v14 = vld [vmem:[#allocation6 + $0x6e4] sm:$0xf] }
 0x592   :  { %3932 = vmatpush.bf16.msra.mxu1 %v5886_v15  ;;  %v5554_v43 = vor.u32 %v6717_v16, %v5551_v38  ;;  %v6863_v15 = vld [vmem:[#allocation6 + $0x54c] sm:$0xf0]  ;;  %v5778_v16 = vor.u32 %v6773_v0, %v5775_v24  ;;  %v6697_v38 = vld [vmem:[#allocation6 + $0x24] sm:$0xf]  ;;  %v6047_v52 = vld [vmem:[#allocation6 + $0x4b0] sm:$0xf0] }
 0x593   :  { %3909 = vmatpush.bf16.msra.mxu3 %v5582_v20  ;;  %v6126_v21 = vor.u32 %v6863_v15, %v6125_v35  ;;  %v6701_v20 = vld [vmem:[#allocation6 + $0x44] sm:$0xf]  ;;  %v6335_v35 = vld [vmem:[#allocation6 + $0x6f0] sm:$0xf0] }
 0x594   :  { %3968 = vmatpush.bf16.msrb.mxu0 %v6318_v23  ;;  %v5870_v23 = vor.u32 %v6799_v22, %v5869_v45  ;;  %v6935_v45 = vld [vmem:[#allocation6 + $0x78c] sm:$0xf0]  ;;  %v6015_v0 = vld [vmem:[#allocation6 + $0x470] sm:$0xf0]  ;;  %v6905_v24 = vld [vmem:[#allocation6 + $0x6a4] sm:$0xf] }
 0x595   :  { %v6414_v22 = vor.u32 %v6935_v45, %v6413_v36  ;;  %v6837_v45 = vld [vmem:[#allocation6 + $0x484] sm:$0xf] }
 0x596   :  { %3933 = vmatpush.bf16.msra.mxu1 %v5870_v23  ;;  %v5506_v23 = vor.u32 %v6705_v4, %v5503_v12  ;;  %v6841_v12 = vld [vmem:[#allocation6 + $0x4a4] sm:$0xf] }
 0x597   :  { %3954 = vmatpush.bf16.msrb.mxu3 %v6206_v53  ;;  %v5487_v53 = vld [vmem:[#allocation6 + $0x50] sm:$0xf0]  ;;  %v6050_v36 = vor.u32 %v6841_v12, %v6047_v52  ;;  %v6741_v12 = vld [vmem:[#allocation6 + $0x184] sm:$0xf]  ;;  %v5541_v52 = vld [vmem:[#allocation6 + $0xa8] sm:$0xf] }
 0x598   :  { %3969 = vmatpush.bf16.msrb.mxu0 %v6302_v25  ;;  %v6721_v25 = vld [vmem:[#allocation6 + $0xe4] sm:$0xf] }
 0x599   :  { %v5570_v28 = vor.u32 %v6721_v25, %v5567_v19  ;;  %v6109_v19 = vld [vmem:[#allocation6 + $0x520] sm:$0xf] }
 0x59a   :  { %3934 = vmatpush.bf16.msra.mxu1 %v5854_v18  ;;  %v6859_v18 = vld [vmem:[#allocation6 + $0x52c] sm:$0xf0] }
 0x59c   :  { %3970 = vmatpush.bf16.msrb.mxu0 %v6286_v7  ;;  %v6879_v7 = vld [vmem:[#allocation6 + $0x5cc] sm:$0xf0] }
 0x59d   :  { %v6190_v27 = vor.u32 %v6879_v7, %v6189_v6  ;;  %v6397_v6 = vld [vmem:[#allocation6 + $0x760] sm:$0xf]  ;;  %v6110_v7 = vor.u32 %v6859_v18, %v6109_v19  ;;  %v6303_v19 = vld [vmem:[#allocation6 + $0x6b0] sm:$0xf0] }
 0x59e   :  { %3935 = vmatpush.bf16.msra.mxu1 %v5838_v32  ;;  %v5759_v32 = vld [vmem:[#allocation6 + $0x270] sm:$0xf0] }
 0x59f   :  { %3955 = vmatpush.bf16.msrb.mxu3 %v6190_v27  ;;  %v6931_v27 = vld [vmem:[#allocation6 + $0x76c] sm:$0xf0]  ;;  %v5762_v44 = vor.u32 %v6769_v31, %v5759_v32  ;;  %v5983_v31 = vld [vmem:[#allocation6 + $0x430] sm:$0xf0]  ;;  %v6897_v32 = vld [vmem:[#allocation6 + $0x664] sm:$0xf] }
 0x5a0   :  { %3971 = vmatpush.bf16.msrb.mxu0 %v6270_v29 }
 0x5a3   :  { %3956 = vmatpush.bf16.msrb.mxu3 %v6174_v8  ;;  %v6381_v8 = vld [vmem:[#allocation6 + $0x740] sm:$0xf] }
 0x5a4   :  { %3972 = vmatpush.bf16.msrb.mxu0 %v6254_v9  ;;  %v6461_v9 = vld [vmem:[#allocation6 + $0x7e0] sm:$0xf] }
 0x5a5   :  { %v6462_v46 = vor.u32 %v6947_v37, %v6461_v9  ;;  %v6094_v9 = vor.u32 %v6855_v34, %v6093_v33  ;;  %v6927_v37 = vld [vmem:[#allocation6 + $0x74c] sm:$0xf0]  ;;  %v6271_v33 = vld [vmem:[#allocation6 + $0x670] sm:$0xf0]  ;;  %v6753_v34 = vld [vmem:[#allocation6 + $0x1e4] sm:$0xf] }
 0x5a6   :  { %v6382_v48 = vor.u32 %v6927_v37, %v6381_v8  ;;  %v5695_v8 = vld [vmem:[#allocation6 + $0x1f0] sm:$0xf0]  ;;  %v6274_v37 = vor.u32 %v6897_v32, %v6271_v33 }
 0x5a7   :  { %3980 = vmatpush.bf16.msrb.mxu1 %v6462_v46 }
 0x5a8   :  { %3973 = vmatpush.bf16.msrb.mxu0 %v6238_v51  ;;  %v6157_v51 = vld [vmem:[#allocation6 + $0x580] sm:$0xf] }
 0x5a9   :  { %v6158_v57 = vor.u32 %v6871_v54, %v6157_v51  ;;  %v5455_v51 = vld [vmem:[#allocation6 + $0x10] sm:$0xf0]  ;;  %v6765_v54 = vld [vmem:[#allocation6 + $0x244] sm:$0xf] }
 0x5ab   :  { %3957 = vmatpush.bf16.msrb.mxu3 %v6158_v57  ;;  %v6079_v57 = vld [vmem:[#allocation6 + $0x4f0] sm:$0xf0] }
 0x5ac   :  { %3974 = vmatpush.bf16.msrb.mxu0 %v6222_v50  ;;  %v2316_v17 = vpop.f32.mrf.mxu2  ;;  %v6446_v50 = vor.u32 %v6943_v58, %v6445_v55  ;;  %v5743_v55 = vld [vmem:[#allocation6 + $0x250] sm:$0xf0]  ;;  %v6365_v58 = vld [vmem:[#allocation6 + $0x720] sm:$0xf]  ;;  %v6082_v62 = vor.u32 %v6849_v56, %v6079_v57  ;;  %v6749_v57 = vld [vmem:[#allocation6 + $0x1c4] sm:$0xf] }
 0x5ad   :  { %v8263_v29 = vpack.c.bf16 %v2316_v17, %v2316_v17  ;;  %v6398_v17 = vor.u32 %v6931_v27, %v6397_v6  ;;  %v6306_v6 = vor.u32 %v6905_v24, %v6303_v19  ;;  %v5999_v27 = vld [vmem:[#allocation6 + $0x450] sm:$0xf0] }
 0x5ae   :  { %3981 = vmatpush.bf16.msrb.mxu1 %v6446_v50  ;;  %v5727_v50 = vld [vmem:[#allocation6 + $0x230] sm:$0xf0] }
 0x5af   :  { %3897 = vmatmul.bf16.vlgmr.msra.gmra.mxu2 %v8263_v29  ;;  %3958 = vmatpush.bf16.msrb.mxu3 %v6142_v2  ;;  %v6919_v2 = vld [vmem:[#allocation6 + $0x70c] sm:$0xf0]  ;;  %v5730_v3 = vor.u32 %v6761_v49, %v5727_v50  ;;  %v6745_v50 = vld [vmem:[#allocation6 + $0x1a4] sm:$0xf] }
 0x5b0   :  { %3993 = vmatpush.bf16.msra.mxu2 %v5570_v28  ;;  %v5490_v28 = vor.u32 %v6701_v20, %v5487_v53  ;;  %v6350_v4 = vor.u32 %v6919_v2, %v6349_v41  ;;  %v6031_v20 = vld [vmem:[#allocation6 + $0x490] sm:$0xf0]  ;;  %v6833_v53 = vld [vmem:[#allocation6 + $0x464] sm:$0xf] }
 0x5b1   :  { %v6018_v18 = vor.u32 %v6833_v53, %v6015_v0  ;;  %v5663_v41 = vld [vmem:[#allocation6 + $0x1b0] sm:$0xf0]  ;;  %v6817_v2 = vld [vmem:[#allocation6 + $0x3e4] sm:$0xf] }
 0x5b2   :  { %3982 = vmatpush.bf16.msrb.mxu1 %v6430_v5  ;;  %v6066_v5 = vor.u32 %v6845_v40, %v6063_v1  ;;  %v5557_v40 = vld [vmem:[#allocation6 + $0xc8] sm:$0xf]  ;;  %v6720_v1 = vld [vmem:[#allocation6 + $0xd4] sm:$0xf0] }
 0x5b3   :  { %3959 = vmatpush.bf16.msrb.mxu3 %v6126_v21  ;;  %v6338_v21 = vor.u32 %v6913_v14, %v6335_v35  ;;  %v5666_v35 = vor.u32 %v6745_v50, %v5663_v41  ;;  %v5781_v50 = vld [vmem:[#allocation6 + $0x288] sm:$0xf]  ;;  %v6725_v41 = vld [vmem:[#allocation6 + $0x104] sm:$0xf] }
 0x5b4   :  { %3994 = vmatpush.bf16.msra.mxu2 %v5554_v43  ;;  %v2318_v39 = vpop.f32.mrf.mxu2  ;;  %v5474_v43 = vor.u32 %v6697_v38, %v5471_v30  ;;  %v6825_v30 = vld [vmem:[#allocation6 + $0x424] sm:$0xf] }
 0x5b5   :  { %v8266_v63 = vpack.c.bf16 %v2318_v39, %v2318_v39  ;;  %v6923_v39 = vld [vmem:[#allocation6 + $0x72c] sm:$0xf0] }
 0x5b6   :  { %3983 = vmatpush.bf16.msrb.mxu1 %v6414_v22  ;;  %v6366_v61 = vor.u32 %v6923_v39, %v6365_v58  ;;  %v6909_v22 = vld [vmem:[#allocation6 + $0x6c4] sm:$0xf]  ;;  %v5679_v58 = vld [vmem:[#allocation6 + $0x1d0] sm:$0xf0] }
 0x5b7   :  { %3923 = vmatmul.bf16.vlgmr.msra.gmra.mxu0 %v8266_v63  ;;  %3960 = vmatpush.bf16.msrb.mxu3 %v6110_v7  ;;  %v6829_v7 = vld [vmem:[#allocation6 + $0x444] sm:$0xf]  ;;  %v5682_v49 = vor.u32 %v6749_v57, %v5679_v58 }
 0x5b8   :  { %3995 = vmatpush.bf16.msra.mxu2 %v5538_v59  ;;  %4019 = vmatpush.bf16.msra.mxu0 %v5826_v60  ;;  %v5458_v59 = vor.u32 %v6693_v47, %v5455_v51  ;;  %v5746_v60 = vor.u32 %v6765_v54, %v5743_v55  ;;  %v6255_v47 = vld [vmem:[#allocation6 + $0x650] sm:$0xf0]  ;;  %v5698_v51 = vor.u32 %v6753_v34, %v5695_v8  ;;  %v5573_v54 = vld [vmem:[#allocation6 + $0xe8] sm:$0xf]  ;;  %v6724_v55 = vld [vmem:[#allocation6 + $0xf4] sm:$0xf0] }
 0x5b9   :  { %v6733_v34 = vld [vmem:[#allocation6 + $0x144] sm:$0xf]  ;;  %v5509_v8 = vld [vmem:[#allocation6 + $0x68] sm:$0xf] }
 0x5ba   :  { %3984 = vmatpush.bf16.msrb.mxu1 %v6398_v17  ;;  %v6901_v17 = vld [vmem:[#allocation6 + $0x684] sm:$0xf] }
 0x5bb   :  { %3961 = vmatpush.bf16.msrb.mxu3 %v6094_v9  ;;  %v5986_v9 = vor.u32 %v6825_v30, %v5983_v31  ;;  %v6729_v58 = vld [vmem:[#allocation6 + $0x124] sm:$0xf] }
 0x5bc   :  { %3996 = vmatpush.bf16.msra.mxu2 %v5522_v10  ;;  %4020 = vmatpush.bf16.msra.mxu0 %v5810_v11  ;;  %v2321_v13 = vpop.f32.mrf.mxu2  ;;  %v6757_v10 = vld [vmem:[#allocation6 + $0x204] sm:$0xf]  ;;  %v5711_v11 = vld [vmem:[#allocation6 + $0x210] sm:$0xf0] }
 0x5bd   :  { %v8269_v25 = vpack.c.bf16 %v2321_v13, %v2321_v13  ;;  %v5714_v15 = vor.u32 %v6757_v10, %v5711_v11  ;;  %v5558_v10 = vor.u32 %v6720_v1, %v5557_v40  ;;  %v6223_v11 = vld [vmem:[#allocation6 + $0x610] sm:$0xf0]  ;;  %v6776_v40 = vld [vmem:[#allocation6 + $0x294] sm:$0xf0] }
 0x5be   :  { %3985 = vmatpush.bf16.msrb.mxu1 %v6382_v48 }
 0x5bf   :  { %3949 = vmatmul.bf16.vlgmr.msrb.gmra.mxu2 %v8269_v25 }
 0x5c0   :  { %3997 = vmatpush.bf16.msra.mxu2 %v5506_v23  ;;  %4021 = vmatpush.bf16.msra.mxu0 %v5794_v26  ;;  %v6319_v23 = vld [vmem:[#allocation6 + $0x6d0] sm:$0xf0]  ;;  %v6034_v26 = vor.u32 %v6837_v45, %v6031_v20  ;;  %v6788_v45 = vld [vmem:[#allocation6 + $0x2f4] sm:$0xf0] }
 0x5c1   :  { %v6322_v13 = vor.u32 %v6909_v22, %v6319_v23  ;;  %v5647_v22 = vld [vmem:[#allocation6 + $0x190] sm:$0xf0]  ;;  %v6813_v23 = vld [vmem:[#allocation6 + $0x3c4] sm:$0xf] }
 0x5c2   :  { %3986 = vmatpush.bf16.msrb.mxu1 %v6366_v61  ;;  %v6889_v61 = vld [vmem:[#allocation6 + $0x624] sm:$0xf]  ;;  %v5650_v24 = vor.u32 %v6741_v12, %v5647_v22 }
 0x5c4   :  { %3998 = vmatpush.bf16.msra.mxu2 %v5490_v28  ;;  %4022 = vmatpush.bf16.msra.mxu0 %v5778_v16  ;;  %v2323_v46 = vpop.f32.mrf.mxu2  ;;  %v6287_v28 = vld [vmem:[#allocation6 + $0x690] sm:$0xf0]  ;;  %v6002_v16 = vor.u32 %v6829_v7, %v5999_v27  ;;  %v6712_v7 = vld [vmem:[#allocation6 + $0x94] sm:$0xf0] }
 0x5c5   :  { %v8272_v42 = vpack.c.bf16 %v2323_v46, %v2323_v46  ;;  %v6290_v38 = vor.u32 %v6901_v17, %v6287_v28  ;;  %v6893_v46 = vld [vmem:[#allocation6 + $0x644] sm:$0xf]  ;;  %v5631_v27 = vld [vmem:[#allocation6 + $0x170] sm:$0xf0] }
 0x5c6   :  { %3987 = vmatpush.bf16.msrb.mxu1 %v6350_v4  ;;  %v6809_v17 = vld [vmem:[#allocation6 + $0x3a4] sm:$0xf]  ;;  %v5919_v28 = vld [vmem:[#allocation6 + $0x3b0] sm:$0xf0] }
 0x5c7   :  { %3975 = vmatmul.bf16.vlgmr.msrb.gmra.mxu0 %v8272_v42  ;;  %v5922_v33 = vor.u32 %v6809_v17, %v5919_v28  ;;  %v6768_v17 = vld [vmem:[#allocation6 + $0x254] sm:$0xf0]  ;;  %v6877_v28 = vld [vmem:[#allocation6 + $0x5c4] sm:$0xf] }
 0x5c8   :  { %3999 = vmatpush.bf16.msra.mxu2 %v5474_v43  ;;  %4023 = vmatpush.bf16.msra.mxu0 %v5762_v44  ;;  %v6821_v43 = vld [vmem:[#allocation6 + $0x404] sm:$0xf]  ;;  %v5967_v44 = vld [vmem:[#allocation6 + $0x410] sm:$0xf0] }
 0x5c9   :  { %v5970_v39 = vor.u32 %v6821_v43, %v5967_v44  ;;  %v5615_v44 = vld [vmem:[#allocation6 + $0x150] sm:$0xf0] }
 0x5cc   :  { %4000 = vmatpush.bf16.msra.mxu2 %v5458_v59  ;;  %4024 = vmatpush.bf16.msra.mxu0 %v5746_v60  ;;  %v6258_v59 = vor.u32 %v6893_v46, %v6255_v47  ;;  %v5574_v60 = vor.u32 %v6724_v55, %v5573_v54  ;;  %v6805_v46 = vld [vmem:[#allocation6 + $0x384] sm:$0xf]  ;;  %v5903_v47 = vld [vmem:[#allocation6 + $0x390] sm:$0xf0]  ;;  %v5618_v55 = vor.u32 %v6733_v34, %v5615_v44  ;;  %v6848_v44 = vld [vmem:[#allocation6 + $0x4d4] sm:$0xf0] }
 0x5cd   :  { %v5906_v57 = vor.u32 %v6805_v46, %v5903_v47  ;;  %v6764_v46 = vld [vmem:[#allocation6 + $0x234] sm:$0xf0]  ;;  %v6873_v47 = vld [vmem:[#allocation6 + $0x5a4] sm:$0xf] }
 0x5cf   :  { %4001 = vmatmul.bf16.vlgmr.msra.gmra.mxu2 %v8263_v29 }
 0x5d0   :  { %4045 = vmatpush.bf16.msrb.mxu2 %v6082_v62  ;;  %4025 = vmatpush.bf16.msra.mxu0 %v5730_v3  ;;  %v6239_v62 = vld [vmem:[#allocation6 + $0x630] sm:$0xf0] }
 0x5d1   :  { %v5951_v3 = vld [vmem:[#allocation6 + $0x3f0] sm:$0xf0]  ;;  %v6242_v4 = vor.u32 %v6889_v61, %v6239_v62  ;;  %v6801_v62 = vld [vmem:[#allocation6 + $0x364] sm:$0xf] }
 0x5d2   :  { %v5599_v61 = vld [vmem:[#allocation6 + $0x130] sm:$0xf0] }
 0x5d4   :  { %4046 = vmatpush.bf16.msrb.mxu2 %v6066_v5  ;;  %4026 = vmatpush.bf16.msra.mxu0 %v5714_v15  ;;  %v6885_v5 = vld [vmem:[#allocation6 + $0x604] sm:$0xf]  ;;  %v5954_v15 = vor.u32 %v6817_v2, %v5951_v3  ;;  %v5602_v3 = vor.u32 %v6729_v58, %v5599_v61  ;;  %v5717_v58 = vld [vmem:[#allocation6 + $0x208] sm:$0xf] }
 0x5d5   :  { %v6053_v61 = vld [vmem:[#allocation6 + $0x4a8] sm:$0xf] }
 0x5d7   :  { %4027 = vmatmul.bf16.vlgmr.msra.gmra.mxu0 %v8266_v63 }
 0x5d8   :  { %4047 = vmatpush.bf16.msrb.mxu2 %v6050_v36  ;;  %4071 = vmatpush.bf16.msrb.mxu0 %v6338_v21  ;;  %v6716_v36 = vld [vmem:[#allocation6 + $0xb4] sm:$0xf0]  ;;  %v5829_v21 = vld [vmem:[#allocation6 + $0x2e8] sm:$0xf] }
 0x5d9   :  { %v5542_v53 = vor.u32 %v6716_v36, %v5541_v52  ;;  %v5830_v0 = vor.u32 %v6788_v45, %v5829_v21  ;;  %v5782_v52 = vor.u32 %v6776_v40, %v5781_v50  ;;  %v6772_v36 = vld [vmem:[#allocation6 + $0x274] sm:$0xf0]  ;;  %v6881_v21 = vld [vmem:[#allocation6 + $0x5e4] sm:$0xf]  ;;  %v6207_v45 = vld [vmem:[#allocation6 + $0x5f0] sm:$0xf0] }
 0x5da   :  { %v6869_v50 = vld [vmem:[#allocation6 + $0x584] sm:$0xf]  ;;  %v6159_v40 = vld [vmem:[#allocation6 + $0x590] sm:$0xf0] }
 0x5dc   :  { %4048 = vmatpush.bf16.msrb.mxu2 %v6034_v26  ;;  %4072 = vmatpush.bf16.msrb.mxu0 %v6322_v13  ;;  %v5935_v26 = vld [vmem:[#allocation6 + $0x3d0] sm:$0xf0]  ;;  %v6226_v13 = vor.u32 %v6885_v5, %v6223_v11  ;;  %v6700_v11 = vld [vmem:[#allocation6 + $0x34] sm:$0xf0] }
 0x5dd   :  { %v5938_v19 = vor.u32 %v6813_v23, %v5935_v26  ;;  %v5583_v5 = vld [vmem:[#allocation6 + $0x110] sm:$0xf0]  ;;  %v6793_v23 = vld [vmem:[#allocation6 + $0x324] sm:$0xf] }
 0x5de   :  { %v5586_v26 = vor.u32 %v6725_v41, %v5583_v5  ;;  %v6447_v41 = vld [vmem:[#allocation6 + $0x7d0] sm:$0xf0] }
 0x5e0   :  { %4049 = vmatpush.bf16.msrb.mxu2 %v6018_v18  ;;  %4073 = vmatpush.bf16.msrb.mxu0 %v6306_v6  ;;  %v6737_v18 = vld [vmem:[#allocation6 + $0x164] sm:$0xf]  ;;  %v5525_v6 = vld [vmem:[#allocation6 + $0x88] sm:$0xf] }
 0x5e1   :  { %v5526_v30 = vor.u32 %v6712_v7, %v5525_v6  ;;  %v5634_v32 = vor.u32 %v6737_v18, %v5631_v27  ;;  %v6210_v18 = vor.u32 %v6881_v21, %v6207_v45  ;;  %v5749_v6 = vld [vmem:[#allocation6 + $0x248] sm:$0xf]  ;;  %v6852_v27 = vld [vmem:[#allocation6 + $0x4f4] sm:$0xf0]  ;;  %v6937_v21 = vld [vmem:[#allocation6 + $0x7a4] sm:$0xf] }
 0x5e2   :  { %v6085_v7 = vld [vmem:[#allocation6 + $0x4e8] sm:$0xf]  ;;  %v5750_v34 = vor.u32 %v6768_v17, %v5749_v6  ;;  %v6431_v45 = vld [vmem:[#allocation6 + $0x7b0] sm:$0xf0] }
 0x5e3   :  { %v6127_v6 = vld [vmem:[#allocation6 + $0x550] sm:$0xf0]  ;;  %v6309_v17 = vld [vmem:[#allocation6 + $0x6a8] sm:$0xf] }
 0x5e4   :  { %4050 = vmatpush.bf16.msrb.mxu2 %v6002_v16  ;;  %4074 = vmatpush.bf16.msrb.mxu0 %v6290_v38  ;;  %v5813_v16 = vld [vmem:[#allocation6 + $0x2c8] sm:$0xf]  ;;  %v6784_v38 = vld [vmem:[#allocation6 + $0x2d4] sm:$0xf0] }
 0x5e5   :  { %v5814_v43 = vor.u32 %v6784_v38, %v5813_v16  ;;  %v6191_v16 = vld [vmem:[#allocation6 + $0x5d0] sm:$0xf0] }
 0x5e8   :  { %4051 = vmatpush.bf16.msrb.mxu2 %v5986_v9  ;;  %4075 = vmatpush.bf16.msrb.mxu0 %v6274_v37  ;;  %v6708_v9 = vld [vmem:[#allocation6 + $0x74] sm:$0xf0] }
 0x5e9   :  { %v5510_v54 = vor.u32 %v6708_v9, %v5509_v8  ;;  %v6194_v8 = vor.u32 %v6877_v28, %v6191_v16  ;;  %v5733_v9 = vld [vmem:[#allocation6 + $0x228] sm:$0xf]  ;;  %v6908_v28 = vld [vmem:[#allocation6 + $0x6b4] sm:$0xf0] }
 0x5ec   :  { %v2335_v48 = vpop.f32.mrf.mxu0  ;;  %4052 = vmatpush.bf16.msrb.mxu2 %v5970_v39  ;;  %4076 = vmatpush.bf16.msrb.mxu0 %v6258_v59  ;;  %v5493_v39 = vld [vmem:[#allocation6 + $0x48] sm:$0xf]  ;;  %v6704_v59 = vld [vmem:[#allocation6 + $0x54] sm:$0xf0] }
 0x5ed   :  { %v8277_v56 = vpack.c.bf16 %v2335_v48, %v2335_v48  ;;  %v5797_v48 = vld [vmem:[#allocation6 + $0x2a8] sm:$0xf]  ;;  %v5494_v1 = vor.u32 %v6704_v59, %v5493_v39  ;;  %v5734_v39 = vor.u32 %v6764_v46, %v5733_v9  ;;  %v6929_v9 = vld [vmem:[#allocation6 + $0x764] sm:$0xf]  ;;  %v6904_v46 = vld [vmem:[#allocation6 + $0x694] sm:$0xf0] }
 0x5ef   :  { %3910 = vmatmul.bf16.vlgmr.msra.gmra.mxu3 %v8277_v56  ;;  %4053 = vmatmul.bf16.vlgmr.msrb.gmra.mxu2 %v8269_v25 }
 0x5f0   :  { %4006 = vmatpush.bf16.msra.mxu3 %v5698_v51  ;;  %4097 = vmatpush.bf16.msra.mxu2 %v5574_v60  ;;  %v6780_v51 = vld [vmem:[#allocation6 + $0x2b4] sm:$0xf0] }
 0x5f1   :  { %4077 = vmatpush.bf16.msrb.mxu0 %v6242_v4  ;;  %v5798_v60 = vor.u32 %v6780_v51, %v5797_v48  ;;  %v6175_v48 = vld [vmem:[#allocation6 + $0x5b0] sm:$0xf0]  ;;  %v6945_v51 = vld [vmem:[#allocation6 + $0x7e4] sm:$0xf] }
 0x5f2   :  { %v6178_v59 = vor.u32 %v6873_v47, %v6175_v48 }
 0x5f4   :  { %4007 = vmatpush.bf16.msra.mxu3 %v5682_v49  ;;  %v2337_v14 = vpop.f32.mrf.mxu0  ;;  %4098 = vmatpush.bf16.msra.mxu2 %v5558_v10  ;;  %v5887_v49 = vld [vmem:[#allocation6 + $0x370] sm:$0xf0]  ;;  %v5477_v10 = vld [vmem:[#allocation6 + $0x28] sm:$0xf] }
 0x5f5   :  { %v8280_v20 = vpack.c.bf16 %v2337_v14, %v2337_v14  ;;  %4078 = vmatpush.bf16.msrb.mxu0 %v6226_v13  ;;  %v5890_v4 = vor.u32 %v6801_v62, %v5887_v49  ;;  %v6797_v14 = vld [vmem:[#allocation6 + $0x344] sm:$0xf]  ;;  %v5478_v22 = vor.u32 %v6700_v11, %v5477_v10  ;;  %v6844_v62 = vld [vmem:[#allocation6 + $0x4b4] sm:$0xf0]  ;;  %v6162_v10 = vor.u32 %v6869_v50, %v6159_v40  ;;  %v6037_v11 = vld [vmem:[#allocation6 + $0x488] sm:$0xf] }
 0x5f6   :  { %v5701_v50 = vld [vmem:[#allocation6 + $0x1e8] sm:$0xf]  ;;  %v6756_v40 = vld [vmem:[#allocation6 + $0x1f4] sm:$0xf0] }
 0x5f7   :  { %3936 = vmatmul.bf16.vlgmr.msra.gmra.mxu1 %v8280_v20 }
 0x5f8   :  { %4008 = vmatpush.bf16.msra.mxu3 %v5666_v35  ;;  %4032 = vmatpush.bf16.msra.mxu1 %v5954_v15  ;;  %v5871_v35 = vld [vmem:[#allocation6 + $0x350] sm:$0xf0]  ;;  %v5765_v15 = vld [vmem:[#allocation6 + $0x268] sm:$0xf] }
 0x5f9   :  { %4099 = vmatpush.bf16.msra.mxu2 %v5542_v53  ;;  %4123 = vmatpush.bf16.msra.mxu0 %v5830_v0  ;;  %v5874_v13 = vor.u32 %v6797_v14, %v5871_v35  ;;  %v5855_v53 = vld [vmem:[#allocation6 + $0x330] sm:$0xf0]  ;;  %v5461_v0 = vld [vmem:[#allocation6 + $0x8] sm:$0xf] }
 0x5fa   :  { %4079 = vmatmul.bf16.vlgmr.msrb.gmra.mxu0 %v8272_v42 }
 0x5fc   :  { %4009 = vmatpush.bf16.msra.mxu3 %v5650_v24  ;;  %4033 = vmatpush.bf16.msra.mxu1 %v5938_v19  ;;  %v2340_v31 = vpop.f32.mrf.mxu0  ;;  %v6696_v24 = vld [vmem:[#allocation6 + $0x14] sm:$0xf0]  ;;  %v5766_v19 = vor.u32 %v6772_v36, %v5765_v15  ;;  %v6865_v15 = vld [vmem:[#allocation6 + $0x564] sm:$0xf]  ;;  %v6143_v36 = vld [vmem:[#allocation6 + $0x570] sm:$0xf0] }
 0x5fd   :  { %v8284_v37 = vpack.c.bf16 %v2340_v31, %v2340_v31  ;;  %4100 = vmatpush.bf16.msra.mxu2 %v5526_v30  ;;  %4124 = vmatpush.bf16.msra.mxu0 %v5814_v43  ;;  %v5462_v38 = vor.u32 %v6696_v24, %v5461_v0  ;;  %v5858_v30 = vor.u32 %v6793_v23, %v5855_v53  ;;  %v6069_v43 = vld [vmem:[#allocation6 + $0x4c8] sm:$0xf]  ;;  %v6912_v23 = vld [vmem:[#allocation6 + $0x6d4] sm:$0xf0] }
 0x5fe   :  { %v6086_v31 = vor.u32 %v6852_v27, %v6085_v7  ;;  %v6021_v53 = vld [vmem:[#allocation6 + $0x468] sm:$0xf]  ;;  %v6836_v0 = vld [vmem:[#allocation6 + $0x474] sm:$0xf0]  ;;  %v6434_v24 = vor.u32 %v6937_v21, %v6431_v45  ;;  %v6933_v7 = vld [vmem:[#allocation6 + $0x784] sm:$0xf] }
 0x5ff   :  { %3962 = vmatmul.bf16.vlgmr.msrb.gmra.mxu3 %v8284_v37  ;;  %v6415_v27 = vld [vmem:[#allocation6 + $0x790] sm:$0xf0]  ;;  %v6022_v16 = vor.u32 %v6836_v0, %v6021_v53  ;;  %v5685_v21 = vld [vmem:[#allocation6 + $0x1c8] sm:$0xf]  ;;  %v6752_v45 = vld [vmem:[#allocation6 + $0x1d4] sm:$0xf0] }
 0x600   :  { %4010 = vmatpush.bf16.msra.mxu3 %v5634_v32  ;;  %4034 = vmatpush.bf16.msra.mxu1 %v5922_v33  ;;  %v6789_v32 = vld [vmem:[#allocation6 + $0x304] sm:$0xf]  ;;  %v5839_v33 = vld [vmem:[#allocation6 + $0x310] sm:$0xf0]  ;;  %v6718_v0 = vld [vmem:[#allocation6 + $0xcc] sm:$0xf] }
 0x601   :  { %4101 = vmatpush.bf16.msra.mxu2 %v5510_v54  ;;  %4125 = vmatpush.bf16.msra.mxu0 %v5798_v60  ;;  %v6463_v54 = vld [vmem:[#allocation6 + $0x7f0] sm:$0xf0]  ;;  %v6760_v60 = vld [vmem:[#allocation6 + $0x214] sm:$0xf0] }
 0x602   :  { %v6466_v49 = vor.u32 %v6945_v51, %v6463_v54  ;;  %v5718_v5 = vor.u32 %v6760_v60, %v5717_v58  ;;  %v5989_v51 = vld [vmem:[#allocation6 + $0x428] sm:$0xf]  ;;  %v6828_v54 = vld [vmem:[#allocation6 + $0x434] sm:$0xf0]  ;;  %v6853_v58 = vld [vmem:[#allocation6 + $0x504] sm:$0xf] }
 0x603   :  { %v6383_v60 = vld [vmem:[#allocation6 + $0x750] sm:$0xf0] }
 0x604   :  { %4011 = vmatpush.bf16.msra.mxu3 %v5618_v55  ;;  %4035 = vmatpush.bf16.msra.mxu1 %v5906_v57  ;;  %v2342_v2 = vpop.f32.mrf.mxu0  ;;  %v5842_v55 = vor.u32 %v6789_v32, %v5839_v33  ;;  %v6070_v57 = vor.u32 %v6848_v44, %v6069_v43  ;;  %v6418_v32 = vor.u32 %v6933_v7, %v6415_v27  ;;  %v6399_v43 = vld [vmem:[#allocation6 + $0x770] sm:$0xf0]  ;;  %v6293_v44 = vld [vmem:[#allocation6 + $0x688] sm:$0xf]  ;;  %v6748_v27 = vld [vmem:[#allocation6 + $0x1b4] sm:$0xf0] }
 0x605   :  { %v8288_v12 = vpack.c.bf16 %v2342_v2, %v2342_v2  ;;  %4102 = vmatpush.bf16.msra.mxu2 %v5494_v1  ;;  %4126 = vmatpush.bf16.msra.mxu0 %v5782_v52  ;;  %v6941_v1 = vld [vmem:[#allocation6 + $0x7c4] sm:$0xf]  ;;  %v6341_v2 = vld [vmem:[#allocation6 + $0x6e8] sm:$0xf]  ;;  %v6840_v52 = vld [vmem:[#allocation6 + $0x494] sm:$0xf0]  ;;  %v6310_v33 = vor.u32 %v6908_v28, %v6309_v17 }
 0x606   :  { %v6450_v14 = vor.u32 %v6941_v1, %v6447_v41  ;;  %v5973_v41 = vld [vmem:[#allocation6 + $0x408] sm:$0xf]  ;;  %v6351_v53 = vld [vmem:[#allocation6 + $0x710] sm:$0xf0]  ;;  %v6820_v28 = vld [vmem:[#allocation6 + $0x3f4] sm:$0xf0] }
 0x607   :  { %3988 = vmatmul.bf16.vlgmr.msrb.gmra.mxu1 %v8288_v12  ;;  %v5669_v7 = vld [vmem:[#allocation6 + $0x1a8] sm:$0xf] }
 0x608   :  { %4012 = vmatpush.bf16.msra.mxu3 %v5602_v3  ;;  %4036 = vmatpush.bf16.msra.mxu1 %v5890_v4  ;;  %v6916_v3 = vld [vmem:[#allocation6 + $0x6f4] sm:$0xf0]  ;;  %v6054_v4 = vor.u32 %v6844_v62, %v6053_v61  ;;  %v6277_v61 = vld [vmem:[#allocation6 + $0x668] sm:$0xf] }
 0x609   :  { %4103 = vmatpush.bf16.msra.mxu2 %v5478_v22  ;;  %4127 = vmatpush.bf16.msra.mxu0 %v5766_v19  ;;  %v6342_v35 = vor.u32 %v6916_v3, %v6341_v2  ;;  %v6325_v22 = vld [vmem:[#allocation6 + $0x6c8] sm:$0xf]  ;;  %v6900_v62 = vld [vmem:[#allocation6 + $0x674] sm:$0xf0] }
 0x60a   :  { %v6326_v19 = vor.u32 %v6912_v23, %v6325_v22  ;;  %v6824_v2 = vld [vmem:[#allocation6 + $0x414] sm:$0xf0]  ;;  %v6917_v23 = vld [vmem:[#allocation6 + $0x704] sm:$0xf]  ;;  %v5957_v17 = vld [vmem:[#allocation6 + $0x3e8] sm:$0xf] }
 0x60c   :  { %4013 = vmatpush.bf16.msra.mxu3 %v5586_v26  ;;  %4037 = vmatpush.bf16.msra.mxu1 %v5874_v13  ;;  %v6038_v26 = vor.u32 %v6840_v52, %v6037_v11  ;;  %v6146_v13 = vor.u32 %v6865_v15, %v6143_v36  ;;  %v5575_v11 = vld [vmem:[#allocation6 + $0xf8] sm:$0xf0]  ;;  %v5702_v52 = vor.u32 %v6756_v40, %v5701_v50  ;;  %v6896_v15 = vld [vmem:[#allocation6 + $0x654] sm:$0xf0] }
 0x60d   :  { %4104 = vmatpush.bf16.msra.mxu2 %v5462_v38  ;;  %4128 = vmatpush.bf16.msra.mxu0 %v5750_v34  ;;  %v6857_v34 = vld [vmem:[#allocation6 + $0x524] sm:$0xf]  ;;  %v5974_v36 = vor.u32 %v6824_v2, %v5973_v41  ;;  %v6812_v50 = vld [vmem:[#allocation6 + $0x3b4] sm:$0xf0]  ;;  %v5815_v41 = vld [vmem:[#allocation6 + $0x2d8] sm:$0xf0] }
 0x60e   :  { %v6706_v2 = vld [vmem:[#allocation6 + $0x6c] sm:$0xf] }
 0x60f   :  { %4014 = vmatmul.bf16.vlgmr.msra.gmra.mxu3 %v8277_v56 }
 0x610   :  { %4058 = vmatpush.bf16.msrb.mxu3 %v6210_v18  ;;  %4038 = vmatpush.bf16.msra.mxu1 %v5858_v30  ;;  %v6861_v18 = vld [vmem:[#allocation6 + $0x544] sm:$0xf]  ;;  %v6005_v30 = vld [vmem:[#allocation6 + $0x448] sm:$0xf] }
 0x611   :  { %4149 = vmatpush.bf16.msrb.mxu2 %v6086_v31  ;;  %4129 = vmatpush.bf16.msra.mxu0 %v5734_v39  ;;  %v6130_v38 = vor.u32 %v6861_v18, %v6127_v6  ;;  %v6832_v31 = vld [vmem:[#allocation6 + $0x454] sm:$0xf0]  ;;  %v6095_v39 = vld [vmem:[#allocation6 + $0x510] sm:$0xf0]  ;;  %v6245_v18 = vld [vmem:[#allocation6 + $0x628] sm:$0xf] }
 0x612   :  { %4105 = vmatmul.bf16.vlgmr.msra.gmra.mxu2 %v8263_v29  ;;  %v6006_v47 = vor.u32 %v6832_v31, %v6005_v30  ;;  %v6098_v1 = vor.u32 %v6853_v58, %v6095_v39  ;;  %v6892_v6 = vld [vmem:[#allocation6 + $0x634] sm:$0xf0]  ;;  %v6714_v31 = vld [vmem:[#allocation6 + $0xac] sm:$0xf]  ;;  %v5527_v58 = vld [vmem:[#allocation6 + $0x98] sm:$0xf0] }
 0x613   :  { %v6246_v30 = vor.u32 %v6892_v6, %v6245_v18  ;;  %v6804_v18 = vld [vmem:[#allocation6 + $0x374] sm:$0xf0] }
 0x614   :  { %4059 = vmatpush.bf16.msrb.mxu3 %v6194_v8  ;;  %4039 = vmatpush.bf16.msra.mxu1 %v5842_v55  ;;  %v6111_v8 = vld [vmem:[#allocation6 + $0x530] sm:$0xf0]  ;;  %v6402_v55 = vor.u32 %v6929_v9, %v6399_v43  ;;  %v6888_v9 = vld [vmem:[#allocation6 + $0x614] sm:$0xf0]  ;;  %v5653_v43 = vld [vmem:[#allocation6 + $0x188] sm:$0xf] }
 0x615   :  { %4150 = vmatpush.bf16.msrb.mxu2 %v6070_v57  ;;  %4130 = vmatpush.bf16.msra.mxu0 %v5718_v5  ;;  %v6114_v48 = vor.u32 %v6857_v34, %v6111_v8  ;;  %v6294_v57 = vor.u32 %v6904_v46, %v6293_v44  ;;  %v6921_v5 = vld [vmem:[#allocation6 + $0x724] sm:$0xf]  ;;  %v5958_v34 = vor.u32 %v6820_v28, %v5957_v17  ;;  %v6229_v8 = vld [vmem:[#allocation6 + $0x608] sm:$0xf]  ;;  %v6744_v44 = vld [vmem:[#allocation6 + $0x194] sm:$0xf0] }
 0x616   :  { %v5941_v46 = vld [vmem:[#allocation6 + $0x3c8] sm:$0xf]  ;;  %v5654_v39 = vor.u32 %v6744_v44, %v5653_v43  ;;  %v6698_v28 = vld [vmem:[#allocation6 + $0x2c] sm:$0xf]  ;;  %v5767_v44 = vld [vmem:[#allocation6 + $0x278] sm:$0xf0] }
 0x617   :  { %4040 = vmatmul.bf16.vlgmr.msra.gmra.mxu1 %v8280_v20 }
 0x618   :  { %4060 = vmatpush.bf16.msrb.mxu3 %v6178_v59  ;;  %4084 = vmatpush.bf16.msrb.mxu1 %v6466_v49  ;;  %v6925_v59 = vld [vmem:[#allocation6 + $0x744] sm:$0xf]  ;;  %v5990_v49 = vor.u32 %v6828_v54, %v5989_v51  ;;  %v6786_v51 = vld [vmem:[#allocation6 + $0x2ec] sm:$0xf]  ;;  %v5831_v54 = vld [vmem:[#allocation6 + $0x2f8] sm:$0xf0] }
 0x619   :  { %4151 = vmatpush.bf16.msrb.mxu2 %v6054_v4  ;;  %4175 = vmatpush.bf16.msrb.mxu0 %v6342_v35  ;;  %v6386_v3 = vor.u32 %v6925_v59, %v6383_v60  ;;  %v6278_v4 = vor.u32 %v6900_v62, %v6277_v61  ;;  %v6261_v35 = vld [vmem:[#allocation6 + $0x648] sm:$0xf]  ;;  %v5834_v61 = vor.u32 %v6786_v51, %v5831_v54  ;;  %v6740_v62 = vld [vmem:[#allocation6 + $0x174] sm:$0xf0]  ;;  %v5463_v51 = vld [vmem:[#allocation6 + $0x18] sm:$0xf0] }
 0x61a   :  { %4131 = vmatmul.bf16.vlgmr.msra.gmra.mxu0 %v8266_v63  ;;  %v5637_v60 = vld [vmem:[#allocation6 + $0x168] sm:$0xf] }
 0x61c   :  { %4061 = vmatpush.bf16.msrb.mxu3 %v6162_v10  ;;  %4085 = vmatpush.bf16.msrb.mxu1 %v6450_v14  ;;  %v6722_v10 = vld [vmem:[#allocation6 + $0xec] sm:$0xf]  ;;  %v6367_v14 = vld [vmem:[#allocation6 + $0x730] sm:$0xf0] }
 0x61d   :  { %4152 = vmatpush.bf16.msrb.mxu2 %v6038_v26  ;;  %4176 = vmatpush.bf16.msrb.mxu0 %v6326_v19  ;;  %v5578_v22 = vor.u32 %v6722_v10, %v5575_v11  ;;  %v6370_v26 = vor.u32 %v6921_v5, %v6367_v14  ;;  %v5686_v19 = vor.u32 %v6752_v45, %v5685_v21  ;;  %v5621_v10 = vld [vmem:[#allocation6 + $0x148] sm:$0xf]  ;;  %v5799_v21 = vld [vmem:[#allocation6 + $0x2b8] sm:$0xf0]  ;;  %v6702_v45 = vld [vmem:[#allocation6 + $0x4c] sm:$0xf] }
 0x61e   :  { %v5909_v14 = vld [vmem:[#allocation6 + $0x388] sm:$0xf] }
 0x620   :  { %4062 = vmatpush.bf16.msrb.mxu3 %v6146_v13  ;;  %4086 = vmatpush.bf16.msrb.mxu1 %v6434_v24  ;;  %v6262_v13 = vor.u32 %v6896_v15, %v6261_v35  ;;  %v5559_v24 = vld [vmem:[#allocation6 + $0xd8] sm:$0xf0]  ;;  %v6808_v35 = vld [vmem:[#allocation6 + $0x394] sm:$0xf0] }
 0x621   :  { %4153 = vmatpush.bf16.msrb.mxu2 %v6022_v16  ;;  %4177 = vmatpush.bf16.msrb.mxu0 %v6310_v33  ;;  %v5562_v16 = vor.u32 %v6718_v0, %v5559_v24  ;;  %v5670_v33 = vor.u32 %v6748_v27, %v5669_v7  ;;  %v6732_v24 = vld [vmem:[#allocation6 + $0x134] sm:$0xf0]  ;;  %v6774_v7 = vld [vmem:[#allocation6 + $0x28c] sm:$0xf]  ;;  %v5783_v27 = vld [vmem:[#allocation6 + $0x298] sm:$0xf0] }
 0x624   :  { %4063 = vmatpush.bf16.msrb.mxu3 %v6130_v38  ;;  %4087 = vmatpush.bf16.msrb.mxu1 %v6418_v32  ;;  %v6354_v38 = vor.u32 %v6917_v23, %v6351_v53  ;;  %v5543_v32 = vld [vmem:[#allocation6 + $0xb8] sm:$0xf0] }
 0x625   :  { %4154 = vmatpush.bf16.msrb.mxu2 %v6006_v47  ;;  %4178 = vmatpush.bf16.msrb.mxu0 %v6294_v57  ;;  %v6816_v47 = vld [vmem:[#allocation6 + $0x3d4] sm:$0xf0]  ;;  %v6710_v57 = vld [vmem:[#allocation6 + $0x8c] sm:$0xf] }
 0x626   :  { %v5942_v59 = vor.u32 %v6816_v47, %v5941_v46  ;;  %v5530_v40 = vor.u32 %v6710_v57, %v5527_v58  ;;  %v6213_v46 = vld [vmem:[#allocation6 + $0x5e8] sm:$0xf]  ;;  %v6884_v47 = vld [vmem:[#allocation6 + $0x5f4] sm:$0xf0]  ;;  %v6850_v57 = vld [vmem:[#allocation6 + $0x4ec] sm:$0xf] }
 0x627   :  { %v6087_v58 = vld [vmem:[#allocation6 + $0x4f8] sm:$0xf0] }
 0x628   :  { %4064 = vmatpush.bf16.msrb.mxu3 %v6114_v48  ;;  %4088 = vmatpush.bf16.msrb.mxu1 %v6402_v55  ;;  %v5546_v48 = vor.u32 %v6714_v31, %v5543_v32  ;;  %v6230_v55 = vor.u32 %v6888_v9, %v6229_v8  ;;  %v5589_v31 = vld [vmem:[#allocation6 + $0x108] sm:$0xf]  ;;  %v6728_v32 = vld [vmem:[#allocation6 + $0x114] sm:$0xf0]  ;;  %v6770_v9 = vld [vmem:[#allocation6 + $0x26c] sm:$0xf] }
 0x629   :  { %4155 = vmatpush.bf16.msrb.mxu2 %v5990_v49  ;;  %4179 = vmatpush.bf16.msrb.mxu0 %v6278_v4  ;;  %v5925_v49 = vld [vmem:[#allocation6 + $0x3a8] sm:$0xf]  ;;  %v5638_v4 = vor.u32 %v6740_v62, %v5637_v60  ;;  %v6800_v8 = vld [vmem:[#allocation6 + $0x354] sm:$0xf0]  ;;  %v5590_v54 = vor.u32 %v6728_v32, %v5589_v31  ;;  %v6214_v60 = vor.u32 %v6884_v47, %v6213_v46 }
 0x62a   :  { %v5926_v5 = vor.u32 %v6812_v50, %v5925_v49  ;;  %v6796_v62 = vld [vmem:[#allocation6 + $0x334] sm:$0xf0]  ;;  %v6766_v49 = vld [vmem:[#allocation6 + $0x24c] sm:$0xf]  ;;  %v6453_v31 = vld [vmem:[#allocation6 + $0x7c8] sm:$0xf] }
 0x62b   :  { %v6944_v32 = vld [vmem:[#allocation6 + $0x7d4] sm:$0xf0] }
 0x62c   :  { %4065 = vmatpush.bf16.msrb.mxu3 %v6098_v1  ;;  %4089 = vmatpush.bf16.msrb.mxu1 %v6386_v3  ;;  %v6782_v1 = vld [vmem:[#allocation6 + $0x2cc] sm:$0xf]  ;;  %v5511_v3 = vld [vmem:[#allocation6 + $0x78] sm:$0xf0] }
 0x62d   :  { %4156 = vmatpush.bf16.msrb.mxu2 %v5974_v36  ;;  %4180 = vmatpush.bf16.msrb.mxu0 %v6262_v13  ;;  %v5818_v11 = vor.u32 %v6782_v1, %v5815_v41  ;;  %v5514_v15 = vor.u32 %v6706_v2, %v5511_v3  ;;  %v6778_v36 = vld [vmem:[#allocation6 + $0x2ac] sm:$0xf]  ;;  %v5605_v13 = vld [vmem:[#allocation6 + $0x128] sm:$0xf]  ;;  %v6880_v2 = vld [vmem:[#allocation6 + $0x5d4] sm:$0xf0]  ;;  %v6090_v3 = vor.u32 %v6850_v57, %v6087_v58 }
 0x62e   :  { %v5802_v0 = vor.u32 %v6778_v36, %v5799_v21  ;;  %v6197_v41 = vld [vmem:[#allocation6 + $0x5c8] sm:$0xf]  ;;  %v5735_v36 = vld [vmem:[#allocation6 + $0x238] sm:$0xf0]  ;;  %v6910_v58 = vld [vmem:[#allocation6 + $0x6cc] sm:$0xf] }
 0x62f   :  { %4066 = vmatmul.bf16.vlgmr.msrb.gmra.mxu3 %v8284_v37  ;;  %v6181_v21 = vld [vmem:[#allocation6 + $0x5a8] sm:$0xf] }
 0x630   :  { %4110 = vmatpush.bf16.msra.mxu3 %v5702_v52  ;;  %4090 = vmatpush.bf16.msrb.mxu1 %v6370_v26  ;;  %v6736_v52 = vld [vmem:[#allocation6 + $0x154] sm:$0xf0]  ;;  %v5910_v26 = vor.u32 %v6808_v35, %v5909_v14  ;;  %v5845_v14 = vld [vmem:[#allocation6 + $0x308] sm:$0xf] }
 0x631   :  { %4201 = vmatpush.bf16.msra.mxu2 %v5578_v22  ;;  %4181 = vmatpush.bf16.msrb.mxu0 %v6246_v30  ;;  %v5495_v22 = vld [vmem:[#allocation6 + $0x58] sm:$0xf0]  ;;  %v5622_v23 = vor.u32 %v6736_v52, %v5621_v10  ;;  %v6198_v52 = vor.u32 %v6880_v2, %v6197_v41  ;;  %v6792_v35 = vld [vmem:[#allocation6 + $0x314] sm:$0xf0]  ;;  %v6421_v2 = vld [vmem:[#allocation6 + $0x788] sm:$0xf] }
 0x632   :  { %4157 = vmatmul.bf16.vlgmr.msrb.gmra.mxu2 %v8269_v25  ;;  %v8299_v53 = vpop.f32.mrf.mxu2  ;;  %v5498_v6 = vor.u32 %v6702_v45, %v5495_v22  ;;  %v6071_v10 = vld [vmem:[#allocation6 + $0x4d8] sm:$0xf0]  ;;  %v6876_v45 = vld [vmem:[#allocation6 + $0x5b4] sm:$0xf0]  ;;  %v6469_v22 = vld [vmem:[#allocation6 + $0x7e8] sm:$0xf] }
 0x633   :  { %v6864_v41 = vld [vmem:[#allocation6 + $0x554] sm:$0xf0] }
 0x634   :  { %4111 = vmatpush.bf16.msra.mxu3 %v5686_v19  ;;  %4091 = vmatpush.bf16.msrb.mxu1 %v6354_v38  ;;  %v5893_v19 = vld [vmem:[#allocation6 + $0x368] sm:$0xf]  ;;  %v8301_v17 = vpop.f32.mrf.mxu0  ;;  %v5606_v38 = vor.u32 %v6732_v24, %v5605_v13  ;;  %v5846_v13 = vor.u32 %v6792_v35, %v5845_v14  ;;  %v6055_v24 = vld [vmem:[#allocation6 + $0x4b8] sm:$0xf0] }
 0x635   :  { %4202 = vmatpush.bf16.msra.mxu2 %v5562_v16  ;;  %4182 = vmatpush.bf16.msrb.mxu0 %v6230_v55  ;;  %v5479_v16 = vld [vmem:[#allocation6 + $0x38] sm:$0xf0]  ;;  %v5894_v30 = vor.u32 %v6804_v18, %v5893_v19 }
 0x636   :  { %v5482_v43 = vor.u32 %v6698_v28, %v5479_v16 }
 0x637   :  { %4092 = vmatmul.bf16.vlgmr.msrb.gmra.mxu1 %v8288_v12 }
 0x638   :  { %4112 = vmatpush.bf16.msra.mxu3 %v5670_v33  ;;  %4136 = vmatpush.bf16.msra.mxu1 %v5958_v34  ;;  %v5786_v33 = vor.u32 %v6774_v7, %v5783_v27  ;;  %v5877_v34 = vld [vmem:[#allocation6 + $0x348] sm:$0xf]  ;;  %v6758_v7 = vld [vmem:[#allocation6 + $0x20c] sm:$0xf]  ;;  %v5719_v27 = vld [vmem:[#allocation6 + $0x218] sm:$0xf0] }
 0x639   :  { %4203 = vmatpush.bf16.msra.mxu2 %v5546_v48  ;;  %4227 = vmatpush.bf16.msra.mxu0 %v5834_v61  ;;  %v6694_v48 = vld [vmem:[#allocation6 + $0xc] sm:$0xf]  ;;  %v5878_v55 = vor.u32 %v6800_v8, %v5877_v34  ;;  %v5861_v61 = vld [vmem:[#allocation6 + $0x328] sm:$0xf]  ;;  %v6343_v8 = vld [vmem:[#allocation6 + $0x6f8] sm:$0xf0] }
 0x63a   :  { %4183 = vmatmul.bf16.vlgmr.msrb.gmra.mxu0 %v8272_v42  ;;  %v5466_v50 = vor.u32 %v6694_v48, %v5463_v51  ;;  %v6914_v34 = vld [vmem:[#allocation6 + $0x6ec] sm:$0xf]  ;;  %v6149_v48 = vld [vmem:[#allocation6 + $0x568] sm:$0xf]  ;;  %v6868_v51 = vld [vmem:[#allocation6 + $0x574] sm:$0xf0] }
 0x63b   :  { %v6346_v47 = vor.u32 %v6914_v34, %v6343_v8  ;;  %v6279_v34 = vld [vmem:[#allocation6 + $0x678] sm:$0xf0]  ;;  %v6754_v8 = vld [vmem:[#allocation6 + $0x1ec] sm:$0xf] }
 0x63c   :  { %4113 = vmatpush.bf16.msra.mxu3 %v5654_v39  ;;  %4137 = vmatpush.bf16.msra.mxu1 %v5942_v59  ;;  %v3900_v39 = vpop.f32.mrf.mxu2  ;;  %v5770_v59 = vor.u32 %v6770_v9, %v5767_v44  ;;  %v3926_v1 = vpop.f32.mrf.mxu0  ;;  %v6838_v9 = vld [vmem:[#allocation6 + $0x48c] sm:$0xf]  ;;  %v5722_v44 = vor.u32 %v6758_v7, %v5719_v27 }
 0x63d   :  { %4204 = vmatpush.bf16.msra.mxu2 %v5530_v40  ;;  %4228 = vmatpush.bf16.msra.mxu0 %v5818_v11  ;;  %v5751_v40 = vld [vmem:[#allocation6 + $0x258] sm:$0xf0]  ;;  %v6133_v1 = vld [vmem:[#allocation6 + $0x548] sm:$0xf] }
 0x63e   :  { %v5754_v11 = vor.u32 %v6766_v49, %v5751_v40  ;;  %v6327_v39 = vld [vmem:[#allocation6 + $0x6d8] sm:$0xf0]  ;;  %v6134_v14 = vor.u32 %v6864_v41, %v6133_v1  ;;  %v6890_v41 = vld [vmem:[#allocation6 + $0x62c] sm:$0xf] }
 0x640   :  { %4114 = vmatpush.bf16.msra.mxu3 %v5638_v4  ;;  %4138 = vmatpush.bf16.msra.mxu1 %v5926_v5  ;;  %v5862_v4 = vor.u32 %v6796_v62, %v5861_v61  ;;  %v6846_v5 = vld [vmem:[#allocation6 + $0x4cc] sm:$0xf]  ;;  %v6150_v62 = vor.u32 %v6868_v51, %v6149_v48  ;;  %v6373_v48 = vld [vmem:[#allocation6 + $0x728] sm:$0xf] }
 0x641   :  { %4205 = vmatpush.bf16.msra.mxu2 %v5514_v15  ;;  %4229 = vmatpush.bf16.msra.mxu0 %v5802_v0  ;;  %v6762_v15 = vld [vmem:[#allocation6 + $0x22c] sm:$0xf] }
 0x642   :  { %v6842_v0 = vld [vmem:[#allocation6 + $0x4ac] sm:$0xf]  ;;  %v5738_v18 = vor.u32 %v6762_v15, %v5735_v36  ;;  %v6117_v36 = vld [vmem:[#allocation6 + $0x528] sm:$0xf] }
 0x644   :  { %4115 = vmatpush.bf16.msra.mxu3 %v5622_v23  ;;  %4139 = vmatpush.bf16.msra.mxu1 %v5910_v26  ;;  %v6948_v23 = vld [vmem:[#allocation6 + $0x7f4] sm:$0xf0]  ;;  %v6074_v26 = vor.u32 %v6846_v5, %v6071_v10  ;;  %v8304_v19 = vpop.f32.mrf.mxu2  ;;  %v8307_v16 = vpop.f32.mrf.mxu0  ;;  %v6906_v5 = vld [vmem:[#allocation6 + $0x6ac] sm:$0xf]  ;;  %v6311_v10 = vld [vmem:[#allocation6 + $0x6b8] sm:$0xf0] }
 0x645   :  { %4206 = vmatpush.bf16.msra.mxu2 %v5498_v6  ;;  %4230 = vmatpush.bf16.msra.mxu0 %v5786_v33  ;;  %v6182_v6 = vor.u32 %v6876_v45, %v6181_v21  ;;  %v6470_v28 = vor.u32 %v6948_v23, %v6469_v22  ;;  %v6058_v33 = vor.u32 %v6842_v0, %v6055_v24  ;;  %v6860_v21 = vld [vmem:[#allocation6 + $0x534] sm:$0xf0]  ;;  %v6405_v45 = vld [vmem:[#allocation6 + $0x768] sm:$0xf]  ;;  %v6826_v0 = vld [vmem:[#allocation6 + $0x42c] sm:$0xf] }
 0x646   :  { %v6314_v15 = vor.u32 %v6906_v5, %v6311_v10  ;;  %v6932_v22 = vld [vmem:[#allocation6 + $0x774] sm:$0xf0]  ;;  %v5991_v24 = vld [vmem:[#allocation6 + $0x438] sm:$0xf0]  ;;  %v6818_v5 = vld [vmem:[#allocation6 + $0x3ec] sm:$0xf] }
 0x647   :  { %v6406_v7 = vor.u32 %v6932_v22, %v6405_v45  ;;  %v5959_v10 = vld [vmem:[#allocation6 + $0x3f8] sm:$0xf0]  ;;  %v6814_v22 = vld [vmem:[#allocation6 + $0x3cc] sm:$0xf] }
 0x648   :  { %4116 = vmatpush.bf16.msra.mxu3 %v5606_v38  ;;  %4140 = vmatpush.bf16.msra.mxu1 %v5894_v30  ;;  %v6165_v38 = vld [vmem:[#allocation6 + $0x588] sm:$0xf]  ;;  %v6872_v30 = vld [vmem:[#allocation6 + $0x594] sm:$0xf0]  ;;  %v5655_v45 = vld [vmem:[#allocation6 + $0x198] sm:$0xf0] }
 0x649   :  { %4207 = vmatpush.bf16.msra.mxu2 %v5482_v43  ;;  %4231 = vmatpush.bf16.msra.mxu0 %v5770_v59  ;;  %v6039_v43 = vld [vmem:[#allocation6 + $0x498] sm:$0xf0]  ;;  %v6166_v46 = vor.u32 %v6872_v30, %v6165_v38  ;;  %v6834_v59 = vld [vmem:[#allocation6 + $0x46c] sm:$0xf]  ;;  %v6856_v38 = vld [vmem:[#allocation6 + $0x514] sm:$0xf0] }
 0x64a   :  { %v6042_v57 = vor.u32 %v6838_v9, %v6039_v43  ;;  %v6389_v30 = vld [vmem:[#allocation6 + $0x748] sm:$0xf]  ;;  %v5703_v9 = vld [vmem:[#allocation6 + $0x1f8] sm:$0xf0]  ;;  %v6822_v43 = vld [vmem:[#allocation6 + $0x40c] sm:$0xf] }
 0x64b   :  { %v5706_v51 = vor.u32 %v6754_v8, %v5703_v9 }
 0x64c   :  { %4117 = vmatpush.bf16.msra.mxu3 %v5590_v54  ;;  %4141 = vmatpush.bf16.msra.mxu1 %v5878_v55  ;;  %v6437_v54 = vld [vmem:[#allocation6 + $0x7a8] sm:$0xf]  ;;  %v6940_v55 = vld [vmem:[#allocation6 + $0x7b4] sm:$0xf0]  ;;  %v3952_v61 = vpop.f32.mrf.mxu2  ;;  %v3978_v40 = vpop.f32.mrf.mxu0 }
 0x64d   :  { %4208 = vmatpush.bf16.msra.mxu2 %v5466_v50  ;;  %4232 = vmatpush.bf16.msra.mxu0 %v5754_v11  ;;  %v6438_v49 = vor.u32 %v6940_v55, %v6437_v54  ;;  %v6330_v50 = vor.u32 %v6910_v58, %v6327_v39  ;;  %v6830_v11 = vld [vmem:[#allocation6 + $0x44c] sm:$0xf]  ;;  %v6924_v54 = vld [vmem:[#allocation6 + $0x734] sm:$0xf0]  ;;  %v6263_v58 = vld [vmem:[#allocation6 + $0x658] sm:$0xf0] }
 0x64e   :  { %v6750_v39 = vld [vmem:[#allocation6 + $0x1cc] sm:$0xf]  ;;  %v6374_v61 = vor.u32 %v6924_v54, %v6373_v48  ;;  %v6920_v40 = vld [vmem:[#allocation6 + $0x714] sm:$0xf0]  ;;  %v5895_v48 = vld [vmem:[#allocation6 + $0x378] sm:$0xf0] }
 0x64f   :  { %4118 = vmatmul.bf16.vlgmr.msra.gmra.mxu3 %v8277_v56 }
 0x650   :  { %4162 = vmatpush.bf16.msrb.mxu3 %v6214_v60  ;;  %4142 = vmatpush.bf16.msra.mxu1 %v5862_v4  ;;  %v6023_v60 = vld [vmem:[#allocation6 + $0x478] sm:$0xf0] }
 0x651   :  { %4253 = vmatpush.bf16.msrb.mxu2 %v6090_v3  ;;  %4233 = vmatpush.bf16.msra.mxu0 %v5738_v18  ;;  %v6936_v3 = vld [vmem:[#allocation6 + $0x794] sm:$0xf0]  ;;  %v6026_v4 = vor.u32 %v6834_v59, %v6023_v60  ;;  %v5687_v59 = vld [vmem:[#allocation6 + $0x1d8] sm:$0xf0] }
 0x652   :  { %4209 = vmatmul.bf16.vlgmr.msra.gmra.mxu2 %v8263_v29  ;;  %v6454_v29 = vor.u32 %v6944_v32, %v6453_v31  ;;  %v6422_v35 = vor.u32 %v6936_v3, %v6421_v2  ;;  %v6928_v31 = vld [vmem:[#allocation6 + $0x754] sm:$0xf0]  ;;  %v5994_v32 = vor.u32 %v6826_v0, %v5991_v24  ;;  %v5690_v1 = vor.u32 %v6750_v39, %v5687_v59  ;;  %v6247_v2 = vld [vmem:[#allocation6 + $0x638] sm:$0xf0]  ;;  %v6746_v3 = vld [vmem:[#allocation6 + $0x1ac] sm:$0xf] }
 0x653   :  { %v6738_v24 = vld [vmem:[#allocation6 + $0x16c] sm:$0xf]  ;;  %v5879_v39 = vld [vmem:[#allocation6 + $0x358] sm:$0xf0] }
 0x654   :  { %4163 = vmatpush.bf16.msrb.mxu3 %v6198_v52  ;;  %4143 = vmatpush.bf16.msra.mxu1 %v5846_v13  ;;  %v6007_v52 = vld [vmem:[#allocation6 + $0x458] sm:$0xf0]  ;;  %v8311_v18 = vpop.f32.mrf.mxu2 }
 0x655   :  { %4254 = vmatpush.bf16.msrb.mxu2 %v6074_v26  ;;  %4234 = vmatpush.bf16.msra.mxu0 %v5722_v44  ;;  %v6010_v23 = vor.u32 %v6830_v11, %v6007_v52  ;;  %v6902_v26 = vld [vmem:[#allocation6 + $0x68c] sm:$0xf]  ;;  %v6295_v13 = vld [vmem:[#allocation6 + $0x698] sm:$0xf0]  ;;  %v6250_v52 = vor.u32 %v6890_v41, %v6247_v2 }
 0x656   :  { %v6298_v27 = vor.u32 %v6902_v26, %v6295_v13  ;;  %v5975_v44 = vld [vmem:[#allocation6 + $0x418] sm:$0xf0]  ;;  %v6878_v2 = vld [vmem:[#allocation6 + $0x5cc] sm:$0xf] }
 0x657   :  { %4144 = vmatmul.bf16.vlgmr.msra.gmra.mxu1 %v8280_v20  ;;  %v5978_v55 = vor.u32 %v6822_v43, %v5975_v44  ;;  %v5863_v41 = vld [vmem:[#allocation6 + $0x338] sm:$0xf0] }
 0x658   :  { %4164 = vmatpush.bf16.msrb.mxu3 %v6182_v6  ;;  %4188 = vmatpush.bf16.msrb.mxu1 %v6470_v28  ;;  %v6101_v6 = vld [vmem:[#allocation6 + $0x508] sm:$0xf]  ;;  %v8313_v28 = vpop.f32.mrf.mxu0 }
 0x659   :  { %4255 = vmatpush.bf16.msrb.mxu2 %v6058_v33  ;;  %4279 = vmatpush.bf16.msrb.mxu0 %v6346_v47  ;;  %v6898_v33 = vld [vmem:[#allocation6 + $0x66c] sm:$0xf] }
 0x65a   :  { %4235 = vmatmul.bf16.vlgmr.msra.gmra.mxu0 %v8266_v63  ;;  %v6118_v63 = vor.u32 %v6860_v21, %v6117_v36  ;;  %v6282_v47 = vor.u32 %v6898_v33, %v6279_v34  ;;  %v6231_v36 = vld [vmem:[#allocation6 + $0x618] sm:$0xf0]  ;;  %v6742_v21 = vld [vmem:[#allocation6 + $0x18c] sm:$0xf] }
 0x65b   :  { %v5658_v13 = vor.u32 %v6742_v21, %v5655_v45  ;;  %v6806_v33 = vld [vmem:[#allocation6 + $0x38c] sm:$0xf]  ;;  %v5911_v34 = vld [vmem:[#allocation6 + $0x398] sm:$0xf0] }
 0x65c   :  { %4165 = vmatpush.bf16.msrb.mxu3 %v6166_v46  ;;  %4189 = vmatpush.bf16.msrb.mxu1 %v6454_v29  ;;  %v6102_v46 = vor.u32 %v6856_v38, %v6101_v6  ;;  %v6390_v29 = vor.u32 %v6928_v31, %v6389_v30  ;;  %v4004_v60 = vpop.f32.mrf.mxu2  ;;  %v6810_v6 = vld [vmem:[#allocation6 + $0x3ac] sm:$0xf]  ;;  %v5914_v44 = vor.u32 %v6806_v33, %v5911_v34  ;;  %v5847_v21 = vld [vmem:[#allocation6 + $0x318] sm:$0xf0] }
 0x65d   :  { %4256 = vmatpush.bf16.msrb.mxu2 %v6042_v57  ;;  %4280 = vmatpush.bf16.msrb.mxu0 %v6330_v50  ;;  %v6894_v57 = vld [vmem:[#allocation6 + $0x64c] sm:$0xf]  ;;  %v6357_v50 = vld [vmem:[#allocation6 + $0x708] sm:$0xf] }
 0x65e   :  { %v6358_v11 = vor.u32 %v6920_v40, %v6357_v50  ;;  %v6734_v30 = vld [vmem:[#allocation6 + $0x14c] sm:$0xf] }
 0x65f   :  { %v6882_v60 = vld [vmem:[#allocation6 + $0x5ec] sm:$0xf] }
 0x660   :  { %4166 = vmatpush.bf16.msrb.mxu3 %v6150_v62  ;;  %4190 = vmatpush.bf16.msrb.mxu1 %v6438_v49  ;;  %v6266_v62 = vor.u32 %v6894_v57, %v6263_v58  ;;  %v4030_v49 = vpop.f32.mrf.mxu0  ;;  %v5591_v58 = vld [vmem:[#allocation6 + $0x118] sm:$0xf0]  ;;  %v6874_v45 = vld [vmem:[#allocation6 + $0x5ac] sm:$0xf] }
 0x661   :  { %4257 = vmatpush.bf16.msrb.mxu2 %v6026_v4  ;;  %4281 = vmatpush.bf16.msrb.mxu0 %v6314_v15  ;;  %v5671_v4 = vld [vmem:[#allocation6 + $0x1b8] sm:$0xf0]  ;;  %v6886_v15 = vld [vmem:[#allocation6 + $0x60c] sm:$0xf] }
 0x662   :  { %v6234_v26 = vor.u32 %v6886_v15, %v6231_v36 }
 0x664   :  { %4167 = vmatpush.bf16.msrb.mxu3 %v6134_v14  ;;  %4191 = vmatpush.bf16.msrb.mxu1 %v6422_v35  ;;  %v5674_v14 = vor.u32 %v6746_v3, %v5671_v4  ;;  %v5962_v35 = vor.u32 %v6818_v5, %v5959_v10  ;;  %v6199_v3 = vld [vmem:[#allocation6 + $0x5d8] sm:$0xf0] }
 0x665   :  { %4258 = vmatpush.bf16.msrb.mxu2 %v6010_v23  ;;  %4282 = vmatpush.bf16.msrb.mxu0 %v6298_v27  ;;  %v5943_v23 = vld [vmem:[#allocation6 + $0x3d8] sm:$0xf0]  ;;  %v6202_v36 = vor.u32 %v6878_v2, %v6199_v3  ;;  %v6854_v3 = vld [vmem:[#allocation6 + $0x50c] sm:$0xf] }
 0x666   :  { %v5946_v0 = vor.u32 %v6814_v22, %v5943_v23  ;;  %v6183_v22 = vld [vmem:[#allocation6 + $0x5b8] sm:$0xf0] }
 0x668   :  { %4168 = vmatpush.bf16.msrb.mxu3 %v6118_v63  ;;  %4192 = vmatpush.bf16.msrb.mxu1 %v6406_v7  ;;  %v5639_v63 = vld [vmem:[#allocation6 + $0x178] sm:$0xf0] }
 0x669   :  { %4259 = vmatpush.bf16.msrb.mxu2 %v5994_v32  ;;  %4283 = vmatpush.bf16.msrb.mxu0 %v6282_v47  ;;  %v5927_v7 = vld [vmem:[#allocation6 + $0x3b8] sm:$0xf0]  ;;  %v5642_v27 = vor.u32 %v6738_v24, %v5639_v63  ;;  %v6802_v47 = vld [vmem:[#allocation6 + $0x36c] sm:$0xf] }
 0x66a   :  { %v5930_v38 = vor.u32 %v6810_v6, %v5927_v7  ;;  %v5623_v32 = vld [vmem:[#allocation6 + $0x158] sm:$0xf0] }
 0x66b   :  { %v5626_v43 = vor.u32 %v6734_v30, %v5623_v32  ;;  %v6167_v30 = vld [vmem:[#allocation6 + $0x598] sm:$0xf0] }
 0x66c   :  { %4169 = vmatpush.bf16.msrb.mxu3 %v6102_v46  ;;  %4193 = vmatpush.bf16.msrb.mxu1 %v6390_v29  ;;  %v6730_v46 = vld [vmem:[#allocation6 + $0x12c] sm:$0xf]  ;;  %v5607_v29 = vld [vmem:[#allocation6 + $0x138] sm:$0xf0] }
 0x66d   :  { %4260 = vmatpush.bf16.msrb.mxu2 %v5978_v55  ;;  %4284 = vmatpush.bf16.msrb.mxu0 %v6266_v62  ;;  %v5610_v54 = vor.u32 %v6730_v46, %v5607_v29  ;;  %v5898_v55 = vor.u32 %v6802_v47, %v5895_v48  ;;  %v6455_v32 = vld [vmem:[#allocation6 + $0x7d8] sm:$0xf0]  ;;  %v6938_v46 = vld [vmem:[#allocation6 + $0x7ac] sm:$0xf] }
 0x66e   :  { %v6439_v29 = vld [vmem:[#allocation6 + $0x7b8] sm:$0xf0] }
 0x66f   :  { %4170 = vmatmul.bf16.vlgmr.msrb.gmra.mxu3 %v8284_v37 }
 0x670   :  { %4214 = vmatpush.bf16.msra.mxu3 %v5706_v51  ;;  %4194 = vmatpush.bf16.msrb.mxu1 %v6374_v61  ;;  %v6215_v61 = vld [vmem:[#allocation6 + $0x5f8] sm:$0xf0] }
 0x671   :  { %4261 = vmatmul.bf16.vlgmr.msrb.gmra.mxu2 %v8269_v25  ;;  %4285 = vmatpush.bf16.msrb.mxu0 %v6250_v52  ;;  %v6218_v40 = vor.u32 %v6882_v60, %v6215_v61  ;;  %v8329_v52 = vld [vmem:[%s8584_s14] sm:$0xf]  ;;  %v6858_v61 = vld [vmem:[#allocation6 + $0x52c] sm:$0xf] }
 0x672   :  { %v3911_v25 = vpop.f32.mrf.mxu3  ;;  %v8321_v51 = vpop.f32.mrf.mxu2  ;;  %v4307_v24 = vperm.slane %v8329_v52, 0 }
 0x673   :  { %v3912_v31 = vadd.f32 %v3911_v25, %v8299_v53  ;;  %v6186_v25 = vor.u32 %v6874_v45, %v6183_v22  ;;  %v6918_v22 = vld [vmem:[#allocation6 + $0x70c] sm:$0xf] }
 0x674   :  { %4215 = vmatpush.bf16.msra.mxu3 %v5690_v1  ;;  %4195 = vmatpush.bf16.msrb.mxu1 %v6358_v11  ;;  %v3937_v8 = vpop.f32.mrf.mxu1  ;;  %v6794_v1 = vld [vmem:[#allocation6 + $0x32c] sm:$0xf] }
 0x675   :  { %4286 = vmatpush.bf16.msrb.mxu0 %v6234_v26  ;;  %v3925_v9 = vadd.f32 %v8301_v17, %v3912_v31  ;;  %v6798_v17 = vld [vmem:[#allocation6 + $0x34c] sm:$0xf]  ;;  %v5866_v11 = vor.u32 %v6794_v1, %v5863_v41 }
 0x676   :  { %v5882_v50 = vor.u32 %v6798_v17, %v5879_v39  ;;  %v6946_v26 = vld [vmem:[#allocation6 + $0x7ec] sm:$0xf] }
 0x677   :  { %4196 = vmatmul.bf16.vlgmr.msrb.gmra.mxu1 %v8288_v12  ;;  %v8323_v57 = vpop.f32.mrf.mxu0  ;;  %v3938_v62 = vadd.f32 %v3937_v8, %v3925_v9  ;;  %v6942_v31 = vld [vmem:[#allocation6 + $0x7cc] sm:$0xf] }
 0x678   :  { %4216 = vmatpush.bf16.msra.mxu3 %v5674_v14  ;;  %4240 = vmatpush.bf16.msra.mxu1 %v5962_v35  ;;  %v6790_v35 = vld [vmem:[#allocation6 + $0x30c] sm:$0xf]  ;;  %v6458_v8 = vor.u32 %v6942_v31, %v6455_v32 }
 0x679   :  { %4287 = vmatmul.bf16.vlgmr.msrb.gmra.mxu0 %v8272_v42  ;;  %v6726_v42 = vld [vmem:[#allocation6 + $0x10c] sm:$0xf]  ;;  %v3951_v5 = vadd.f32 %v8304_v19, %v3938_v62  ;;  %v8334_v19 = vld [vmem:[%s8585_s15] sm:$0xf]  ;;  %v5850_v63 = vor.u32 %v6790_v35, %v5847_v21  ;;  %v6375_v21 = vld [vmem:[#allocation6 + $0x738] sm:$0xf0] }
 0x67a   :  { %v3913_v53 = vpop.f32.mrf.mxu3  ;;  %v5594_v49 = vor.u32 %v6726_v42, %v5591_v58  ;;  %v4056_v4 = vpop.f32.mrf.mxu2  ;;  %v4321_v7 = vperm.slane %v8334_v19, 0  ;;  %v6866_v9 = vld [vmem:[#allocation6 + $0x56c] sm:$0xf]  ;;  %v6423_v58 = vld [vmem:[#allocation6 + $0x798] sm:$0xf0]  ;;  %v4322_v31 = vperm.slane %v8334_v19, 1 }
 0x67b   :  { %v6442_v53 = vor.u32 %v6938_v46, %v6439_v29  ;;  %v6934_v42 = vld [vmem:[#allocation6 + $0x78c] sm:$0xf]  ;;  %v6103_v4 = vld [vmem:[#allocation6 + $0x518] sm:$0xf0] }
 0x67c   :  { %4217 = vmatpush.bf16.msra.mxu3 %v5658_v13  ;;  %4241 = vmatpush.bf16.msra.mxu1 %v5946_v0  ;;  %v3939_v59 = vpop.f32.mrf.mxu1  ;;  %v6471_v13 = vld [vmem:[#allocation6 + $0x7f8] sm:$0xf0]  ;;  %v6426_v60 = vor.u32 %v6934_v42, %v6423_v58 }
 0x67f   :  { %v4082_v14 = vpop.f32.mrf.mxu0 }
 0x680   :  { %4218 = vmatpush.bf16.msra.mxu3 %v5642_v27  ;;  %4242 = vmatpush.bf16.msra.mxu1 %v5930_v38  ;;  %v6474_v27 = vor.u32 %v6946_v26, %v6471_v13  ;;  %v6870_v38 = vld [vmem:[#allocation6 + $0x58c] sm:$0xf]  ;;  %v6106_v14 = vor.u32 %v6854_v3, %v6103_v4  ;;  %v8358_v4 = vld [vmem:[%s8586_s16] sm:$0xff] }
 0x682   :  { %v3963_v10 = vpop.f32.mrf.mxu3 }
 0x683   :  { %v3964_v15 = vadd.f32 %v3963_v10, %v3951_v5  ;;  %v6926_v5 = vld [vmem:[#allocation6 + $0x74c] sm:$0xf]  ;;  %v6391_v10 = vld [vmem:[#allocation6 + $0x758] sm:$0xf0] }
 0x684   :  { %4219 = vmatpush.bf16.msra.mxu3 %v5626_v43  ;;  %4243 = vmatpush.bf16.msra.mxu1 %v5914_v44  ;;  %v3989_v23 = vpop.f32.mrf.mxu1  ;;  %v6151_v44 = vld [vmem:[#allocation6 + $0x578] sm:$0xf0]  ;;  %v6394_v35 = vor.u32 %v6926_v5, %v6391_v10 }
 0x685   :  { %v3977_v0 = vadd.f32 %v8307_v16, %v3964_v15  ;;  %v6170_v16 = vor.u32 %v6870_v38, %v6167_v30  ;;  %v6154_v48 = vor.u32 %v6866_v9, %v6151_v44 }
 0x687   :  { %v3990_v6 = vadd.f32 %v3989_v23, %v3977_v0  ;;  %v6359_v23 = vld [vmem:[#allocation6 + $0x718] sm:$0xf0] }
 0x688   :  { %4220 = vmatpush.bf16.msra.mxu3 %v5610_v54  ;;  %4244 = vmatpush.bf16.msra.mxu1 %v5898_v55  ;;  %v6862_v54 = vld [vmem:[#allocation6 + $0x54c] sm:$0xf]  ;;  %v6135_v55 = vld [vmem:[#allocation6 + $0x558] sm:$0xf0]  ;;  %v6362_v13 = vor.u32 %v6918_v22, %v6359_v23 }
 0x689   :  { %v4315_v33 = vmul.f32 %v4307_v24, %v3990_v6  ;;  %v6138_v59 = vor.u32 %v6862_v54, %v6135_v55  ;;  %v4434_v22 = vld [vmem:[%s8587_s17 + $0x68] sm:$0xff]  ;;  %v4468_v23 = vld [vmem:[%s8587_s17 + $0x178] sm:$0xff] }
 0x68a   :  { %v3965_v34 = vpop.f32.mrf.mxu3 }
 0x68c   :  { %4221 = vmatpush.bf16.msra.mxu3 %v5594_v49  ;;  %4245 = vmatpush.bf16.msra.mxu1 %v5882_v50  ;;  %v3991_v43 = vpop.f32.mrf.mxu1  ;;  %v6119_v49 = vld [vmem:[#allocation6 + $0x538] sm:$0xf0] }
 0x68d   :  { %v6407_v50 = vld [vmem:[#allocation6 + $0x778] sm:$0xf0]  ;;  %v6122_v41 = vor.u32 %v6858_v61, %v6119_v49 }
 0x68f   :  { %4222 = vmatmul.bf16.vlgmr.msra.gmra.mxu3 %v8277_v56  ;;  %v4329_v56 = vadd.f32 %v4321_v7, %v4315_v33 }
 0x690   :  { %4266 = vmatpush.bf16.msrb.mxu3 %v6218_v40  ;;  %4246 = vmatpush.bf16.msra.mxu1 %v5866_v11 }
 0x691   :  { %v4333_v47 = vmax.f32 %v4329_v56, 0.0 }
 0x692   :  { %v4015_v17 = vpop.f32.mrf.mxu3 }
 0x693   :  { %4356 = vmatpush.msra.mxu2 %v4333_v47  ;;  %v4016_v39 = vadd.f32 %v4015_v17, %v8311_v18 }
 0x694   :  { %4267 = vmatpush.bf16.msrb.mxu3 %v6202_v36  ;;  %4247 = vmatpush.bf16.msra.mxu1 %v5850_v63  ;;  %v4041_v62 = vpop.f32.mrf.mxu1  ;;  %v6922_v36 = vld [vmem:[#allocation6 + $0x72c] sm:$0xf] }
 0x695   :  { %v4029_v40 = vadd.f32 %v8313_v28, %v4016_v39  ;;  %v4106_v1 = vpop.f32.mrf.mxu2  ;;  %v6378_v28 = vor.u32 %v6922_v36, %v6375_v21  ;;  %6475 = vmatmul.msk.f32.vlgmr.msra.gmra.mxu2 %vm2293_vm6, %v8358_v4  ;;  %v4451_v36 = vld [vmem:[%s8587_s17 + $0xf0] sm:$0xff]  ;;  %v4436_v21 = vld [vmem:[%s8587_s17 + $0x78] sm:$0xff] }
 0x697   :  { %4248 = vmatmul.bf16.vlgmr.msra.gmra.mxu1 %v8280_v20  ;;  %v6930_v20 = vld [vmem:[#allocation6 + $0x76c] sm:$0xf]  ;;  %v4132_v11 = vpop.f32.mrf.mxu0  ;;  %v4042_v0 = vadd.f32 %v4041_v62, %v4029_v40  ;;  %v4323_v62 = vperm.slane %v8334_v19, 2 }
 0x698   :  { %4268 = vmatpush.bf16.msrb.mxu3 %v6186_v25  ;;  %4292 = vmatpush.bf16.msrb.mxu1 %v6474_v27  ;;  %v6410_v2 = vor.u32 %v6930_v20, %v6407_v50  ;;  %v4308_v27 = vperm.slane %v8329_v52, 1 }
 0x699   :  { %v4055_v24 = vadd.f32 %v8321_v51, %v4042_v0  ;;  %v4467_v0 = vld [vmem:[%s8587_s17 + $0x170] sm:$0xff] }
 0x69a   :  { %v4017_v18 = vpop.f32.mrf.mxu3 }
 0x69c   :  { %4269 = vmatpush.bf16.msrb.mxu3 %v6170_v16  ;;  %4293 = vmatpush.bf16.msrb.mxu1 %v6458_v8  ;;  %v4043_v15 = vpop.f32.mrf.mxu1 }
 0x69d   :  { %v4108_v45 = vpop.f32.mrf.mxu2  ;;  %v4452_v15 = vld [vmem:[%s8587_s17 + $0xf8] sm:$0xff] }
 0x69e   :  { %v4435_v45 = vld [vmem:[%s8587_s17 + $0x70] sm:$0xff] }
 0x69f   :  { %v4134_v26 = vpop.f32.mrf.mxu0 }
 0x6a0   :  { %4270 = vmatpush.bf16.msrb.mxu3 %v6154_v48  ;;  %4294 = vmatpush.bf16.msrb.mxu1 %v6442_v53  ;;  %v4449_v26 = vld [vmem:[%s8587_s17 + $0xe0] sm:$0xff] }
 0x6a4   :  { %4271 = vmatpush.bf16.msrb.mxu3 %v6138_v59  ;;  %4295 = vmatpush.bf16.msrb.mxu1 %v6426_v60  ;;  %v4309_v59 = vperm.slane %v8329_v52, 2 }
 0x6a8   :  { %4272 = vmatpush.bf16.msrb.mxu3 %v6122_v41  ;;  %4296 = vmatpush.bf16.msrb.mxu1 %v6410_v2 }
 0x6ac   :  { %4273 = vmatpush.bf16.msrb.mxu3 %v6106_v14  ;;  %4297 = vmatpush.bf16.msrb.mxu1 %v6394_v35 }
 0x6af   :  { %4274 = vmatmul.bf16.vlgmr.msrb.gmra.mxu3 %v8284_v37 }
 0x6b0   :  { %4298 = vmatpush.bf16.msrb.mxu1 %v6378_v28  ;;  %v4450_v28 = vld [vmem:[%s8587_s17 + $0xe8] sm:$0xff] }
 0x6b2   :  { %v4067_v63 = vpop.f32.mrf.mxu3 }
 0x6b3   :  { %v4068_v6 = vadd.f32 %v4067_v63, %v4055_v24  ;;  %v4448_v24 = vld [vmem:[%s8587_s17 + $0xd8] sm:$0xff] }
 0x6b4   :  { %4299 = vmatpush.bf16.msrb.mxu1 %v6362_v13  ;;  %v4093_v25 = vpop.f32.mrf.mxu1  ;;  %v4433_v13 = vld [vmem:[%s8587_s17 + $0x60] sm:$0xff]  ;;  %v4432_v63 = vld [vmem:[%s8587_s17 + $0x58] sm:$0xff] }
 0x6b5   :  { %v4081_v7 = vadd.f32 %v8323_v57, %v4068_v6  ;;  %v4158_v38 = vpop.f32.mrf.mxu2  ;;  %v4466_v6 = vld [vmem:[%s8587_s17 + $0x168] sm:$0xff] }
 0x6b7   :  { %4300 = vmatmul.bf16.vlgmr.msrb.gmra.mxu1 %v8288_v12  ;;  %v4094_v30 = vadd.f32 %v4093_v25, %v4081_v7  ;;  %v4184_v32 = vpop.f32.mrf.mxu0  ;;  %v4447_v7 = vld [vmem:[%s8587_s17 + $0xd0] sm:$0xff] }
 0x6b8   :  { %4489 = vmatpush.msra.mxu1 %v4436_v21  ;;  %v4431_v25 = vld [vmem:[%s8587_s17 + $0x50] sm:$0xff] }
 0x6b9   :  { %v4316_v37 = vmul.f32 %v4308_v27, %v4094_v30  ;;  %v4465_v27 = vld [vmem:[%s8587_s17 + $0x160] sm:$0xff]  ;;  %v4430_v30 = vld [vmem:[%s8587_s17 + $0x48] sm:$0xff]  ;;  %v4423_v21 = vld [vmem:[%s8587_s17 + $0x10] sm:$0xff] }
 0x6ba   :  { %v4069_v33 = vpop.f32.mrf.mxu3  ;;  %4490 = vmatpush.msra.mxu1 %v4435_v45  ;;  %v4437_v45 = vld [vmem:[%s8587_s17 + $0x80] sm:$0xff] }
 0x6bb   :  { %v4330_v34 = vadd.f32 %v4322_v31, %v4316_v37  ;;  %v4464_v31 = vld [vmem:[%s8587_s17 + $0x158] sm:$0xff]  ;;  %v4445_v37 = vld [vmem:[%s8587_s17 + $0xc0] sm:$0xff] }
 0x6bc   :  { %v4095_v16 = vpop.f32.mrf.mxu1  ;;  %4491 = vmatpush.msra.mxu1 %v4434_v22  ;;  %v4429_v33 = vld [vmem:[%s8587_s17 + $0x40] sm:$0xff]  ;;  %v4471_v22 = vld [vmem:[%s8587_s17 + $0x190] sm:$0xff] }
 0x6bd   :  { %v4334_v56 = vmax.f32 %v4330_v34, 0.0  ;;  %v4160_v12 = vpop.f32.mrf.mxu2  ;;  %v4463_v34 = vld [vmem:[%s8587_s17 + $0x150] sm:$0xff]  ;;  %v4428_v16 = vld [vmem:[%s8587_s17 + $0x38] sm:$0xff] }
 0x6be   :  { %4492 = vmatpush.msra.mxu1 %v4433_v13  ;;  %v4462_v12 = vld [vmem:[%s8587_s17 + $0x148] sm:$0xff] }
 0x6bf   :  { %4376 = vmatpush.msra.mxu3 %v4334_v56  ;;  %v4186_v51 = vpop.f32.mrf.mxu0  ;;  %v4444_v56 = vld [vmem:[%s8587_s17 + $0xb8] sm:$0xff]  ;;  %v4470_v13 = vld [vmem:[%s8587_s17 + $0x188] sm:$0xff] }
 0x6c0   :  { %6476 = vmatmul.msk.f32.vlgmr.msra.gmra.mxu3 %vm2293_vm6, %v8358_v4  ;;  %4493 = vmatpush.msra.mxu1 %v4432_v63  ;;  %v4443_v51 = vld [vmem:[%s8587_s17 + $0xb0] sm:$0xff] }
 0x6c1   :  { %4509 = vmatpush.msrb.mxu3 %v4452_v15  ;;  %v4458_v15 = vld [vmem:[%s8587_s17 + $0x128] sm:$0xff] }
 0x6c2   :  { %4494 = vmatpush.msra.mxu1 %v4431_v25  ;;  %v4453_v25 = vld [vmem:[%s8587_s17 + $0x100] sm:$0xff] }
 0x6c3   :  { %4510 = vmatpush.msrb.mxu3 %v4451_v36  ;;  %v4472_v36 = vld [vmem:[%s8587_s17 + $0x198] sm:$0xff] }
 0x6c4   :  { %4495 = vmatpush.msra.mxu1 %v4430_v30 }
 0x6c5   :  { %4511 = vmatpush.msrb.mxu3 %v4450_v28  ;;  %v4457_v28 = vld [vmem:[%s8587_s17 + $0x120] sm:$0xff] }
 0x6c6   :  { %4496 = vmatpush.msra.mxu1 %v4429_v33 }
 0x6c7   :  { %4512 = vmatpush.msrb.mxu3 %v4449_v26  ;;  %v4456_v26 = vld [vmem:[%s8587_s17 + $0x118] sm:$0xff] }
 0x6c8   :  { %4497 = vmatpush.msra.mxu1 %v4428_v16 }
 0x6c9   :  { %4513 = vmatpush.msrb.mxu3 %v4448_v24  ;;  %v4455_v24 = vld [vmem:[%s8587_s17 + $0x110] sm:$0xff] }
 0x6cb   :  { %4514 = vmatpush.msrb.mxu3 %v4447_v7  ;;  %v4454_v7 = vld [vmem:[%s8587_s17 + $0x108] sm:$0xff] }
 0x6d2   :  { %v4119_v8 = vpop.f32.mrf.mxu3 }
 0x6d3   :  { %v4120_v9 = vadd.f32 %v4119_v8, %v4106_v1 }
 0x6d4   :  { %v4145_v43 = vpop.f32.mrf.mxu1 }
 0x6d5   :  { %v4133_v57 = vadd.f32 %v4132_v11, %v4120_v9  ;;  %v4210_v44 = vpop.f32.mrf.mxu2  ;;  %v4427_v9 = vld [vmem:[%s8587_s17 + $0x30] sm:$0xff] }
 0x6d6   :  { %4498 = vmatpush.msra.mxu1 %v4427_v9 }
 0x6d7   :  { %v4236_v46 = vpop.f32.mrf.mxu0  ;;  %v4146_v54 = vadd.f32 %v4145_v43, %v4133_v57  ;;  %v4461_v43 = vld [vmem:[%s8587_s17 + $0x140] sm:$0xff] }
 0x6d9   :  { %v4159_v55 = vadd.f32 %v4158_v38, %v4146_v54  ;;  %v4446_v38 = vld [vmem:[%s8587_s17 + $0xc8] sm:$0xff] }
 0x6da   :  { %v4121_v29 = vpop.f32.mrf.mxu3  ;;  %4515 = vmatpush.msrb.mxu3 %v4446_v38  ;;  %v4469_v38 = vld [vmem:[%s8587_s17 + $0x180] sm:$0xff] }
 0x6db   :  { %v4426_v29 = vld [vmem:[%s8587_s17 + $0x28] sm:$0xff] }
 0x6dc   :  { %v4147_v47 = vpop.f32.mrf.mxu1  ;;  %4516 = vmatpush.msrb.mxu3 %v4445_v37  ;;  %4499 = vmatpush.msra.mxu1 %v4426_v29 }
 0x6dd   :  { %v4212_v48 = vpop.f32.mrf.mxu2  ;;  %v4460_v47 = vld [vmem:[%s8587_s17 + $0x138] sm:$0xff] }
 0x6de   :  { %4517 = vmatpush.msrb.mxu3 %v4444_v56 }
 0x6df   :  { %v4238_v53 = vpop.f32.mrf.mxu0 }
 0x6e0   :  { %4518 = vmatpush.msrb.mxu3 %v4443_v51  ;;  %v4441_v53 = vld [vmem:[%s8587_s17 + $0xa0] sm:$0xff] }
 0x6f2   :  { %v4171_v42 = vpop.f32.mrf.mxu3 }
 0x6f3   :  { %v4172_v58 = vadd.f32 %v4171_v42, %v4159_v55  ;;  %v4310_v55 = vperm.slane %v8329_v52, 3  ;;  %v4425_v42 = vld [vmem:[%s8587_s17 + $0x20] sm:$0xff]  ;;  %v4439_v52 = vld [vmem:[%s8587_s17 + $0x90] sm:$0xff] }
 0x6f4   :  { %v4197_v39 = vpop.f32.mrf.mxu1  ;;  %v8350_v60 = vpop.f32.mrf.mxu2  ;;  %4500 = vmatpush.msra.mxu1 %v4425_v42 }
 0x6f5   :  { %v4185_v17 = vadd.f32 %v4184_v32, %v4172_v58  ;;  %v4459_v58 = vld [vmem:[%s8587_s17 + $0x130] sm:$0xff] }
 0x6f6   :  { %v8353_v20 = vpop.f32.mrf.mxu0 }
 0x6f7   :  { %v4198_v61 = vadd.f32 %v4197_v39, %v4185_v17  ;;  %v4440_v17 = vld [vmem:[%s8587_s17 + $0x98] sm:$0xff] }
 0x6f9   :  { %v4317_v49 = vmul.f32 %v4309_v59, %v4198_v61  ;;  %v4324_v59 = vperm.slane %v8334_v19, 3  ;;  %v4483_v19 = vld [vmem:[%s8587_s17 + $0x1f0] sm:$0xff] }
 0x6fa   :  { %v4173_v50 = vpop.f32.mrf.mxu3 }
 0x6fb   :  { %v4331_v40 = vadd.f32 %v4323_v62, %v4317_v49  ;;  %v4484_v50 = vld [vmem:[%s8587_s17 + $0x1f8] sm:$0xff] }
 0x6fc   :  { %v4199_v41 = vpop.f32.mrf.mxu1  ;;  %v4264_v2 = vpop.f32.mrf.mxu2 }
 0x6fd   :  { %v4335_v1 = vmax.f32 %v4331_v40, 0.0  ;;  %v4482_v40 = vld [vmem:[%s8587_s17 + $0x1e8] sm:$0xff]  ;;  %v4480_v41 = vld [vmem:[%s8587_s17 + $0x1d8] sm:$0xff]  ;;  %v4479_v2 = vld [vmem:[%s8587_s17 + $0x1d0] sm:$0xff] }
 0x6fe   :  { %v4290_v3 = vpop.f32.mrf.mxu0 }
 0x6ff   :  { %4396 = vmatpush.msra.mxu0 %v4335_v1  ;;  %v4481_v1 = vld [vmem:[%s8587_s17 + $0x1e0] sm:$0xff]  ;;  %v4478_v3 = vld [vmem:[%s8587_s17 + $0x1c8] sm:$0xff] }
 0x700   :  { %6477 = vmatmul.msk.f32.vlgmr.msra.gmra.mxu0 %vm2293_vm6, %v8358_v4 }
 0x701   :  { %4529 = vmatpush.msrb.mxu0 %v4468_v23  ;;  %v4422_v23 = vld [vmem:[%s8587_s17 + $0x8] sm:$0xff] }
 0x703   :  { %4530 = vmatpush.msrb.mxu0 %v4467_v0  ;;  %v4421_v0 = vld [vmem:[%s8587_s17] sm:$0xff] }
 0x705   :  { %4531 = vmatpush.msrb.mxu0 %v4466_v6 }
 0x707   :  { %4532 = vmatpush.msrb.mxu0 %v4465_v27 }
 0x709   :  { %4533 = vmatpush.msrb.mxu0 %v4464_v31  ;;  %v7001_v31 = vld [vmem:[%s8588_s18] ss:$0 sm:$0xff] }
 0x70b   :  { %4534 = vmatpush.msrb.mxu0 %v4463_v34 }
 0x70d   :  { %4535 = vmatpush.msrb.mxu0 %v4462_v12 }
 0x70f   :  { %4536 = vmatpush.msrb.mxu0 %v4461_v43 }
 0x711   :  { %4537 = vmatpush.msrb.mxu0 %v4460_v47 }
 0x712   :  { %v4223_v5 = vpop.f32.mrf.mxu3 }
 0x713   :  { %v4224_v10 = vadd.f32 %v4223_v5, %v4210_v44  ;;  %v4442_v44 = vld [vmem:[%s8587_s17 + $0xa8] sm:$0xff]  ;;  %4538 = vmatpush.msrb.mxu0 %v4459_v58  ;;  %v4476_v5 = vld [vmem:[%s8587_s17 + $0x1b8] sm:$0xff] }
 0x714   :  { %v4249_v11 = vpop.f32.mrf.mxu1  ;;  %4519 = vmatpush.msrb.mxu3 %v4442_v44 }
 0x715   :  { %v4237_v18 = vadd.f32 %v4236_v46, %v4224_v10  ;;  %v4475_v10 = vld [vmem:[%s8587_s17 + $0x1b0] sm:$0xff]  ;;  %4539 = vmatpush.msrb.mxu0 %v4458_v15 }
 0x716   :  { %4520 = vmatpush.msrb.mxu3 %v4441_v53 }
 0x717   :  { %v4250_v32 = vadd.f32 %v4249_v11, %v4237_v18  ;;  %v4474_v11 = vld [vmem:[%s8587_s17 + $0x1a8] sm:$0xff]  ;;  %v4473_v18 = vld [vmem:[%s8587_s17 + $0x1a0] sm:$0xff]  ;;  %4540 = vmatpush.msrb.mxu0 %v4457_v28 }
 0x718   :  { %4521 = vmatpush.msrb.mxu3 %v4440_v17  ;;  %v4358_v63 = vpop.f32.mrf.mxu2 }
 0x719   :  { %v4263_v8 = vadd.f32 %v8350_v60, %v4250_v32  ;;  %4541 = vmatpush.msrb.mxu0 %v4456_v26 }
 0x71a   :  { %v4225_v14 = vpop.f32.mrf.mxu3  ;;  %4522 = vmatpush.msrb.mxu3 %v4439_v52 }
 0x71b   :  { %v4424_v14 = vld [vmem:[%s8587_s17 + $0x18] sm:$0xff]  ;;  %4542 = vmatpush.msrb.mxu0 %v4455_v24 }
 0x71c   :  { %v4251_v35 = vpop.f32.mrf.mxu1  ;;  %4501 = vmatpush.msra.mxu1 %v4424_v14 }
 0x71d   :  { %v4438_v35 = vld [vmem:[%s8587_s17 + $0x88] sm:$0xff]  ;;  %4543 = vmatpush.msrb.mxu0 %v4454_v7 }
 0x71e   :  { %4523 = vmatpush.msrb.mxu3 %v4438_v35  ;;  %4502 = vmatpush.msra.mxu1 %v4423_v21 }
 0x71f   :  { %4544 = vmatpush.msrb.mxu0 %v4453_v25 }
 0x720   :  { %4524 = vmatpush.msrb.mxu3 %v4437_v45  ;;  %4503 = vmatpush.msra.mxu1 %v4422_v23 }
 0x722   :  { %4504 = vmatpush.msra.mxu1 %v4421_v0 }
 0x723   :  { %4505 = vmatmul.f32.vlgmr.msra.gmra.mxu1 %v4358_v63 }
 0x732   :  { %v4275_v57 = vpop.f32.mrf.mxu3 }
 0x733   :  { %v4276_v46 = vadd.f32 %v4275_v57, %v4263_v8 }
 0x734   :  { %v4301_v48 = vpop.f32.mrf.mxu1 }
 0x735   :  { %v4289_v54 = vadd.f32 %v8353_v20, %v4276_v46 }
 0x737   :  { %v4302_v39 = vadd.f32 %v4301_v48, %v4289_v54 }
 0x739   :  { %v4318_v60 = vmul.f32 %v4310_v55, %v4302_v39 }
 0x73a   :  { %v4277_v61 = vpop.f32.mrf.mxu3 }
 0x73b   :  { %v4332_v62 = vadd.f32 %v4324_v59, %v4318_v60 }
 0x73c   :  { %v4303_v49 = vpop.f32.mrf.mxu1 }
 0x73d   :  { %v4336_v20 = vmax.f32 %v4332_v62, 0.0 }
 0x73f   :  { %4416 = vmatpush.msrb.mxu2 %v4336_v20 }
 0x740   :  { %6478 = vmatmul.msk.f32.vlgmr.msrb.gmra.mxu2 %vm2293_vm6, %v8358_v4  ;;  %v4477_v4 = vld [vmem:[%s8587_s17 + $0x1c0] sm:$0xff] }
 0x741   :  { %4549 = vmatpush.msra.mxu2 %v4484_v50 }
 0x743   :  { %4550 = vmatpush.msra.mxu2 %v4483_v19  ;;  %v4378_v6 = vpop.f32.mrf.mxu3 }
 0x744   :  { %4525 = vmatmul.f32.vlgmr.msrb.gmra.mxu3 %v4378_v6 }
 0x745   :  { %4551 = vmatpush.msra.mxu2 %v4482_v40 }
 0x747   :  { %4552 = vmatpush.msra.mxu2 %v4481_v1 }
 0x749   :  { %4553 = vmatpush.msra.mxu2 %v4480_v41 }
 0x74b   :  { %4554 = vmatpush.msra.mxu2 %v4479_v2 }
 0x74d   :  { %4555 = vmatpush.msra.mxu2 %v4478_v3 }
 0x74f   :  { %4556 = vmatpush.msra.mxu2 %v4477_v4 }
 0x751   :  { %4557 = vmatpush.msra.mxu2 %v4476_v5 }
 0x753   :  { %4558 = vmatpush.msra.mxu2 %v4475_v10 }
 0x755   :  { %4559 = vmatpush.msra.mxu2 %v4474_v11 }
 0x757   :  { %4560 = vmatpush.msra.mxu2 %v4473_v18 }
 0x759   :  { %4561 = vmatpush.msra.mxu2 %v4472_v36 }
 0x75b   :  { %4562 = vmatpush.msra.mxu2 %v4471_v22 }
 0x75d   :  { %4563 = vmatpush.msra.mxu2 %v4470_v13 }
 0x75f   :  { %4564 = vmatpush.msra.mxu2 %v4469_v38 }
 0x77d   :  { %v4398_v27 = vpop.f32.mrf.mxu0 }
 0x77e   :  { %4545 = vmatmul.f32.vlgmr.msrb.gmra.mxu0 %v4398_v27 }
 0x7a0   :  { %v4506_v37 = vpop.f32.mrf.mxu1 }
 0x7a1   :  { %v4507_v32 = vadd.f32 %v7001_v31, %v4506_v37 }
 0x7c3   :  { %v4418_v30 = vpop.f32.mrf.mxu2 }
 0x7c4   :  { %4565 = vmatmul.f32.vlgmr.msra.gmra.mxu2 %v4418_v30 }
 0x7c7   :  { %v4526_v33 = vpop.f32.mrf.mxu3 }
 0x7c8   :  { %v4527_v34 = vadd.f32 %v4526_v33, %v4507_v32 }
 0x7fb   :  { %v4546_v56 = vpop.f32.mrf.mxu0 }
 0x7fc   :  { %v4547_v16 = vadd.f32 %v4546_v56, %v4527_v34 }
 0x847   :  { %v4566_v12 = vpop.f32.mrf.mxu2 }
 0x848   :  { %v4567_v51 = vadd.f32 %v4566_v12, %v4547_v16 }
 0x84a   :  { %4569 = vst [vmem:[%s8589_s19] sm:$0xff] %v4567_v51 }
 0x84b   :  { %4574 = vsyncpa [#allocation3], 1 }
 0x84c   :  { %4575 = vsyncpa [#allocation5], 1 }

</bundles_post_ra>
